<compile_context>
chip_gen: v6e
topology: v6e:2x2x1
jax: 0.10.0
libtpu: 0.0.40
codegen_flags: <defaults>
</compile_context>

<pallas_src>
import math
from functools import partial

import numpy as np
import jax
import jax.numpy as jnp
from jax import lax
from jax.experimental import pallas as pl
from jax.experimental.pallas import tpu as pltpu

KS = 5            # kernel_size
PAD = KS // 2


# --------------------------- Fused kernel (per batch) ------------------------
# Layout inside the kernel (per image):
#   xpad_ref : (C, PADL)  flattened zero-padded image, row stride Wp
#   out_ref  : (C, L)     strided-flat output, L = H*Wp; column m = y*Wp + x
def _samca_fused_kernel(xpad_ref, w_ref, s1_ref, sh1_ref, w1a_ref, w1b_ref,
                        s2_ref, sh2_ref, w2_ref, bm_ref, out_ref, *, Wp):
    C, L = out_ref.shape

    # ---- depthwise 5x5 conv (25 static taps = lane-offset slices) + BN1 + ReLU ----
    acc = jnp.zeros((C, L), jnp.float32)
    for t in range(KS * KS):                      # static unrolled MAC loop
        dy, dx = divmod(t, KS)
        off = dy * Wp + dx                        # flat offset in the padded image
        acc = acc + w_ref[t] * xpad_ref[:, off:off + L]
    k1 = jnp.maximum(acc * s1_ref[...] + sh1_ref[...], 0.0)

    # x (the "center tap" slice of the padded input) in strided-flat layout
    center = PAD * Wp + PAD
    xc = xpad_ref[:, center:center + L]

    # ---- attention_embed conv1 as two de-interleaved (C,C) MXU matmuls + BN2 + ReLU ----
    hidden = (jnp.dot(w1a_ref[...], k1, preferred_element_type=jnp.float32)
              + jnp.dot(w1b_ref[...], xc, preferred_element_type=jnp.float32))
    hidden = jnp.maximum(hidden * s2_ref[...] + sh2_ref[...], 0.0)

    # ---- attention logits (conv2, spa_head=1) + masked softmax over pixels ----
    # bm_ref = conv2 bias + (-1e30 on width-pad columns), pre-folded in the wrapper.
    att = jnp.dot(w2_ref[...], hidden, preferred_element_type=jnp.float32) + bm_ref[...]
    m = jnp.max(att, axis=-1, keepdims=True)
    p = jnp.exp(att - m)
    denom = jnp.sum(p, axis=-1, keepdims=True)
    a = p * pl.reciprocal(denom, approx=True)     # softmax over h*w (valid lanes)

    # ---- out = k1 + softmax(att) * x ----
    out_ref[...] = k1 + a * xc


# ----------------------------- Wrapper --------------------------------------
def samca_forward(x, p):
    bs, C, H, W = x.shape
    Hp, Wp = H + 2 * PAD, W + 2 * PAD
    L = H * Wp                                   # strided-flat output columns
    max_off = (KS - 1) * Wp + (KS - 1)
    padl = L + max_off                           # flat padded length the kernel reads

    xpad = jnp.pad(x, ((0, 0), (0, 0), (PAD, PAD), (PAD, PAD)))
    xflat = xpad.reshape(bs, C, Hp * Wp)
    xflat = jnp.pad(xflat, ((0, 0), (0, 0), (0, padl - Hp * Wp)))

    # conv2 bias + softmax validity mask folded into one additive (1, L) term
    col = jnp.arange(L, dtype=jnp.int32)
    mask = jnp.where((col % Wp) < W, 0.0, -1e30).astype(jnp.float32).reshape(1, L)
    biasmask = mask + p["b2"].reshape(1, 1)

    kernel = partial(_samca_fused_kernel, Wp=Wp)

    def full(shape):
        return pl.BlockSpec(shape, lambda b, _n=len(shape): (0,) * _n)

    out_s = pl.pallas_call(
        kernel,
        out_shape=jax.ShapeDtypeStruct((bs, C, L), jnp.float32),
        grid=(bs,),
        in_specs=[
            pl.BlockSpec((None, C, padl), lambda b: (b, 0, 0)),   # padded image (flat)
            full((KS * KS, C, 1)),                                # depthwise taps
            full((C, 1)), full((C, 1)),                           # BN1 scale / shift
            full((C, C)), full((C, C)),                           # de-interleaved 1x1 conv1
            full((C, 1)), full((C, 1)),                           # BN2 scale / shift
            full((1, C)),                                         # conv2 weight (spa_head=1)
            full((1, L)),                                         # bias + softmax mask
        ],
        out_specs=pl.BlockSpec((None, C, L), lambda b: (b, 0, 0)),
        compiler_params=pltpu.CompilerParams(
            dimension_semantics=("parallel",)),
    )(xflat, p["k_dw"], p["k_s1"], p["k_sh1"], p["k_w1a"], p["k_w1b"],
      p["k_s2"], p["k_sh2"], p["k_w2r"], biasmask)

    # strided-flat (C, H*Wp) -> NCHW (drop the width-pad garbage columns)
    return out_s.reshape(bs, C, H, Wp)[:, :, :, :W]


# ------------------------ Deterministic parameters ---------------------------
def init_params(key, dim=32, ks=KS, spa_head=1):
    eps = 1e-5
    keys = jax.random.split(key, 12)
    # key_embed: depthwise conv (dim, 1, ks, ks), BN1 (inference)
    dw = 0.2 * jax.random.normal(keys[0], (dim, 1, ks, ks), jnp.float32)
    g1 = 1.0 + 0.1 * jax.random.normal(keys[1], (dim,), jnp.float32)
    b1 = 0.1 * jax.random.normal(keys[2], (dim,), jnp.float32)
    m1 = 0.05 * jax.random.normal(keys[3], (dim,), jnp.float32)
    v1 = 1.0 + 0.2 * jax.random.uniform(keys[4], (dim,), jnp.float32)
    s1 = g1 / jnp.sqrt(v1 + eps)
    sh1 = b1 - m1 * s1
    # attention_embed: conv1 (dim, 2*dim, 1, 1), BN2, conv2 (spa_head, dim, 1, 1)+bias
    w1 = jax.random.normal(keys[5], (dim, 2 * dim), jnp.float32) / math.sqrt(2 * dim)
    g2 = 1.0 + 0.1 * jax.random.normal(keys[6], (dim,), jnp.float32)
    b2bn = 0.1 * jax.random.normal(keys[7], (dim,), jnp.float32)
    m2 = 0.05 * jax.random.normal(keys[8], (dim,), jnp.float32)
    v2 = 1.0 + 0.2 * jax.random.uniform(keys[9], (dim,), jnp.float32)
    s2 = g2 / jnp.sqrt(v2 + eps)
    sh2 = b2bn - m2 * s2
    w2 = jax.random.normal(keys[10], (spa_head, dim), jnp.float32) / math.sqrt(dim)
    b2 = 0.1 * jax.random.normal(keys[11], (spa_head,), jnp.float32)
    # De-interleaved conv1 weights: the original stack is k1_0, x_0, k1_1, x_1, ...
    # so even input channels act on k1 and odd input channels act on x.
    w1a = w1[:, 0::2]                                            # (dim, dim) -> k1
    w1b = w1[:, 1::2]                                            # (dim, dim) -> x
    return dict(
        # raw (PyTorch-layout) params for the pure-JAX reference
        dw=dw, bn1_scale=s1, bn1_shift=sh1, w1=w1,
        bn2_scale=s2, bn2_shift=sh2, w2=w2, b2=b2,
        # kernel-formatted params (channel-on-sublane layout)
        k_dw=jnp.transpose(dw[:, 0].reshape(dim, ks * ks), (1, 0)).reshape(ks * ks, dim, 1),
        k_s1=s1.reshape(dim, 1), k_sh1=sh1.reshape(dim, 1),
        k_w1a=w1a, k_w1b=w1b,
        k_s2=s2.reshape(dim, 1), k_sh2=sh2.reshape(dim, 1),
        k_w2r=w2.reshape(spa_head, dim),                         # (1, dim) for spa_head=1
    )


# ------------------------ Pure-JAX reference (NCHW) ---------------------------
def samca_reference(x, p):
    bs, C, H, W = x.shape
    dn = lax.conv_dimension_numbers(x.shape, p["dw"].shape, ("NCHW", "OIHW", "NCHW"))
    k1 = lax.conv_general_dilated(x, p["dw"], (1, 1), [(PAD, PAD), (PAD, PAD)],
                                  dimension_numbers=dn, feature_group_count=C,
                                  precision=lax.Precision.HIGHEST)
    k1 = jnp.maximum(k1 * p["bn1_scale"][None, :, None, None]
                     + p["bn1_shift"][None, :, None, None], 0.0)
    v = x.reshape(bs, C, -1)
    kq = jnp.stack((k1, x), 2).reshape(bs, 2 * C, H, W)
    hid = jnp.einsum("dc,bchw->bdhw", p["w1"], kq, precision=lax.Precision.HIGHEST)
    hid = jnp.maximum(hid * p["bn2_scale"][None, :, None, None]
                      + p["bn2_shift"][None, :, None, None], 0.0)
    att = jnp.einsum("oc,bchw->bohw", p["w2"], hid,
                     precision=lax.Precision.HIGHEST) + p["b2"][None, :, None, None]
    att = att.reshape(bs, 1, H * W)
    a = jax.nn.softmax(att, axis=-1)
    k2 = jnp.tile(a[:, :, None, :], (1, 1, C, 1)).reshape(bs, C, -1)   # spa_head=1
    k2 = (k2 * v).reshape(bs, C, H, W)
    return k1 + k2


if __name__ == "__main__":
    key = jax.random.PRNGKey(0)
    bs, dim, H, W = 2, 32, 16, 16
    params = init_params(key, dim=dim)
    x = jax.random.normal(jax.random.fold_in(key, 123), (bs, dim, H, W), jnp.float32)

    out = jax.block_until_ready(jax.jit(samca_forward)(x, params))
    ref = jax.block_until_ready(samca_reference(x, params))

    assert out.shape == (bs, dim, H, W) and out.dtype == jnp.float32
    np.testing.assert_allclose(np.asarray(out), np.asarray(ref), rtol=1e-2, atol=1e-3)
    print("KERNEL_OK")
</pallas_src>

<mosaic_0001>
module attributes {stable_mosaic.version = 11 : i64} {
  func.func @_samca_fused_kernel(%arg0: i32, %arg1: memref<1x32x404xf32, #tpu.memory_space<vmem>>, %arg2: memref<25x32x1xf32, #tpu.memory_space<vmem>>, %arg3: memref<32x1xf32, #tpu.memory_space<vmem>>, %arg4: memref<32x1xf32, #tpu.memory_space<vmem>>, %arg5: memref<32x32xf32, #tpu.memory_space<vmem>>, %arg6: memref<32x32xf32, #tpu.memory_space<vmem>>, %arg7: memref<32x1xf32, #tpu.memory_space<vmem>>, %arg8: memref<32x1xf32, #tpu.memory_space<vmem>>, %arg9: memref<1x32xf32, #tpu.memory_space<vmem>>, %arg10: memref<1x320xf32, #tpu.memory_space<vmem>>, %arg11: memref<1x32x320xf32, #tpu.memory_space<vmem>>) attributes {dimension_semantics = [#tpu.dimension_semantics<parallel>], iteration_bounds = array<i64: 2>, scalar_prefetch = 0 : i64, scratch_operands = 0 : i64, tpu.core_type = #tpu.core_type<tc>, window_params = [{transform_indices = @transform_0, window_bounds = array<i64: 1, 32, 404>}, {pipeline_mode = #tpu.pipeline_mode<synchronous>, transform_indices = @transform_1, window_bounds = array<i64: 25, 32, 1>}, {pipeline_mode = #tpu.pipeline_mode<synchronous>, transform_indices = @transform_2, window_bounds = array<i64: 32, 1>}, {pipeline_mode = #tpu.pipeline_mode<synchronous>, transform_indices = @transform_3, window_bounds = array<i64: 32, 1>}, {pipeline_mode = #tpu.pipeline_mode<synchronous>, transform_indices = @transform_4, window_bounds = array<i64: 32, 32>}, {pipeline_mode = #tpu.pipeline_mode<synchronous>, transform_indices = @transform_5, window_bounds = array<i64: 32, 32>}, {pipeline_mode = #tpu.pipeline_mode<synchronous>, transform_indices = @transform_6, window_bounds = array<i64: 32, 1>}, {pipeline_mode = #tpu.pipeline_mode<synchronous>, transform_indices = @transform_7, window_bounds = array<i64: 32, 1>}, {pipeline_mode = #tpu.pipeline_mode<synchronous>, transform_indices = @transform_8, window_bounds = array<i64: 1, 32>}, {pipeline_mode = #tpu.pipeline_mode<synchronous>, transform_indices = @transform_9, window_bounds = array<i64: 1, 320>}, {transform_indices = @transform_10, window_bounds = array<i64: 1, 32, 320>}]} {
    %cst = arith.constant 0.000000e+00 : f32
    %0 = vector.broadcast %cst : f32 to vector<32x320xf32>
    %c0 = arith.constant 0 : index
    %c0_0 = arith.constant 0 : index
    %c0_1 = arith.constant 0 : index
    %1 = vector.load %arg2[%c0, %c0_0, %c0_1] : memref<25x32x1xf32, #tpu.memory_space<vmem>>, vector<1x32x1xf32>
    %2 = vector.shape_cast %1 : vector<1x32x1xf32> to vector<32x1xf32>
    %c0_2 = arith.constant 0 : index
    %c0_3 = arith.constant 0 : index
    %c0_4 = arith.constant 0 : index
    %3 = vector.load %arg1[%c0_2, %c0_3, %c0_4] : memref<1x32x404xf32, #tpu.memory_space<vmem>>, vector<1x32x320xf32>
    %4 = vector.shape_cast %3 : vector<1x32x320xf32> to vector<32x320xf32>
    %5 = vector.broadcast %2 : vector<32x1xf32> to vector<32x320xf32>
    %6 = arith.mulf %5, %4 : vector<32x320xf32>
    %7 = arith.addf %0, %6 : vector<32x320xf32>
    %c1 = arith.constant 1 : index
    %c0_5 = arith.constant 0 : index
    %c0_6 = arith.constant 0 : index
    %8 = vector.load %arg2[%c1, %c0_5, %c0_6] : memref<25x32x1xf32, #tpu.memory_space<vmem>>, vector<1x32x1xf32>
    %9 = vector.shape_cast %8 : vector<1x32x1xf32> to vector<32x1xf32>
    %c0_7 = arith.constant 0 : index
    %c0_8 = arith.constant 0 : index
    %c1_9 = arith.constant 1 : index
    %10 = vector.load %arg1[%c0_7, %c0_8, %c1_9] : memref<1x32x404xf32, #tpu.memory_space<vmem>>, vector<1x32x320xf32>
    %11 = vector.shape_cast %10 : vector<1x32x320xf32> to vector<32x320xf32>
    %12 = vector.broadcast %9 : vector<32x1xf32> to vector<32x320xf32>
    %13 = arith.mulf %12, %11 : vector<32x320xf32>
    %14 = arith.addf %7, %13 : vector<32x320xf32>
    %c2 = arith.constant 2 : index
    %c0_10 = arith.constant 0 : index
    %c0_11 = arith.constant 0 : index
    %15 = vector.load %arg2[%c2, %c0_10, %c0_11] : memref<25x32x1xf32, #tpu.memory_space<vmem>>, vector<1x32x1xf32>
    %16 = vector.shape_cast %15 : vector<1x32x1xf32> to vector<32x1xf32>
    %c0_12 = arith.constant 0 : index
    %c0_13 = arith.constant 0 : index
    %c2_14 = arith.constant 2 : index
    %17 = vector.load %arg1[%c0_12, %c0_13, %c2_14] : memref<1x32x404xf32, #tpu.memory_space<vmem>>, vector<1x32x320xf32>
    %18 = vector.shape_cast %17 : vector<1x32x320xf32> to vector<32x320xf32>
    %19 = vector.broadcast %16 : vector<32x1xf32> to vector<32x320xf32>
    %20 = arith.mulf %19, %18 : vector<32x320xf32>
    %21 = arith.addf %14, %20 : vector<32x320xf32>
    %c3 = arith.constant 3 : index
    %c0_15 = arith.constant 0 : index
    %c0_16 = arith.constant 0 : index
    %22 = vector.load %arg2[%c3, %c0_15, %c0_16] : memref<25x32x1xf32, #tpu.memory_space<vmem>>, vector<1x32x1xf32>
    %23 = vector.shape_cast %22 : vector<1x32x1xf32> to vector<32x1xf32>
    %c0_17 = arith.constant 0 : index
    %c0_18 = arith.constant 0 : index
    %c3_19 = arith.constant 3 : index
    %24 = vector.load %arg1[%c0_17, %c0_18, %c3_19] : memref<1x32x404xf32, #tpu.memory_space<vmem>>, vector<1x32x320xf32>
    %25 = vector.shape_cast %24 : vector<1x32x320xf32> to vector<32x320xf32>
    %26 = vector.broadcast %23 : vector<32x1xf32> to vector<32x320xf32>
    %27 = arith.mulf %26, %25 : vector<32x320xf32>
    %28 = arith.addf %21, %27 : vector<32x320xf32>
    %c4 = arith.constant 4 : index
    %c0_20 = arith.constant 0 : index
    %c0_21 = arith.constant 0 : index
    %29 = vector.load %arg2[%c4, %c0_20, %c0_21] : memref<25x32x1xf32, #tpu.memory_space<vmem>>, vector<1x32x1xf32>
    %30 = vector.shape_cast %29 : vector<1x32x1xf32> to vector<32x1xf32>
    %c0_22 = arith.constant 0 : index
    %c0_23 = arith.constant 0 : index
    %c4_24 = arith.constant 4 : index
    %31 = vector.load %arg1[%c0_22, %c0_23, %c4_24] : memref<1x32x404xf32, #tpu.memory_space<vmem>>, vector<1x32x320xf32>
    %32 = vector.shape_cast %31 : vector<1x32x320xf32> to vector<32x320xf32>
    %33 = vector.broadcast %30 : vector<32x1xf32> to vector<32x320xf32>
    %34 = arith.mulf %33, %32 : vector<32x320xf32>
    %35 = arith.addf %28, %34 : vector<32x320xf32>
    %c5 = arith.constant 5 : index
    %c0_25 = arith.constant 0 : index
    %c0_26 = arith.constant 0 : index
    %36 = vector.load %arg2[%c5, %c0_25, %c0_26] : memref<25x32x1xf32, #tpu.memory_space<vmem>>, vector<1x32x1xf32>
    %37 = vector.shape_cast %36 : vector<1x32x1xf32> to vector<32x1xf32>
    %c0_27 = arith.constant 0 : index
    %c0_28 = arith.constant 0 : index
    %c20 = arith.constant 20 : index
    %38 = vector.load %arg1[%c0_27, %c0_28, %c20] : memref<1x32x404xf32, #tpu.memory_space<vmem>>, vector<1x32x320xf32>
    %39 = vector.shape_cast %38 : vector<1x32x320xf32> to vector<32x320xf32>
    %40 = vector.broadcast %37 : vector<32x1xf32> to vector<32x320xf32>
    %41 = arith.mulf %40, %39 : vector<32x320xf32>
    %42 = arith.addf %35, %41 : vector<32x320xf32>
    %c6 = arith.constant 6 : index
    %c0_29 = arith.constant 0 : index
    %c0_30 = arith.constant 0 : index
    %43 = vector.load %arg2[%c6, %c0_29, %c0_30] : memref<25x32x1xf32, #tpu.memory_space<vmem>>, vector<1x32x1xf32>
    %44 = vector.shape_cast %43 : vector<1x32x1xf32> to vector<32x1xf32>
    %c0_31 = arith.constant 0 : index
    %c0_32 = arith.constant 0 : index
    %c21 = arith.constant 21 : index
    %45 = vector.load %arg1[%c0_31, %c0_32, %c21] : memref<1x32x404xf32, #tpu.memory_space<vmem>>, vector<1x32x320xf32>
    %46 = vector.shape_cast %45 : vector<1x32x320xf32> to vector<32x320xf32>
    %47 = vector.broadcast %44 : vector<32x1xf32> to vector<32x320xf32>
    %48 = arith.mulf %47, %46 : vector<32x320xf32>
    %49 = arith.addf %42, %48 : vector<32x320xf32>
    %c7 = arith.constant 7 : index
    %c0_33 = arith.constant 0 : index
    %c0_34 = arith.constant 0 : index
    %50 = vector.load %arg2[%c7, %c0_33, %c0_34] : memref<25x32x1xf32, #tpu.memory_space<vmem>>, vector<1x32x1xf32>
    %51 = vector.shape_cast %50 : vector<1x32x1xf32> to vector<32x1xf32>
    %c0_35 = arith.constant 0 : index
    %c0_36 = arith.constant 0 : index
    %c22 = arith.constant 22 : index
    %52 = vector.load %arg1[%c0_35, %c0_36, %c22] : memref<1x32x404xf32, #tpu.memory_space<vmem>>, vector<1x32x320xf32>
    %53 = vector.shape_cast %52 : vector<1x32x320xf32> to vector<32x320xf32>
    %54 = vector.broadcast %51 : vector<32x1xf32> to vector<32x320xf32>
    %55 = arith.mulf %54, %53 : vector<32x320xf32>
    %56 = arith.addf %49, %55 : vector<32x320xf32>
    %c8 = arith.constant 8 : index
    %c0_37 = arith.constant 0 : index
    %c0_38 = arith.constant 0 : index
    %57 = vector.load %arg2[%c8, %c0_37, %c0_38] : memref<25x32x1xf32, #tpu.memory_space<vmem>>, vector<1x32x1xf32>
    %58 = vector.shape_cast %57 : vector<1x32x1xf32> to vector<32x1xf32>
    %c0_39 = arith.constant 0 : index
    %c0_40 = arith.constant 0 : index
    %c23 = arith.constant 23 : index
    %59 = vector.load %arg1[%c0_39, %c0_40, %c23] : memref<1x32x404xf32, #tpu.memory_space<vmem>>, vector<1x32x320xf32>
    %60 = vector.shape_cast %59 : vector<1x32x320xf32> to vector<32x320xf32>
    %61 = vector.broadcast %58 : vector<32x1xf32> to vector<32x320xf32>
    %62 = arith.mulf %61, %60 : vector<32x320xf32>
    %63 = arith.addf %56, %62 : vector<32x320xf32>
    %c9 = arith.constant 9 : index
    %c0_41 = arith.constant 0 : index
    %c0_42 = arith.constant 0 : index
    %64 = vector.load %arg2[%c9, %c0_41, %c0_42] : memref<25x32x1xf32, #tpu.memory_space<vmem>>, vector<1x32x1xf32>
    %65 = vector.shape_cast %64 : vector<1x32x1xf32> to vector<32x1xf32>
    %c0_43 = arith.constant 0 : index
    %c0_44 = arith.constant 0 : index
    %c24 = arith.constant 24 : index
    %66 = vector.load %arg1[%c0_43, %c0_44, %c24] : memref<1x32x404xf32, #tpu.memory_space<vmem>>, vector<1x32x320xf32>
    %67 = vector.shape_cast %66 : vector<1x32x320xf32> to vector<32x320xf32>
    %68 = vector.broadcast %65 : vector<32x1xf32> to vector<32x320xf32>
    %69 = arith.mulf %68, %67 : vector<32x320xf32>
    %70 = arith.addf %63, %69 : vector<32x320xf32>
    %c10 = arith.constant 10 : index
    %c0_45 = arith.constant 0 : index
    %c0_46 = arith.constant 0 : index
    %71 = vector.load %arg2[%c10, %c0_45, %c0_46] : memref<25x32x1xf32, #tpu.memory_space<vmem>>, vector<1x32x1xf32>
    %72 = vector.shape_cast %71 : vector<1x32x1xf32> to vector<32x1xf32>
    %c0_47 = arith.constant 0 : index
    %c0_48 = arith.constant 0 : index
    %c40 = arith.constant 40 : index
    %73 = vector.load %arg1[%c0_47, %c0_48, %c40] : memref<1x32x404xf32, #tpu.memory_space<vmem>>, vector<1x32x320xf32>
    %74 = vector.shape_cast %73 : vector<1x32x320xf32> to vector<32x320xf32>
    %75 = vector.broadcast %72 : vector<32x1xf32> to vector<32x320xf32>
    %76 = arith.mulf %75, %74 : vector<32x320xf32>
    %77 = arith.addf %70, %76 : vector<32x320xf32>
    %c11 = arith.constant 11 : index
    %c0_49 = arith.constant 0 : index
    %c0_50 = arith.constant 0 : index
    %78 = vector.load %arg2[%c11, %c0_49, %c0_50] : memref<25x32x1xf32, #tpu.memory_space<vmem>>, vector<1x32x1xf32>
    %79 = vector.shape_cast %78 : vector<1x32x1xf32> to vector<32x1xf32>
    %c0_51 = arith.constant 0 : index
    %c0_52 = arith.constant 0 : index
    %c41 = arith.constant 41 : index
    %80 = vector.load %arg1[%c0_51, %c0_52, %c41] : memref<1x32x404xf32, #tpu.memory_space<vmem>>, vector<1x32x320xf32>
    %81 = vector.shape_cast %80 : vector<1x32x320xf32> to vector<32x320xf32>
    %82 = vector.broadcast %79 : vector<32x1xf32> to vector<32x320xf32>
    %83 = arith.mulf %82, %81 : vector<32x320xf32>
    %84 = arith.addf %77, %83 : vector<32x320xf32>
    %c12 = arith.constant 12 : index
    %c0_53 = arith.constant 0 : index
    %c0_54 = arith.constant 0 : index
    %85 = vector.load %arg2[%c12, %c0_53, %c0_54] : memref<25x32x1xf32, #tpu.memory_space<vmem>>, vector<1x32x1xf32>
    %86 = vector.shape_cast %85 : vector<1x32x1xf32> to vector<32x1xf32>
    %c0_55 = arith.constant 0 : index
    %c0_56 = arith.constant 0 : index
    %c42 = arith.constant 42 : index
    %87 = vector.load %arg1[%c0_55, %c0_56, %c42] : memref<1x32x404xf32, #tpu.memory_space<vmem>>, vector<1x32x320xf32>
    %88 = vector.shape_cast %87 : vector<1x32x320xf32> to vector<32x320xf32>
    %89 = vector.broadcast %86 : vector<32x1xf32> to vector<32x320xf32>
    %90 = arith.mulf %89, %88 : vector<32x320xf32>
    %91 = arith.addf %84, %90 : vector<32x320xf32>
    %c13 = arith.constant 13 : index
    %c0_57 = arith.constant 0 : index
    %c0_58 = arith.constant 0 : index
    %92 = vector.load %arg2[%c13, %c0_57, %c0_58] : memref<25x32x1xf32, #tpu.memory_space<vmem>>, vector<1x32x1xf32>
    %93 = vector.shape_cast %92 : vector<1x32x1xf32> to vector<32x1xf32>
    %c0_59 = arith.constant 0 : index
    %c0_60 = arith.constant 0 : index
    %c43 = arith.constant 43 : index
    %94 = vector.load %arg1[%c0_59, %c0_60, %c43] : memref<1x32x404xf32, #tpu.memory_space<vmem>>, vector<1x32x320xf32>
    %95 = vector.shape_cast %94 : vector<1x32x320xf32> to vector<32x320xf32>
    %96 = vector.broadcast %93 : vector<32x1xf32> to vector<32x320xf32>
    %97 = arith.mulf %96, %95 : vector<32x320xf32>
    %98 = arith.addf %91, %97 : vector<32x320xf32>
    %c14 = arith.constant 14 : index
    %c0_61 = arith.constant 0 : index
    %c0_62 = arith.constant 0 : index
    %99 = vector.load %arg2[%c14, %c0_61, %c0_62] : memref<25x32x1xf32, #tpu.memory_space<vmem>>, vector<1x32x1xf32>
    %100 = vector.shape_cast %99 : vector<1x32x1xf32> to vector<32x1xf32>
    %c0_63 = arith.constant 0 : index
    %c0_64 = arith.constant 0 : index
    %c44 = arith.constant 44 : index
    %101 = vector.load %arg1[%c0_63, %c0_64, %c44] : memref<1x32x404xf32, #tpu.memory_space<vmem>>, vector<1x32x320xf32>
    %102 = vector.shape_cast %101 : vector<1x32x320xf32> to vector<32x320xf32>
    %103 = vector.broadcast %100 : vector<32x1xf32> to vector<32x320xf32>
    %104 = arith.mulf %103, %102 : vector<32x320xf32>
    %105 = arith.addf %98, %104 : vector<32x320xf32>
    %c15 = arith.constant 15 : index
    %c0_65 = arith.constant 0 : index
    %c0_66 = arith.constant 0 : index
    %106 = vector.load %arg2[%c15, %c0_65, %c0_66] : memref<25x32x1xf32, #tpu.memory_space<vmem>>, vector<1x32x1xf32>
    %107 = vector.shape_cast %106 : vector<1x32x1xf32> to vector<32x1xf32>
    %c0_67 = arith.constant 0 : index
    %c0_68 = arith.constant 0 : index
    %c60 = arith.constant 60 : index
    %108 = vector.load %arg1[%c0_67, %c0_68, %c60] : memref<1x32x404xf32, #tpu.memory_space<vmem>>, vector<1x32x320xf32>
    %109 = vector.shape_cast %108 : vector<1x32x320xf32> to vector<32x320xf32>
    %110 = vector.broadcast %107 : vector<32x1xf32> to vector<32x320xf32>
    %111 = arith.mulf %110, %109 : vector<32x320xf32>
    %112 = arith.addf %105, %111 : vector<32x320xf32>
    %c16 = arith.constant 16 : index
    %c0_69 = arith.constant 0 : index
    %c0_70 = arith.constant 0 : index
    %113 = vector.load %arg2[%c16, %c0_69, %c0_70] : memref<25x32x1xf32, #tpu.memory_space<vmem>>, vector<1x32x1xf32>
    %114 = vector.shape_cast %113 : vector<1x32x1xf32> to vector<32x1xf32>
    %c0_71 = arith.constant 0 : index
    %c0_72 = arith.constant 0 : index
    %c61 = arith.constant 61 : index
    %115 = vector.load %arg1[%c0_71, %c0_72, %c61] : memref<1x32x404xf32, #tpu.memory_space<vmem>>, vector<1x32x320xf32>
    %116 = vector.shape_cast %115 : vector<1x32x320xf32> to vector<32x320xf32>
    %117 = vector.broadcast %114 : vector<32x1xf32> to vector<32x320xf32>
    %118 = arith.mulf %117, %116 : vector<32x320xf32>
    %119 = arith.addf %112, %118 : vector<32x320xf32>
    %c17 = arith.constant 17 : index
    %c0_73 = arith.constant 0 : index
    %c0_74 = arith.constant 0 : index
    %120 = vector.load %arg2[%c17, %c0_73, %c0_74] : memref<25x32x1xf32, #tpu.memory_space<vmem>>, vector<1x32x1xf32>
    %121 = vector.shape_cast %120 : vector<1x32x1xf32> to vector<32x1xf32>
    %c0_75 = arith.constant 0 : index
    %c0_76 = arith.constant 0 : index
    %c62 = arith.constant 62 : index
    %122 = vector.load %arg1[%c0_75, %c0_76, %c62] : memref<1x32x404xf32, #tpu.memory_space<vmem>>, vector<1x32x320xf32>
    %123 = vector.shape_cast %122 : vector<1x32x320xf32> to vector<32x320xf32>
    %124 = vector.broadcast %121 : vector<32x1xf32> to vector<32x320xf32>
    %125 = arith.mulf %124, %123 : vector<32x320xf32>
    %126 = arith.addf %119, %125 : vector<32x320xf32>
    %c18 = arith.constant 18 : index
    %c0_77 = arith.constant 0 : index
    %c0_78 = arith.constant 0 : index
    %127 = vector.load %arg2[%c18, %c0_77, %c0_78] : memref<25x32x1xf32, #tpu.memory_space<vmem>>, vector<1x32x1xf32>
    %128 = vector.shape_cast %127 : vector<1x32x1xf32> to vector<32x1xf32>
    %c0_79 = arith.constant 0 : index
    %c0_80 = arith.constant 0 : index
    %c63 = arith.constant 63 : index
    %129 = vector.load %arg1[%c0_79, %c0_80, %c63] : memref<1x32x404xf32, #tpu.memory_space<vmem>>, vector<1x32x320xf32>
    %130 = vector.shape_cast %129 : vector<1x32x320xf32> to vector<32x320xf32>
    %131 = vector.broadcast %128 : vector<32x1xf32> to vector<32x320xf32>
    %132 = arith.mulf %131, %130 : vector<32x320xf32>
    %133 = arith.addf %126, %132 : vector<32x320xf32>
    %c19 = arith.constant 19 : index
    %c0_81 = arith.constant 0 : index
    %c0_82 = arith.constant 0 : index
    %134 = vector.load %arg2[%c19, %c0_81, %c0_82] : memref<25x32x1xf32, #tpu.memory_space<vmem>>, vector<1x32x1xf32>
    %135 = vector.shape_cast %134 : vector<1x32x1xf32> to vector<32x1xf32>
    %c0_83 = arith.constant 0 : index
    %c0_84 = arith.constant 0 : index
    %c64 = arith.constant 64 : index
    %136 = vector.load %arg1[%c0_83, %c0_84, %c64] : memref<1x32x404xf32, #tpu.memory_space<vmem>>, vector<1x32x320xf32>
    %137 = vector.shape_cast %136 : vector<1x32x320xf32> to vector<32x320xf32>
    %138 = vector.broadcast %135 : vector<32x1xf32> to vector<32x320xf32>
    %139 = arith.mulf %138, %137 : vector<32x320xf32>
    %140 = arith.addf %133, %139 : vector<32x320xf32>
    %c20_85 = arith.constant 20 : index
    %c0_86 = arith.constant 0 : index
    %c0_87 = arith.constant 0 : index
    %141 = vector.load %arg2[%c20_85, %c0_86, %c0_87] : memref<25x32x1xf32, #tpu.memory_space<vmem>>, vector<1x32x1xf32>
    %142 = vector.shape_cast %141 : vector<1x32x1xf32> to vector<32x1xf32>
    %c0_88 = arith.constant 0 : index
    %c0_89 = arith.constant 0 : index
    %c80 = arith.constant 80 : index
    %143 = vector.load %arg1[%c0_88, %c0_89, %c80] : memref<1x32x404xf32, #tpu.memory_space<vmem>>, vector<1x32x320xf32>
    %144 = vector.shape_cast %143 : vector<1x32x320xf32> to vector<32x320xf32>
    %145 = vector.broadcast %142 : vector<32x1xf32> to vector<32x320xf32>
    %146 = arith.mulf %145, %144 : vector<32x320xf32>
    %147 = arith.addf %140, %146 : vector<32x320xf32>
    %c21_90 = arith.constant 21 : index
    %c0_91 = arith.constant 0 : index
    %c0_92 = arith.constant 0 : index
    %148 = vector.load %arg2[%c21_90, %c0_91, %c0_92] : memref<25x32x1xf32, #tpu.memory_space<vmem>>, vector<1x32x1xf32>
    %149 = vector.shape_cast %148 : vector<1x32x1xf32> to vector<32x1xf32>
    %c0_93 = arith.constant 0 : index
    %c0_94 = arith.constant 0 : index
    %c81 = arith.constant 81 : index
    %150 = vector.load %arg1[%c0_93, %c0_94, %c81] : memref<1x32x404xf32, #tpu.memory_space<vmem>>, vector<1x32x320xf32>
    %151 = vector.shape_cast %150 : vector<1x32x320xf32> to vector<32x320xf32>
    %152 = vector.broadcast %149 : vector<32x1xf32> to vector<32x320xf32>
    %153 = arith.mulf %152, %151 : vector<32x320xf32>
    %154 = arith.addf %147, %153 : vector<32x320xf32>
    %c22_95 = arith.constant 22 : index
    %c0_96 = arith.constant 0 : index
    %c0_97 = arith.constant 0 : index
    %155 = vector.load %arg2[%c22_95, %c0_96, %c0_97] : memref<25x32x1xf32, #tpu.memory_space<vmem>>, vector<1x32x1xf32>
    %156 = vector.shape_cast %155 : vector<1x32x1xf32> to vector<32x1xf32>
    %c0_98 = arith.constant 0 : index
    %c0_99 = arith.constant 0 : index
    %c82 = arith.constant 82 : index
    %157 = vector.load %arg1[%c0_98, %c0_99, %c82] : memref<1x32x404xf32, #tpu.memory_space<vmem>>, vector<1x32x320xf32>
    %158 = vector.shape_cast %157 : vector<1x32x320xf32> to vector<32x320xf32>
    %159 = vector.broadcast %156 : vector<32x1xf32> to vector<32x320xf32>
    %160 = arith.mulf %159, %158 : vector<32x320xf32>
    %161 = arith.addf %154, %160 : vector<32x320xf32>
    %c23_100 = arith.constant 23 : index
    %c0_101 = arith.constant 0 : index
    %c0_102 = arith.constant 0 : index
    %162 = vector.load %arg2[%c23_100, %c0_101, %c0_102] : memref<25x32x1xf32, #tpu.memory_space<vmem>>, vector<1x32x1xf32>
    %163 = vector.shape_cast %162 : vector<1x32x1xf32> to vector<32x1xf32>
    %c0_103 = arith.constant 0 : index
    %c0_104 = arith.constant 0 : index
    %c83 = arith.constant 83 : index
    %164 = vector.load %arg1[%c0_103, %c0_104, %c83] : memref<1x32x404xf32, #tpu.memory_space<vmem>>, vector<1x32x320xf32>
    %165 = vector.shape_cast %164 : vector<1x32x320xf32> to vector<32x320xf32>
    %166 = vector.broadcast %163 : vector<32x1xf32> to vector<32x320xf32>
    %167 = arith.mulf %166, %165 : vector<32x320xf32>
    %168 = arith.addf %161, %167 : vector<32x320xf32>
    %c24_105 = arith.constant 24 : index
    %c0_106 = arith.constant 0 : index
    %c0_107 = arith.constant 0 : index
    %169 = vector.load %arg2[%c24_105, %c0_106, %c0_107] : memref<25x32x1xf32, #tpu.memory_space<vmem>>, vector<1x32x1xf32>
    %170 = vector.shape_cast %169 : vector<1x32x1xf32> to vector<32x1xf32>
    %c0_108 = arith.constant 0 : index
    %c0_109 = arith.constant 0 : index
    %c84 = arith.constant 84 : index
    %171 = vector.load %arg1[%c0_108, %c0_109, %c84] : memref<1x32x404xf32, #tpu.memory_space<vmem>>, vector<1x32x320xf32>
    %172 = vector.shape_cast %171 : vector<1x32x320xf32> to vector<32x320xf32>
    %173 = vector.broadcast %170 : vector<32x1xf32> to vector<32x320xf32>
    %174 = arith.mulf %173, %172 : vector<32x320xf32>
    %175 = arith.addf %168, %174 : vector<32x320xf32>
    %c0_110 = arith.constant 0 : index
    %c0_111 = arith.constant 0 : index
    %176 = vector.load %arg3[%c0_110, %c0_111] : memref<32x1xf32, #tpu.memory_space<vmem>>, vector<32x1xf32>
    %177 = vector.broadcast %176 : vector<32x1xf32> to vector<32x320xf32>
    %178 = arith.mulf %175, %177 : vector<32x320xf32>
    %c0_112 = arith.constant 0 : index
    %c0_113 = arith.constant 0 : index
    %179 = vector.load %arg4[%c0_112, %c0_113] : memref<32x1xf32, #tpu.memory_space<vmem>>, vector<32x1xf32>
    %180 = vector.broadcast %179 : vector<32x1xf32> to vector<32x320xf32>
    %181 = arith.addf %178, %180 : vector<32x320xf32>
    %cst_114 = arith.constant 0.000000e+00 : f32
    %182 = vector.broadcast %cst_114 : f32 to vector<32x320xf32>
    %183 = arith.maximumf %181, %182 : vector<32x320xf32>
    %c0_115 = arith.constant 0 : index
    %c0_116 = arith.constant 0 : index
    %c42_117 = arith.constant 42 : index
    %184 = vector.load %arg1[%c0_115, %c0_116, %c42_117] : memref<1x32x404xf32, #tpu.memory_space<vmem>>, vector<1x32x320xf32>
    %185 = vector.shape_cast %184 : vector<1x32x320xf32> to vector<32x320xf32>
    %c0_118 = arith.constant 0 : index
    %c0_119 = arith.constant 0 : index
    %186 = vector.load %arg5[%c0_118, %c0_119] : memref<32x32xf32, #tpu.memory_space<vmem>>, vector<32x32xf32>
    %cst_120 = arith.constant dense<0.000000e+00> : vector<32x320xf32>
    %187 = tpu.matmul %186, %183, %cst_120 {dimension_numbers = #tpu.dot_dimension_numbers<[1], [0], [0], [1], [0, 0, 1, 1], [], []>} : vector<32x32xf32>, vector<32x320xf32>, vector<32x320xf32> -> vector<32x320xf32>
    %c0_121 = arith.constant 0 : index
    %c0_122 = arith.constant 0 : index
    %188 = vector.load %arg6[%c0_121, %c0_122] : memref<32x32xf32, #tpu.memory_space<vmem>>, vector<32x32xf32>
    %cst_123 = arith.constant dense<0.000000e+00> : vector<32x320xf32>
    %189 = tpu.matmul %188, %185, %cst_123 {dimension_numbers = #tpu.dot_dimension_numbers<[1], [0], [0], [1], [0, 0, 1, 1], [], []>} : vector<32x32xf32>, vector<32x320xf32>, vector<32x320xf32> -> vector<32x320xf32>
    %190 = arith.addf %187, %189 : vector<32x320xf32>
    %c0_124 = arith.constant 0 : index
    %c0_125 = arith.constant 0 : index
    %191 = vector.load %arg7[%c0_124, %c0_125] : memref<32x1xf32, #tpu.memory_space<vmem>>, vector<32x1xf32>
    %192 = vector.broadcast %191 : vector<32x1xf32> to vector<32x320xf32>
    %193 = arith.mulf %190, %192 : vector<32x320xf32>
    %c0_126 = arith.constant 0 : index
    %c0_127 = arith.constant 0 : index
    %194 = vector.load %arg8[%c0_126, %c0_127] : memref<32x1xf32, #tpu.memory_space<vmem>>, vector<32x1xf32>
    %195 = vector.broadcast %194 : vector<32x1xf32> to vector<32x320xf32>
    %196 = arith.addf %193, %195 : vector<32x320xf32>
    %cst_128 = arith.constant 0.000000e+00 : f32
    %197 = vector.broadcast %cst_128 : f32 to vector<32x320xf32>
    %198 = arith.maximumf %196, %197 : vector<32x320xf32>
    %c0_129 = arith.constant 0 : index
    %c0_130 = arith.constant 0 : index
    %199 = vector.load %arg9[%c0_129, %c0_130] : memref<1x32xf32, #tpu.memory_space<vmem>>, vector<1x32xf32>
    %cst_131 = arith.constant dense<0.000000e+00> : vector<1x320xf32>
    %200 = tpu.matmul %199, %198, %cst_131 {dimension_numbers = #tpu.dot_dimension_numbers<[1], [0], [0], [1], [0, 0, 1, 1], [], []>} : vector<1x32xf32>, vector<32x320xf32>, vector<1x320xf32> -> vector<1x320xf32>
    %c0_132 = arith.constant 0 : index
    %c0_133 = arith.constant 0 : index
    %201 = vector.load %arg10[%c0_132, %c0_133] : memref<1x320xf32, #tpu.memory_space<vmem>>, vector<1x320xf32>
    %202 = arith.addf %200, %201 : vector<1x320xf32>
    %cst_134 = arith.constant dense<0xFF800000> : vector<1xf32>
    %203 = vector.multi_reduction <maximumf>, %202, %cst_134 [1] : vector<1x320xf32> to vector<1xf32>
    %204 = vector.shape_cast %203 : vector<1xf32> to vector<1x1xf32>
    %205 = vector.broadcast %204 : vector<1x1xf32> to vector<1x320xf32>
    %206 = arith.subf %202, %205 : vector<1x320xf32>
    %207 = math.exp %206 : vector<1x320xf32>
    %cst_135 = arith.constant dense<0.000000e+00> : vector<1xf32>
    %208 = vector.multi_reduction <add>, %207, %cst_135 [1] : vector<1x320xf32> to vector<1xf32>
    %209 = vector.shape_cast %208 : vector<1xf32> to vector<1x1xf32>
    %210 = tpu.reciprocal %209 {approx = true} : vector<1x1xf32> -> vector<1x1xf32>
    %211 = vector.broadcast %210 : vector<1x1xf32> to vector<1x320xf32>
    %212 = arith.mulf %207, %211 : vector<1x320xf32>
    %213 = vector.broadcast %212 : vector<1x320xf32> to vector<32x320xf32>
    %214 = arith.mulf %213, %185 : vector<32x320xf32>
    %215 = arith.addf %183, %214 : vector<32x320xf32>
    %c0_136 = arith.constant 0 : index
    %c0_137 = arith.constant 0 : index
    %c0_138 = arith.constant 0 : index
    %216 = vector.load %arg11[%c0_136, %c0_137, %c0_138] : memref<1x32x320xf32, #tpu.memory_space<vmem>>, vector<1x32x320xf32>
    %217 = vector.shape_cast %216 : vector<1x32x320xf32> to vector<32x320xf32>
    %218 = vector.shape_cast %215 : vector<32x320xf32> to vector<1x32x320xf32>
    tpu.vector_store %arg11[%c0_136, %c0_137, %c0_138], %218 {strides = array<i32>} : memref<1x32x320xf32, #tpu.memory_space<vmem>>, vector<1x32x320xf32>,
    return
  }
  func.func @transform_0(%arg0: i32) -> (i32, i32, i32) {
    %c0_i32 = arith.constant 0 : i32
    %c0_i32_0 = arith.constant 0 : i32
    %c0_i32_1 = arith.constant 0 : i32
    return %arg0, %c0_i32, %c0_i32_0 : i32, i32, i32
  }
  func.func @transform_1(%arg0: i32) -> (i32, i32, i32) {
    %c0_i32 = arith.constant 0 : i32
    %c0_i32_0 = arith.constant 0 : i32
    %c0_i32_1 = arith.constant 0 : i32
    %c0_i32_2 = arith.constant 0 : i32
    return %c0_i32, %c0_i32_0, %c0_i32_1 : i32, i32, i32
  }
  func.func @transform_2(%arg0: i32) -> (i32, i32) {
    %c0_i32 = arith.constant 0 : i32
    %c0_i32_0 = arith.constant 0 : i32
    %c0_i32_1 = arith.constant 0 : i32
    return %c0_i32, %c0_i32_0 : i32, i32
  }
  func.func @transform_3(%arg0: i32) -> (i32, i32) {
    %c0_i32 = arith.constant 0 : i32
    %c0_i32_0 = arith.constant 0 : i32
    %c0_i32_1 = arith.constant 0 : i32
    return %c0_i32, %c0_i32_0 : i32, i32
  }
  func.func @transform_4(%arg0: i32) -> (i32, i32) {
    %c0_i32 = arith.constant 0 : i32
    %c0_i32_0 = arith.constant 0 : i32
    %c0_i32_1 = arith.constant 0 : i32
    return %c0_i32, %c0_i32_0 : i32, i32
  }
  func.func @transform_5(%arg0: i32) -> (i32, i32) {
    %c0_i32 = arith.constant 0 : i32
    %c0_i32_0 = arith.constant 0 : i32
    %c0_i32_1 = arith.constant 0 : i32
    return %c0_i32, %c0_i32_0 : i32, i32
  }
  func.func @transform_6(%arg0: i32) -> (i32, i32) {
    %c0_i32 = arith.constant 0 : i32
    %c0_i32_0 = arith.constant 0 : i32
    %c0_i32_1 = arith.constant 0 : i32
    return %c0_i32, %c0_i32_0 : i32, i32
  }
  func.func @transform_7(%arg0: i32) -> (i32, i32) {
    %c0_i32 = arith.constant 0 : i32
    %c0_i32_0 = arith.constant 0 : i32
    %c0_i32_1 = arith.constant 0 : i32
    return %c0_i32, %c0_i32_0 : i32, i32
  }
  func.func @transform_8(%arg0: i32) -> (i32, i32) {
    %c0_i32 = arith.constant 0 : i32
    %c0_i32_0 = arith.constant 0 : i32
    %c0_i32_1 = arith.constant 0 : i32
    return %c0_i32, %c0_i32_0 : i32, i32
  }
  func.func @transform_9(%arg0: i32) -> (i32, i32) {
    %c0_i32 = arith.constant 0 : i32
    %c0_i32_0 = arith.constant 0 : i32
    %c0_i32_1 = arith.constant 0 : i32
    return %c0_i32, %c0_i32_0 : i32, i32
  }
  func.func @transform_10(%arg0: i32) -> (i32, i32, i32) {
    %c0_i32 = arith.constant 0 : i32
    %c0_i32_0 = arith.constant 0 : i32
    %c0_i32_1 = arith.constant 0 : i32
    return %arg0, %c0_i32, %c0_i32_0 : i32, i32, i32
  }
}

</mosaic_0001>

<bundles_post_ra>
// kernel: samca_forward.1
= control target key start
LH: loop header
LB: loop body
LE: loop exit
PB: predicated region body
PF: predicated region fallthrough
CT: control target
= control target key end

     0   :  { %s4326_s13 = smov 0   ;;  %s7343_s0 = inlined_call_operand.vmem [shape: f32[2,32,404], index: 0, kind: input, shape index: {}]   ;;  %s7344_s1 = inlined_call_operand.vmem [shape: f32[25,32,1], index: 1, kind: input, shape index: {}]   ;;  %s7345_s2 = inlined_call_operand.vmem [shape: f32[32,1], index: 2, kind: input, shape index: {}]   ;;  %s7346_s3 = inlined_call_operand.vmem [shape: f32[32,1], index: 3, kind: input, shape index: {}]   ;;  %s7347_s4 = inlined_call_operand.vmem [shape: f32[32,32], index: 4, kind: input, shape index: {}]   ;;  %s7348_s5 = inlined_call_operand.vmem [shape: f32[32,32], index: 5, kind: input, shape index: {}]   ;;  %s7349_s6 = inlined_call_operand.vmem [shape: f32[32,1], index: 6, kind: input, shape index: {}]   ;;  %s7350_s7 = inlined_call_operand.vmem [shape: f32[32,1], index: 7, kind: input, shape index: {}]   ;;  %s7351_s8 = inlined_call_operand.vmem [shape: f32[1,32], index: 8, kind: input, shape index: {}]   ;;  %s7352_s9 = inlined_call_operand.vmem [shape: f32[1,320], index: 9, kind: input, shape index: {}]   ;;  %s7353_s10 = inlined_call_operand.vmem [shape: f32[2,32,320], index: 10, kind: output, shape index: {}]  }
   0x1 LB: > { %s3979_s14 = sadd.s32 4294967295, %s4242_s13   ;;  %p3983_p0 = scmp.ge.s32.totalorder %s4242_s13, 1  ;;  %s4242_s13 = sphi %s4326_s13, %s20_s13  }
   0x2   : > { %p312_p1 = scmp.lt.s32.totalorder %s4242_s13, 3 }
   0x4   : > { %p313_p2 = pnand %p3983_p0, %p312_p1 }
   0x6   : > { %316 = sbr.rel (%p313_p2) target bundleno = 2309 (0x905), region = 60 }
   0xb   : > { %v362_v0 = vld [vmem:[%s7344_s1 + $0x10] sm:$0xff]  ;;  %v360_v1 = vld [vmem:[%s7344_s1] sm:$0xff]  ;;  %v4244_v2 = vmov 0   ;;  %v363_v3 = vld [vmem:[%s7344_s1 + $0x18] sm:$0xff]  ;;  %p350_p3 = scmp.lt.s32.totalorder %s3979_s14, 1  ;;  %s4245_s23 = smov 127  }
   0xc   : > { %4201 = vset.pattern.permute.xlu1 %v4244_v2  ;;  %4200 = vset.pattern.permute.xlu0 %v4244_v2  ;;  %v361_v4 = vld [vmem:[%s7344_s1 + $0x8] sm:$0xff]  ;;  %v3987_v6 = vld [vmem:[%s7344_s1 + $0x20] sm:$0xff]  ;;  %v3990_v7 = vld [vmem:[%s7344_s1 + $0x38] sm:$0xff]  ;;  %s4246_s24 = smov 126   ;;  %s4247_s25 = smov 125   ;;  %vm493_vm0 = vcmask 1039360  }
   0xd   : > { %388 = vperm.xlu1 %4201, %v362_v0   ;;  %378 = vperm.xlu0 %4200, %v360_v1   ;;  %v3988_v5 = vld [vmem:[%s7344_s1 + $0x28] sm:$0xff]  ;;  %v3989_v8 = vld [vmem:[%s7344_s1 + $0x30] sm:$0xff]  ;;  %v3991_v10 = vld [vmem:[%s7344_s1 + $0x40] sm:$0xff]  ;;  %s8215_s14 = smov (!%p350_p3, %s3979_s14), 1  ;;  %s4248_s26 = smov 124   ;;  %vm599_vm1 = vcmask 1031168  }
   0xe   : > { %v3992_v9 = vld [vmem:[%s7344_s1 + $0x48] sm:$0xff]  ;;  %v3994_v11 = vld [vmem:[%s7344_s1 + $0x58] sm:$0xff]  ;;  %v3993_v12 = vld [vmem:[%s7344_s1 + $0x50] sm:$0xff]  ;;  %s4103_s19 = sshll.u32 %s8215_s14, 7  ;;  %s4249_s17 = smov 108   ;;  %vm705_vm2 = vcmask 1022976  }
   0xf   : > { %v3996_v13 = vld [vmem:[%s7344_s1 + $0x68] sm:$0xff]  ;;  %v3995_v14 = vld [vmem:[%s7344_s1 + $0x60] sm:$0xff]  ;;  %v3998_v15 = vld [vmem:[%s7344_s1 + $0x78] sm:$0xff]  ;;  %s4412_s22 = scalar_lea.vmem %s7343_s0, %s4103_s19  ;;  %s4250_s27 = smov 107   ;;  %vm811_vm3 = vcmask 1014784   ;;  %vm917_vm4 = vcmask 883712  }
  0x10   : > { %v3997_v16 = vld [vmem:[%s7344_s1 + $0x70] sm:$0xff]  ;;  %v4000_v17 = vld [vmem:[%s7344_s1 + $0x88] sm:$0xff]  ;;  %v3999_v18 = vld [vmem:[%s7344_s1 + $0x80] sm:$0xff]  ;;  %s4251_s18 = smov 106   ;;  %s4252_s28 = smov 105   ;;  %vm1023_vm5 = vcmask 875520  }
  0x11   : > { %393 = vperm.xlu1 %4201, %v363_v3   ;;  %383 = vperm.xlu0 %4200, %v361_v4   ;;  %v4002_v19 = vld [vmem:[%s7344_s1 + $0x98] sm:$0xff]  ;;  %v4001_v20 = vld [vmem:[%s7344_s1 + $0x90] sm:$0xff]  ;;  %v4415_v25 = vld [vmem:[%s4412_s22 + $0x8] sm:$0xff]  ;;  %s4253_s20 = smov 104   ;;  %s4254_s21 = smov 88   ;;  %vm1129_vm6 = vcmask 867328  }
  0x12   : > { %v4418_v27 = vld [vmem:[%s4412_s22] sm:$0xff]  ;;  %v4428_v32 = vld [vmem:[%s4412_s22 + $0x10] sm:$0xff]  ;;  %v4435_v35 = vld [vmem:[%s4412_s22 + $0x28] sm:$0xff]  ;;  %s4261_s29 = smov 66   ;;  %s4262_s30 = smov 65   ;;  %vm1235_vm7 = vcmask 859136  }
  0x13   : > { %v4425_v31 = vld [vmem:[%s4412_s22 + $0x20] sm:$0xff]  ;;  %v4438_v36 = vld [vmem:[%s4412_s22 + $0x30] sm:$0xff]  ;;  %v4445_v40 = vld [vmem:[%s4412_s22 + $0x48] sm:$0xff]  ;;  %s4263_s11 = smov 64   ;;  %s4264_s12 = smov 48   ;;  %vm1341_vm8 = vcmask 850944  }
  0x14   : > { %v4448_v41 = vld [vmem:[%s4412_s22 + $0x40] sm:$0xff]  ;;  %v4458_v46 = vld [vmem:[%s4412_s22 + $0x50] sm:$0xff]  ;;  %v4465_v49 = vld [vmem:[%s4412_s22 + $0x68] sm:$0xff]  ;;  %s4265_s15 = smov 47   ;;  %s4266_s16 = smov 46   ;;  %vm1447_vm9 = vcmask 719872  }
  0x15   : > { %432 = vperm.xlu1 %4201, %v3988_v5   ;;  %427 = vperm.xlu0 %4200, %v3987_v6   ;;  %v4455_v45 = vld [vmem:[%s4412_s22 + $0x60] sm:$0xff]  ;;  %v4468_v50 = vld [vmem:[%s4412_s22 + $0x70] sm:$0xff]  ;;  %vm1553_vm10 = vcmask 711680   ;;  %vm1659_vm11 = vcmask 703488   ;;  %vm1765_vm12 = vcmask 695296   ;;  %vm1871_vm13 = vcmask 687104  }
  0x16   : > { %vm1977_vm14 = vcmask 556032   ;;  %vm3228_vm15 = vcmask 261120  }
  0x19   : > { %442 = vperm.xlu1 %4201, %v3990_v7   ;;  %437 = vperm.xlu0 %4200, %v3989_v8  }
  0x1d   : > { %538 = vperm.xlu1 %4201, %v3992_v9   ;;  %533 = vperm.xlu0 %4200, %v3991_v10  }
  0x21   : > { %548 = vperm.xlu1 %4201, %v3994_v11   ;;  %543 = vperm.xlu0 %4200, %v3993_v12  }
  0x25   : > { %644 = vperm.xlu1 %4201, %v3996_v13   ;;  %639 = vperm.xlu0 %4200, %v3995_v14  }
  0x29   : > { %654 = vperm.xlu1 %4201, %v3998_v15   ;;  %649 = vperm.xlu0 %4200, %v3997_v16  }
  0x2d   : > { %750 = vperm.xlu1 %4201, %v4000_v17   ;;  %745 = vperm.xlu0 %4200, %v3999_v18  }
  0x31   : > { %760 = vperm.xlu1 %4201, %v4002_v19   ;;  %755 = vperm.xlu0 %4200, %v4001_v20  }
  0x88   : > { %v4400_v21 = vpop.permute.xlu1 %388  ;;  %v4402_v22 = vpop.permute.xlu0 %378 }
  0x89   : > { %7577 = vst [vmem:[#allocation2_spill] sm:$0xff] %v4400_v21  ;;  %7578 = vst [vmem:[#allocation3_spill] sm:$0xff] %v4402_v22 }
  0x8c   : > { %v4405_v23 = vpop.permute.xlu1 %393  ;;  %v4407_v24 = vpop.permute.xlu0 %383 }
  0x8d   : > { %7579 = vst [vmem:[#allocation4_spill] sm:$0xff] %v4405_v23  ;;  %7580 = vst [vmem:[#allocation5_spill] sm:$0xff] %v4407_v24 }
  0x90   : > { %v428_v26 = vpop.permute.xlu0 %427  ;;  %v433_v30 = vpop.permute.xlu1 %432 }
  0x91   : > { %v446_v28 = vmul.f32 %v428_v26, %v4415_v25  ;;  %v445_v29 = vmul.f32 %v428_v26, %v4418_v27  ;;  %v448_v33 = vmul.f32 %v433_v30, %v4425_v31  ;;  %v447_v34 = vmul.f32 %v428_v26, %v4428_v32 }
  0x92   : > { %v450_v37 = vmul.f32 %v433_v30, %v4438_v36  ;;  %v449_v38 = vmul.f32 %v433_v30, %v4435_v35 }
  0x93   : > { %471 = vrot.lane.b32.xlu1 %v446_v28, %s4245_s23  ;;  %469 = vrot.lane.b32.xlu0 %v445_v29, %s4245_s23 }
  0x94   : > { %v438_v39 = vpop.permute.xlu0 %437  ;;  %v443_v44 = vpop.permute.xlu1 %442 }
  0x95   : > { %v452_v42 = vmul.f32 %v438_v39, %v4445_v40  ;;  %v451_v43 = vmul.f32 %v438_v39, %v4448_v41  ;;  %v454_v47 = vmul.f32 %v443_v44, %v4455_v45  ;;  %v453_v48 = vmul.f32 %v438_v39, %v4458_v46 }
  0x96   : > { %v456_v51 = vmul.f32 %v443_v44, %v4468_v50  ;;  %v455_v52 = vmul.f32 %v443_v44, %v4465_v49 }
  0x97   : > { %475 = vrot.lane.b32.xlu1 %v448_v33, %s4245_s23  ;;  %473 = vrot.lane.b32.xlu0 %v447_v34, %s4245_s23 }
  0x98   : > { %v534_v53 = vpop.permute.xlu0 %533  ;;  %v539_v56 = vpop.permute.xlu1 %538 }
  0x99   : > { %v552_v54 = vmul.f32 %v534_v53, %v4415_v25  ;;  %v551_v55 = vmul.f32 %v534_v53, %v4418_v27  ;;  %v554_v57 = vmul.f32 %v539_v56, %v4425_v31  ;;  %v553_v58 = vmul.f32 %v534_v53, %v4428_v32  ;;  %v4004_v53 = vld [vmem:[%s7344_s1 + $0xa8] sm:$0xff] }
  0x9a   : > { %v556_v59 = vmul.f32 %v539_v56, %v4438_v36  ;;  %v555_v60 = vmul.f32 %v539_v56, %v4435_v35  ;;  %v4005_v56 = vld [vmem:[%s7344_s1 + $0xb0] sm:$0xff] }
  0x9b   : > { %479 = vrot.lane.b32.xlu1 %v450_v37, %s4245_s23  ;;  %477 = vrot.lane.b32.xlu0 %v449_v38, %s4245_s23 }
  0x9c   : > { %v544_v61 = vpop.permute.xlu0 %543  ;;  %v549_v0 = vpop.permute.xlu1 %548 }
  0x9d   : > { %v558_v62 = vmul.f32 %v544_v61, %v4445_v40  ;;  %v557_v63 = vmul.f32 %v544_v61, %v4448_v41  ;;  %v560_v1 = vmul.f32 %v549_v0, %v4455_v45  ;;  %v559_v2 = vmul.f32 %v544_v61, %v4458_v46 }
  0x9e   : > { %v562_v3 = vmul.f32 %v549_v0, %v4468_v50  ;;  %v561_v4 = vmul.f32 %v549_v0, %v4465_v49 }
  0x9f   : > { %483 = vrot.lane.b32.xlu1 %v452_v42, %s4245_s23  ;;  %481 = vrot.lane.b32.xlu0 %v451_v43, %s4245_s23 }
  0xa0   : > { %v640_v5 = vpop.permute.xlu0 %639  ;;  %v645_v8 = vpop.permute.xlu1 %644 }
  0xa1   : > { %v658_v6 = vmul.f32 %v640_v5, %v4415_v25  ;;  %v657_v7 = vmul.f32 %v640_v5, %v4418_v27  ;;  %v660_v9 = vmul.f32 %v645_v8, %v4425_v31  ;;  %v659_v10 = vmul.f32 %v640_v5, %v4428_v32 }
  0xa2   : > { %v662_v11 = vmul.f32 %v645_v8, %v4438_v36  ;;  %v661_v12 = vmul.f32 %v645_v8, %v4435_v35 }
  0xa3   : > { %487 = vrot.lane.b32.xlu1 %v454_v47, %s4245_s23  ;;  %485 = vrot.lane.b32.xlu0 %v453_v48, %s4245_s23 }
  0xa4   : > { %v650_v13 = vpop.permute.xlu0 %649  ;;  %v655_v16 = vpop.permute.xlu1 %654 }
  0xa5   : > { %v664_v14 = vmul.f32 %v650_v13, %v4445_v40  ;;  %v663_v15 = vmul.f32 %v650_v13, %v4448_v41  ;;  %v666_v17 = vmul.f32 %v655_v16, %v4455_v45  ;;  %v665_v18 = vmul.f32 %v650_v13, %v4458_v46 }
  0xa6   : > { %v668_v19 = vmul.f32 %v655_v16, %v4468_v50  ;;  %v667_v20 = vmul.f32 %v655_v16, %v4465_v49 }
  0xa7   : > { %491 = vrot.lane.b32.xlu1 %v456_v51, %s4245_s23  ;;  %489 = vrot.lane.b32.xlu0 %v455_v52, %s4245_s23  ;;  %s4255_s23 = smov 87  }
  0xa8   : > { %v746_v26 = vpop.permute.xlu0 %745  ;;  %v751_v30 = vpop.permute.xlu1 %750 }
  0xa9   : > { %v764_v28 = vmul.f32 %v746_v26, %v4415_v25  ;;  %v763_v29 = vmul.f32 %v746_v26, %v4418_v27  ;;  %v766_v33 = vmul.f32 %v751_v30, %v4425_v31  ;;  %v765_v34 = vmul.f32 %v746_v26, %v4428_v32 }
  0xaa   : > { %v768_v37 = vmul.f32 %v751_v30, %v4438_v36  ;;  %v767_v38 = vmul.f32 %v751_v30, %v4435_v35 }
  0xab   : > { %577 = vrot.lane.b32.xlu1 %v552_v54, %s4246_s24  ;;  %575 = vrot.lane.b32.xlu0 %v551_v55, %s4246_s24  ;;  %v4003_v54 = vld [vmem:[%s7344_s1 + $0xa0] sm:$0xff]  ;;  %v4006_v55 = vld [vmem:[%s7344_s1 + $0xb8] sm:$0xff] }
  0xac   : > { %v756_v39 = vpop.permute.xlu0 %755  ;;  %v761_v44 = vpop.permute.xlu1 %760 }
  0xad   : > { %v770_v42 = vmul.f32 %v756_v39, %v4445_v40  ;;  %v769_v43 = vmul.f32 %v756_v39, %v4448_v41  ;;  %v772_v47 = vmul.f32 %v761_v44, %v4455_v45  ;;  %v771_v48 = vmul.f32 %v756_v39, %v4458_v46 }
  0xae   : > { %v774_v51 = vmul.f32 %v761_v44, %v4468_v50  ;;  %v773_v52 = vmul.f32 %v761_v44, %v4465_v49 }
  0xaf   : > { %581 = vrot.lane.b32.xlu1 %v554_v57, %s4246_s24  ;;  %579 = vrot.lane.b32.xlu0 %v553_v58, %s4246_s24 }
  0xb3   : > { %585 = vrot.lane.b32.xlu1 %v556_v59, %s4246_s24  ;;  %583 = vrot.lane.b32.xlu0 %v555_v60, %s4246_s24 }
  0xb7   : > { %589 = vrot.lane.b32.xlu1 %v558_v62, %s4246_s24  ;;  %587 = vrot.lane.b32.xlu0 %v557_v63, %s4246_s24 }
  0xbb   : > { %593 = vrot.lane.b32.xlu1 %v560_v1, %s4246_s24  ;;  %591 = vrot.lane.b32.xlu0 %v559_v2, %s4246_s24 }
  0xbf   : > { %597 = vrot.lane.b32.xlu1 %v562_v3, %s4246_s24  ;;  %595 = vrot.lane.b32.xlu0 %v561_v4, %s4246_s24  ;;  %s4256_s24 = smov 86  }
  0xc3   : > { %683 = vrot.lane.b32.xlu1 %v658_v6, %s4247_s25  ;;  %681 = vrot.lane.b32.xlu0 %v657_v7, %s4247_s25 }
  0xc7   : > { %687 = vrot.lane.b32.xlu1 %v660_v9, %s4247_s25  ;;  %685 = vrot.lane.b32.xlu0 %v659_v10, %s4247_s25 }
  0xcb   : > { %691 = vrot.lane.b32.xlu1 %v662_v11, %s4247_s25  ;;  %689 = vrot.lane.b32.xlu0 %v661_v12, %s4247_s25 }
  0xcf   : > { %695 = vrot.lane.b32.xlu1 %v664_v14, %s4247_s25  ;;  %693 = vrot.lane.b32.xlu0 %v663_v15, %s4247_s25 }
  0xd3   : > { %699 = vrot.lane.b32.xlu1 %v666_v17, %s4247_s25  ;;  %697 = vrot.lane.b32.xlu0 %v665_v18, %s4247_s25 }
  0xd7   : > { %703 = vrot.lane.b32.xlu1 %v668_v19, %s4247_s25  ;;  %701 = vrot.lane.b32.xlu0 %v667_v20, %s4247_s25  ;;  %s4257_s25 = smov 85  }
  0xdb   : > { %789 = vrot.lane.b32.xlu1 %v764_v28, %s4248_s26  ;;  %787 = vrot.lane.b32.xlu0 %v763_v29, %s4248_s26 }
  0xdf   : > { %793 = vrot.lane.b32.xlu1 %v766_v33, %s4248_s26  ;;  %791 = vrot.lane.b32.xlu0 %v765_v34, %s4248_s26 }
  0xe3   : > { %797 = vrot.lane.b32.xlu1 %v768_v37, %s4248_s26  ;;  %795 = vrot.lane.b32.xlu0 %v767_v38, %s4248_s26 }
  0xe7   : > { %801 = vrot.lane.b32.xlu1 %v770_v42, %s4248_s26  ;;  %799 = vrot.lane.b32.xlu0 %v769_v43, %s4248_s26 }
  0xeb   : > { %805 = vrot.lane.b32.xlu1 %v772_v47, %s4248_s26  ;;  %803 = vrot.lane.b32.xlu0 %v771_v48, %s4248_s26 }
  0xef   : > { %809 = vrot.lane.b32.xlu1 %v774_v51, %s4248_s26  ;;  %807 = vrot.lane.b32.xlu0 %v773_v52, %s4248_s26  ;;  %s4258_s26 = smov 84  }
  0xf3   : > { %856 = vperm.xlu1 %4201, %v4004_v53   ;;  %851 = vperm.xlu0 %4200, %v4003_v54  }
  0xf7   : > { %866 = vperm.xlu1 %4201, %v4006_v55   ;;  %861 = vperm.xlu0 %4200, %v4005_v56  }
 0x105   : > { %v4522_v57 = vpop.permute.xlu1 %471  ;;  %v4524_v58 = vpop.permute.xlu0 %469 }
 0x106   : > { %7581 = vst [vmem:[#allocation6_spill] sm:$0xff] %v4524_v58 }
 0x109   : > { %v4526_v59 = vpop.permute.xlu1 %475  ;;  %v4528_v60 = vpop.permute.xlu0 %473 }
 0x10a   : > { %7582 = vst [vmem:[#allocation7_spill] sm:$0xff] %v4526_v59  ;;  %7583 = vst [vmem:[#allocation8_spill] sm:$0xff] %v4528_v60 }
 0x10d   : > { %v4530_v61 = vpop.permute.xlu1 %479  ;;  %v4532_v62 = vpop.permute.xlu0 %477 }
 0x10e   : > { %7584 = vst [vmem:[#allocation9_spill] sm:$0xff] %v4530_v61  ;;  %7585 = vst [vmem:[#allocation10_spill] sm:$0xff] %v4532_v62 }
 0x111   : > { %v4534_v63 = vpop.permute.xlu1 %483  ;;  %v4536_v0 = vpop.permute.xlu0 %481 }
 0x112   : > { %7586 = vst [vmem:[#allocation11_spill] sm:$0xff] %v4534_v63  ;;  %7587 = vst [vmem:[#allocation12_spill] sm:$0xff] %v4536_v0 }
 0x115   : > { %v4538_v1 = vpop.permute.xlu1 %487  ;;  %v4540_v2 = vpop.permute.xlu0 %485 }
 0x116   : > { %7588 = vst [vmem:[#allocation13_spill] sm:$0xff] %v4538_v1  ;;  %7589 = vst [vmem:[#allocation14_spill] sm:$0xff] %v4540_v2 }
 0x119   : > { %v4542_v3 = vpop.permute.xlu1 %491  ;;  %v4544_v4 = vpop.permute.xlu0 %489 }
 0x11a   : > { %7590 = vst [vmem:[#allocation15_spill] sm:$0xff] %v4542_v3  ;;  %7591 = vst [vmem:[#allocation16_spill] sm:$0xff] %v4544_v4 }
 0x11d   : > { %v4546_v5 = vpop.permute.xlu1 %577  ;;  %v4548_v6 = vpop.permute.xlu0 %575 }
 0x11e   : > { %7592 = vst [vmem:[#allocation17_spill] sm:$0xff] %v4546_v5  ;;  %7593 = vst [vmem:[#allocation18_spill] sm:$0xff] %v4548_v6 }
 0x121   : > { %v4550_v7 = vpop.permute.xlu1 %581  ;;  %v4552_v8 = vpop.permute.xlu0 %579 }
 0x122   : > { %7594 = vst [vmem:[#allocation19_spill] sm:$0xff] %v4550_v7  ;;  %7595 = vst [vmem:[#allocation20_spill] sm:$0xff] %v4552_v8 }
 0x125   : > { %v4554_v9 = vpop.permute.xlu1 %585  ;;  %v4556_v10 = vpop.permute.xlu0 %583 }
 0x126   : > { %7596 = vst [vmem:[#allocation21_spill] sm:$0xff] %v4554_v9  ;;  %7597 = vst [vmem:[#allocation22_spill] sm:$0xff] %v4556_v10 }
 0x129   : > { %v4558_v11 = vpop.permute.xlu1 %589  ;;  %v4560_v12 = vpop.permute.xlu0 %587 }
 0x12a   : > { %7598 = vst [vmem:[#allocation23_spill] sm:$0xff] %v4558_v11  ;;  %7599 = vst [vmem:[#allocation24_spill] sm:$0xff] %v4560_v12 }
 0x12d   : > { %v4562_v13 = vpop.permute.xlu1 %593  ;;  %v4564_v14 = vpop.permute.xlu0 %591 }
 0x12e   : > { %7600 = vst [vmem:[#allocation25_spill] sm:$0xff] %v4562_v13  ;;  %7601 = vst [vmem:[#allocation26_spill] sm:$0xff] %v4564_v14  ;;  %v5132_v13 = vld [vmem:[%s4412_s22] sm:$0xff] }
 0x131   : > { %v4566_v15 = vpop.permute.xlu1 %597  ;;  %v4568_v16 = vpop.permute.xlu0 %595 }
 0x132   : > { %7602 = vst [vmem:[#allocation27_spill] sm:$0xff] %v4566_v15  ;;  %7603 = vst [vmem:[#allocation28_spill] sm:$0xff] %v4568_v16 }
 0x135   : > { %v4570_v17 = vpop.permute.xlu1 %683  ;;  %v4572_v18 = vpop.permute.xlu0 %681 }
 0x136   : > { %7604 = vst [vmem:[#allocation29_spill] sm:$0xff] %v4570_v17  ;;  %7605 = vst [vmem:[#allocation30_spill] sm:$0xff] %v4572_v18 }
 0x139   : > { %v4574_v19 = vpop.permute.xlu1 %687  ;;  %v4576_v20 = vpop.permute.xlu0 %685 }
 0x13a   : > { %7606 = vst [vmem:[#allocation31_spill] sm:$0xff] %v4574_v19  ;;  %7607 = vst [vmem:[#allocation32_spill] sm:$0xff] %v4576_v20 }
 0x13d   : > { %v4578_v26 = vpop.permute.xlu1 %691  ;;  %v4580_v28 = vpop.permute.xlu0 %689 }
 0x13e   : > { %7608 = vst [vmem:[#allocation33_spill] sm:$0xff] %v4578_v26  ;;  %7609 = vst [vmem:[#allocation34_spill] sm:$0xff] %v4580_v28  ;;  %v5088_v26 = vld [vmem:[%s4412_s22 + $0x10] sm:$0xff] }
 0x141   : > { %v4582_v29 = vpop.permute.xlu1 %695  ;;  %v4584_v30 = vpop.permute.xlu0 %693 }
 0x142   : > { %7610 = vst [vmem:[#allocation35_spill] sm:$0xff] %v4582_v29  ;;  %7611 = vst [vmem:[#allocation36_spill] sm:$0xff] %v4584_v30 }
 0x145   : > { %v4586_v33 = vpop.permute.xlu1 %699  ;;  %v4588_v34 = vpop.permute.xlu0 %697 }
 0x146   : > { %7612 = vst [vmem:[#allocation37_spill] sm:$0xff] %v4586_v33  ;;  %7613 = vst [vmem:[#allocation38_spill] sm:$0xff] %v4588_v34  ;;  %v5069_v33 = vld [vmem:[%s4412_s22 + $0x40] sm:$0xff] }
 0x147   : > { %v5073_v34 = vld [vmem:[%s4412_s22 + $0x60] sm:$0xff] }
 0x149   : > { %v4590_v37 = vpop.permute.xlu1 %703  ;;  %v4592_v38 = vpop.permute.xlu0 %701 }
 0x14a   : > { %7614 = vst [vmem:[#allocation39_spill] sm:$0xff] %v4590_v37  ;;  %7615 = vst [vmem:[#allocation40_spill] sm:$0xff] %v4592_v38  ;;  %v5059_v37 = vld [vmem:[%s4412_s22 + $0x70] sm:$0xff] }
 0x14d   : > { %v4594_v39 = vpop.permute.xlu0 %787  ;;  %v4596_v42 = vpop.permute.xlu1 %789 }
 0x14e   : > { %7616 = vst [vmem:[#allocation41_spill] sm:$0xff] %v4594_v39  ;;  %7617 = vst [vmem:[#allocation42_spill] sm:$0xff] %v4596_v42 }
 0x151   : > { %v4598_v43 = vpop.permute.xlu0 %791  ;;  %v4600_v44 = vpop.permute.xlu1 %793 }
 0x152   : > { %7618 = vst [vmem:[#allocation43_spill] sm:$0xff] %v4598_v43  ;;  %7619 = vst [vmem:[#allocation44_spill] sm:$0xff] %v4600_v44 }
 0x155   : > { %v4602_v47 = vpop.permute.xlu0 %795  ;;  %v4604_v48 = vpop.permute.xlu1 %797 }
 0x156   : > { %7620 = vst [vmem:[#allocation45_spill] sm:$0xff] %v4602_v47  ;;  %7621 = vst [vmem:[#allocation46_spill] sm:$0xff] %v4604_v48 }
 0x159   : > { %v4606_v51 = vpop.permute.xlu0 %799  ;;  %v4608_v52 = vpop.permute.xlu1 %801 }
 0x15a   : > { %7622 = vst [vmem:[#allocation47_spill] sm:$0xff] %v4606_v51  ;;  %7623 = vst [vmem:[#allocation48_spill] sm:$0xff] %v4608_v52 }
 0x15d   : > { %v4610_v53 = vpop.permute.xlu0 %803  ;;  %v4612_v54 = vpop.permute.xlu1 %805 }
 0x15e   : > { %7624 = vst [vmem:[#allocation49_spill] sm:$0xff] %v4610_v53  ;;  %7625 = vst [vmem:[#allocation50_spill] sm:$0xff] %v4612_v54 }
 0x161   : > { %v4614_v55 = vpop.permute.xlu0 %807  ;;  %v4616_v56 = vpop.permute.xlu1 %809 }
 0x162   : > { %7626 = vst [vmem:[#allocation51_spill] sm:$0xff] %v4614_v55  ;;  %7627 = vst [vmem:[#allocation52_spill] sm:$0xff] %v4616_v56 }
 0x16e   : > { %v852_v39 = vpop.permute.xlu0 %851  ;;  %v857_v47 = vpop.permute.xlu1 %856 }
 0x16f   : > { %v870_v43 = vmul.f32 %v852_v39, %v4415_v25  ;;  %v869_v44 = vmul.f32 %v852_v39, %v4418_v27  ;;  %v872_v51 = vmul.f32 %v857_v47, %v4425_v31  ;;  %v871_v52 = vmul.f32 %v852_v39, %v4428_v32 }
 0x170   : > { %v874_v54 = vmul.f32 %v857_v47, %v4438_v36  ;;  %v873_v55 = vmul.f32 %v857_v47, %v4435_v35 }
 0x171   : > { %895 = vrot.lane.b32.xlu1 %v870_v43, %s4249_s17  ;;  %893 = vrot.lane.b32.xlu0 %v869_v44, %s4249_s17 }
 0x172   : > { %v862_v56 = vpop.permute.xlu0 %861  ;;  %v867_v42 = vpop.permute.xlu1 %866 }
 0x173   : > { %v876_v53 = vmul.f32 %v862_v56, %v4445_v40  ;;  %v875_v48 = vmul.f32 %v862_v56, %v4448_v41  ;;  %v878_v43 = vmul.f32 %v867_v42, %v4455_v45  ;;  %v877_v39 = vmul.f32 %v862_v56, %v4458_v46 }
 0x174   : > { %v880_v44 = vmul.f32 %v867_v42, %v4468_v50  ;;  %v879_v47 = vmul.f32 %v867_v42, %v4465_v49  ;;  %v4009_v42 = vld [vmem:[%s7344_s1 + $0xd0] sm:$0xff] }
 0x175   : > { %899 = vrot.lane.b32.xlu1 %v872_v51, %s4249_s17  ;;  %897 = vrot.lane.b32.xlu0 %v871_v52, %s4249_s17  ;;  %v4008_v51 = vld [vmem:[%s7344_s1 + $0xc8] sm:$0xff]  ;;  %v4010_v52 = vld [vmem:[%s7344_s1 + $0xd8] sm:$0xff] }
 0x179   : > { %903 = vrot.lane.b32.xlu1 %v874_v54, %s4249_s17  ;;  %901 = vrot.lane.b32.xlu0 %v873_v55, %s4249_s17 }
 0x17d   : > { %907 = vrot.lane.b32.xlu1 %v876_v53, %s4249_s17  ;;  %905 = vrot.lane.b32.xlu0 %v875_v48, %s4249_s17  ;;  %v4007_v48 = vld [vmem:[%s7344_s1 + $0xc0] sm:$0xff] }
 0x181   : > { %911 = vrot.lane.b32.xlu1 %v878_v43, %s4249_s17  ;;  %909 = vrot.lane.b32.xlu0 %v877_v39, %s4249_s17 }
 0x185   : > { %915 = vrot.lane.b32.xlu1 %v880_v44, %s4249_s17  ;;  %913 = vrot.lane.b32.xlu0 %v879_v47, %s4249_s17  ;;  %s4267_s17 = smov 45  }
 0x189   : > { %962 = vperm.xlu1 %4201, %v4008_v51   ;;  %957 = vperm.xlu0 %4200, %v4007_v48  }
 0x18d   : > { %972 = vperm.xlu1 %4201, %v4010_v52   ;;  %967 = vperm.xlu0 %4200, %v4009_v42  }
 0x1e3   : > { %v4642_v53 = vpop.permute.xlu0 %893  ;;  %v4644_v54 = vpop.permute.xlu1 %895 }
 0x1e4   : > { %7628 = vst [vmem:[#allocation53_spill] sm:$0xff] %v4642_v53  ;;  %7629 = vst [vmem:[#allocation54_spill] sm:$0xff] %v4644_v54 }
 0x1e7   : > { %v4646_v55 = vpop.permute.xlu0 %897  ;;  %v4648_v56 = vpop.permute.xlu1 %899 }
 0x1e8   : > { %7630 = vst [vmem:[#allocation55_spill] sm:$0xff] %v4646_v55  ;;  %7631 = vst [vmem:[#allocation56_spill] sm:$0xff] %v4648_v56 }
 0x1eb   : > { %v4650_v43 = vpop.permute.xlu0 %901  ;;  %v4652_v39 = vpop.permute.xlu1 %903 }
 0x1ec   : > { %7632 = vst [vmem:[#allocation57_spill] sm:$0xff] %v4650_v43  ;;  %7633 = vst [vmem:[#allocation58_spill] sm:$0xff] %v4652_v39 }
 0x1ef   : > { %v4654_v44 = vpop.permute.xlu0 %905  ;;  %v4656_v47 = vpop.permute.xlu1 %907 }
 0x1f0   : > { %7634 = vst [vmem:[#allocation59_spill] sm:$0xff] %v4654_v44  ;;  %7635 = vst [vmem:[#allocation60_spill] sm:$0xff] %v4656_v47 }
 0x1f3   : > { %v4658_v51 = vpop.permute.xlu0 %909  ;;  %v4660_v48 = vpop.permute.xlu1 %911 }
 0x1f4   : > { %7636 = vst [vmem:[#allocation61_spill] sm:$0xff] %v4658_v51  ;;  %7637 = vst [vmem:[#allocation62_spill] sm:$0xff] %v4660_v48 }
 0x1f7   : > { %v4662_v52 = vpop.permute.xlu0 %913  ;;  %v4664_v42 = vpop.permute.xlu1 %915 }
 0x1f8   : > { %7638 = vst [vmem:[#allocation63_spill] sm:$0xff] %v4662_v52  ;;  %7639 = vst [vmem:[#allocation64_spill] sm:$0xff] %v4664_v42 }
 0x204   : > { %v958_v53 = vpop.permute.xlu0 %957  ;;  %v963_v43 = vpop.permute.xlu1 %962 }
 0x205   : > { %v976_v55 = vmul.f32 %v958_v53, %v4415_v25  ;;  %v975_v56 = vmul.f32 %v958_v53, %v4418_v27  ;;  %v978_v44 = vmul.f32 %v963_v43, %v4425_v31  ;;  %v977_v47 = vmul.f32 %v958_v53, %v4428_v32 }
 0x206   : > { %v980_v48 = vmul.f32 %v963_v43, %v4438_v36  ;;  %v979_v52 = vmul.f32 %v963_v43, %v4435_v35 }
 0x207   : > { %1001 = vrot.lane.b32.xlu1 %v976_v55, %s4250_s27  ;;  %999 = vrot.lane.b32.xlu0 %v975_v56, %s4250_s27 }
 0x208   : > { %v968_v42 = vpop.permute.xlu0 %967  ;;  %v973_v54 = vpop.permute.xlu1 %972 }
 0x209   : > { %v982_v51 = vmul.f32 %v968_v42, %v4445_v40  ;;  %v981_v39 = vmul.f32 %v968_v42, %v4448_v41  ;;  %v984_v55 = vmul.f32 %v973_v54, %v4455_v45  ;;  %v983_v53 = vmul.f32 %v968_v42, %v4458_v46 }
 0x20a   : > { %v985_v56 = vmul.f32 %v973_v54, %v4465_v49  ;;  %v986_v43 = vmul.f32 %v973_v54, %v4468_v50  ;;  %v4013_v54 = vld [vmem:[%s7344_s1 + $0xf0] sm:$0xff] }
 0x20b   : > { %1005 = vrot.lane.b32.xlu1 %v978_v44, %s4250_s27  ;;  %1003 = vrot.lane.b32.xlu0 %v977_v47, %s4250_s27  ;;  %v4012_v44 = vld [vmem:[%s7344_s1 + $0xe8] sm:$0xff]  ;;  %v4014_v47 = vld [vmem:[%s7344_s1 + $0xf8] sm:$0xff] }
 0x20f   : > { %1009 = vrot.lane.b32.xlu1 %v980_v48, %s4250_s27  ;;  %1007 = vrot.lane.b32.xlu0 %v979_v52, %s4250_s27 }
 0x213   : > { %1013 = vrot.lane.b32.xlu1 %v982_v51, %s4250_s27  ;;  %1011 = vrot.lane.b32.xlu0 %v981_v39, %s4250_s27  ;;  %v4011_v39 = vld [vmem:[%s7344_s1 + $0xe0] sm:$0xff] }
 0x217   : > { %1017 = vrot.lane.b32.xlu1 %v984_v55, %s4250_s27  ;;  %1015 = vrot.lane.b32.xlu0 %v983_v53, %s4250_s27 }
 0x21b   : > { %1021 = vrot.lane.b32.xlu1 %v986_v43, %s4250_s27  ;;  %1019 = vrot.lane.b32.xlu0 %v985_v56, %s4250_s27  ;;  %s4259_s27 = smov 68  }
 0x21f   : > { %1068 = vperm.xlu1 %4201, %v4012_v44   ;;  %1063 = vperm.xlu0 %4200, %v4011_v39  }
 0x223   : > { %1078 = vperm.xlu1 %4201, %v4014_v47   ;;  %1073 = vperm.xlu0 %4200, %v4013_v54  }
 0x279   : > { %v4690_v51 = vpop.permute.xlu0 %999  ;;  %v4692_v48 = vpop.permute.xlu1 %1001 }
 0x27a   : > { %7640 = vst [vmem:[#allocation65_spill] sm:$0xff] %v4690_v51  ;;  %7641 = vst [vmem:[#allocation66_spill] sm:$0xff] %v4692_v48 }
 0x27d   : > { %v4694_v52 = vpop.permute.xlu0 %1003  ;;  %v4696_v42 = vpop.permute.xlu1 %1005 }
 0x27e   : > { %7642 = vst [vmem:[#allocation67_spill] sm:$0xff] %v4694_v52  ;;  %7643 = vst [vmem:[#allocation68_spill] sm:$0xff] %v4696_v42 }
 0x281   : > { %v4698_v55 = vpop.permute.xlu0 %1007  ;;  %v4700_v53 = vpop.permute.xlu1 %1009 }
 0x282   : > { %7644 = vst [vmem:[#allocation69_spill] sm:$0xff] %v4698_v55  ;;  %7645 = vst [vmem:[#allocation70_spill] sm:$0xff] %v4700_v53 }
 0x285   : > { %v4702_v56 = vpop.permute.xlu0 %1011  ;;  %v4704_v43 = vpop.permute.xlu1 %1013 }
 0x286   : > { %7646 = vst [vmem:[#allocation71_spill] sm:$0xff] %v4702_v56  ;;  %7647 = vst [vmem:[#allocation72_spill] sm:$0xff] %v4704_v43 }
 0x289   : > { %v4706_v44 = vpop.permute.xlu0 %1015  ;;  %v4708_v39 = vpop.permute.xlu1 %1017 }
 0x28a   : > { %7648 = vst [vmem:[#allocation73_spill] sm:$0xff] %v4706_v44  ;;  %7649 = vst [vmem:[#allocation74_spill] sm:$0xff] %v4708_v39 }
 0x28d   : > { %v4710_v47 = vpop.permute.xlu0 %1019  ;;  %v4712_v54 = vpop.permute.xlu1 %1021 }
 0x28e   : > { %7650 = vst [vmem:[#allocation75_spill] sm:$0xff] %v4710_v47  ;;  %7651 = vst [vmem:[#allocation76_spill] sm:$0xff] %v4712_v54 }
 0x29a   : > { %v1064_v51 = vpop.permute.xlu0 %1063  ;;  %v1069_v55 = vpop.permute.xlu1 %1068 }
 0x29b   : > { %v1081_v52 = vmul.f32 %v1064_v51, %v4418_v27  ;;  %v1082_v42 = vmul.f32 %v1064_v51, %v4415_v25  ;;  %v1083_v56 = vmul.f32 %v1064_v51, %v4428_v32  ;;  %v1084_v43 = vmul.f32 %v1069_v55, %v4425_v31 }
 0x29c   : > { %v1085_v39 = vmul.f32 %v1069_v55, %v4435_v35  ;;  %v1086_v47 = vmul.f32 %v1069_v55, %v4438_v36 }
 0x29d   : > { %1105 = vrot.lane.b32.xlu0 %v1081_v52, %s4251_s18  ;;  %1107 = vrot.lane.b32.xlu1 %v1082_v42, %s4251_s18 }
 0x29e   : > { %v1074_v54 = vpop.permute.xlu0 %1073  ;;  %v1079_v48 = vpop.permute.xlu1 %1078 }
 0x29f   : > { %v1087_v44 = vmul.f32 %v1074_v54, %v4448_v41  ;;  %v1088_v53 = vmul.f32 %v1074_v54, %v4445_v40  ;;  %v1089_v51 = vmul.f32 %v1074_v54, %v4458_v46  ;;  %v1090_v52 = vmul.f32 %v1079_v48, %v4455_v45 }
 0x2a0   : > { %v1091_v42 = vmul.f32 %v1079_v48, %v4465_v49  ;;  %v1092_v55 = vmul.f32 %v1079_v48, %v4468_v50  ;;  %v4018_v48 = vld [vmem:[%s7344_s1 + $0x118] sm:$0xff] }
 0x2a1   : > { %1109 = vrot.lane.b32.xlu0 %v1083_v56, %s4251_s18  ;;  %1111 = vrot.lane.b32.xlu1 %v1084_v43, %s4251_s18  ;;  %v4015_v56 = vld [vmem:[%s7344_s1 + $0x100] sm:$0xff]  ;;  %v4017_v43 = vld [vmem:[%s7344_s1 + $0x110] sm:$0xff] }
 0x2a5   : > { %1113 = vrot.lane.b32.xlu0 %v1085_v39, %s4251_s18  ;;  %1115 = vrot.lane.b32.xlu1 %v1086_v47, %s4251_s18 }
 0x2a9   : > { %1117 = vrot.lane.b32.xlu0 %v1087_v44, %s4251_s18  ;;  %1119 = vrot.lane.b32.xlu1 %v1088_v53, %s4251_s18  ;;  %v4016_v53 = vld [vmem:[%s7344_s1 + $0x108] sm:$0xff] }
 0x2ad   : > { %1121 = vrot.lane.b32.xlu0 %v1089_v51, %s4251_s18  ;;  %1123 = vrot.lane.b32.xlu1 %v1090_v52, %s4251_s18 }
 0x2b1   : > { %1125 = vrot.lane.b32.xlu0 %v1091_v42, %s4251_s18  ;;  %1127 = vrot.lane.b32.xlu1 %v1092_v55, %s4251_s18 }
 0x2b5   : > { %1169 = vperm.xlu0 %4200, %v4015_v56   ;;  %1174 = vperm.xlu1 %4201, %v4016_v53  }
 0x2b9   : > { %1179 = vperm.xlu0 %4200, %v4017_v43   ;;  %1184 = vperm.xlu1 %4201, %v4018_v48  }
 0x30f   : > { %v4738_v44 = vpop.permute.xlu0 %1105  ;;  %v4740_v39 = vpop.permute.xlu1 %1107 }
 0x310   : > { %7652 = vst [vmem:[#allocation77_spill] sm:$0xff] %v4738_v44  ;;  %7653 = vst [vmem:[#allocation78_spill] sm:$0xff] %v4740_v39 }
 0x313   : > { %v4742_v47 = vpop.permute.xlu0 %1109  ;;  %v4744_v54 = vpop.permute.xlu1 %1111 }
 0x314   : > { %7654 = vst [vmem:[#allocation79_spill] sm:$0xff] %v4742_v47  ;;  %7655 = vst [vmem:[#allocation80_spill] sm:$0xff] %v4744_v54 }
 0x317   : > { %v4746_v51 = vpop.permute.xlu0 %1113  ;;  %v4748_v52 = vpop.permute.xlu1 %1115 }
 0x318   : > { %7656 = vst [vmem:[#allocation81_spill] sm:$0xff] %v4746_v51  ;;  %7657 = vst [vmem:[#allocation82_spill] sm:$0xff] %v4748_v52  ;;  %v5055_v52 = vld [vmem:[%s4412_s22 + $0x20] sm:$0xff] }
 0x31b   : > { %v4750_v42 = vpop.permute.xlu0 %1117  ;;  %v4752_v55 = vpop.permute.xlu1 %1119 }
 0x31c   : > { %7658 = vst [vmem:[#allocation83_spill] sm:$0xff] %v4750_v42  ;;  %7659 = vst [vmem:[#allocation84_spill] sm:$0xff] %v4752_v55 }
 0x31f   : > { %v4754_v56 = vpop.permute.xlu0 %1121  ;;  %v4756_v53 = vpop.permute.xlu1 %1123 }
 0x320   : > { %7660 = vst [vmem:[#allocation85_spill] sm:$0xff] %v4754_v56  ;;  %7661 = vst [vmem:[#allocation86_spill] sm:$0xff] %v4756_v53 }
 0x323   : > { %v4758_v43 = vpop.permute.xlu0 %1125  ;;  %v4760_v48 = vpop.permute.xlu1 %1127 }
 0x324   : > { %7662 = vst [vmem:[#allocation87_spill] sm:$0xff] %v4758_v43  ;;  %7663 = vst [vmem:[#allocation88_spill] sm:$0xff] %v4760_v48 }
 0x330   : > { %v1170_v44 = vpop.permute.xlu0 %1169  ;;  %v1175_v51 = vpop.permute.xlu1 %1174 }
 0x331   : > { %v1187_v47 = vmul.f32 %v1170_v44, %v4418_v27  ;;  %v1188_v54 = vmul.f32 %v1170_v44, %v4415_v25  ;;  %v1190_v42 = vmul.f32 %v1175_v51, %v4425_v31  ;;  %v1189_v55 = vmul.f32 %v1170_v44, %v4428_v32  ;;  %v4020_v44 = vld [vmem:[%s7344_s1 + $0x128] sm:$0xff] }
 0x332   : > { %v1191_v53 = vmul.f32 %v1175_v51, %v4435_v35  ;;  %v1192_v43 = vmul.f32 %v1175_v51, %v4438_v36  ;;  %v4022_v51 = vld [vmem:[%s7344_s1 + $0x138] sm:$0xff] }
 0x333   : > { %1213 = vrot.lane.b32.xlu1 %v1188_v54, %s4252_s28  ;;  %1211 = vrot.lane.b32.xlu0 %v1187_v47, %s4252_s28  ;;  %v4019_v47 = vld [vmem:[%s7344_s1 + $0x120] sm:$0xff]  ;;  %v4021_v54 = vld [vmem:[%s7344_s1 + $0x130] sm:$0xff] }
 0x334   : > { %v1180_v48 = vpop.permute.xlu0 %1179  ;;  %v1185_v56 = vpop.permute.xlu1 %1184 }
 0x335   : > { %v1193_v27 = vmul.f32 %v1180_v48, %v4448_v41  ;;  %v1194_v25 = vmul.f32 %v1180_v48, %v4445_v40  ;;  %v1196_v31 = vmul.f32 %v1185_v56, %v4455_v45  ;;  %v1195_v32 = vmul.f32 %v1180_v48, %v4458_v46  ;;  %v4029_v48 = vld [vmem:[%s7344_s1 + $0x170] sm:$0xff] }
 0x336   : > { %v1197_v35 = vmul.f32 %v1185_v56, %v4465_v49  ;;  %v1198_v36 = vmul.f32 %v1185_v56, %v4468_v50  ;;  %v4024_v56 = vld [vmem:[%s7344_s1 + $0x148] sm:$0xff] }
 0x337   : > { %1217 = vrot.lane.b32.xlu1 %v1190_v42, %s4252_s28  ;;  %1215 = vrot.lane.b32.xlu0 %v1189_v55, %s4252_s28  ;;  %v4025_v42 = vld [vmem:[%s7344_s1 + $0x150] sm:$0xff]  ;;  %v4026_v55 = vld [vmem:[%s7344_s1 + $0x158] sm:$0xff] }
 0x33b   : > { %1221 = vrot.lane.b32.xlu1 %v1192_v43, %s4252_s28  ;;  %1219 = vrot.lane.b32.xlu0 %v1191_v53, %s4252_s28  ;;  %v4030_v53 = vld [vmem:[%s7344_s1 + $0x178] sm:$0xff] }
 0x33c   : > { %v4034_v43 = vld [vmem:[%s7344_s1 + $0x198] sm:$0xff] }
 0x33f   : > { %1225 = vrot.lane.b32.xlu1 %v1194_v25, %s4252_s28  ;;  %1223 = vrot.lane.b32.xlu0 %v1193_v27, %s4252_s28  ;;  %v4028_v27 = vld [vmem:[%s7344_s1 + $0x168] sm:$0xff]  ;;  %v4023_v25 = vld [vmem:[%s7344_s1 + $0x140] sm:$0xff] }
 0x343   : > { %1229 = vrot.lane.b32.xlu1 %v1196_v31, %s4252_s28  ;;  %1227 = vrot.lane.b32.xlu0 %v1195_v32, %s4252_s28  ;;  %v4038_v31 = vld [vmem:[%s7344_s1 + $0x1b8] sm:$0xff]  ;;  %v4033_v32 = vld [vmem:[%s7344_s1 + $0x190] sm:$0xff] }
 0x347   : > { %1233 = vrot.lane.b32.xlu1 %v1198_v36, %s4252_s28  ;;  %1231 = vrot.lane.b32.xlu0 %v1197_v35, %s4252_s28  ;;  %v4032_v35 = vld [vmem:[%s7344_s1 + $0x188] sm:$0xff]  ;;  %v4027_v36 = vld [vmem:[%s7344_s1 + $0x160] sm:$0xff]  ;;  %s4260_s28 = smov 67  }
 0x34b   : > { %1280 = vperm.xlu1 %4201, %v4020_v44   ;;  %1275 = vperm.xlu0 %4200, %v4019_v47   ;;  %v4042_v44 = vld [vmem:[%s7344_s1 + $0x1d8] sm:$0xff]  ;;  %v4037_v47 = vld [vmem:[%s7344_s1 + $0x1b0] sm:$0xff] }
 0x34f   : > { %1285 = vperm.xlu1 %4201, %v4021_v54   ;;  %1290 = vperm.xlu0 %4200, %v4022_v51   ;;  %v4036_v54 = vld [vmem:[%s7344_s1 + $0x1a8] sm:$0xff]  ;;  %v4031_v51 = vld [vmem:[%s7344_s1 + $0x180] sm:$0xff] }
 0x353   : > { %1391 = vperm.xlu1 %4201, %v4025_v42   ;;  %1396 = vperm.xlu0 %4200, %v4026_v55   ;;  %v4046_v42 = vld [vmem:[%s7344_s1 + $0x1f8] sm:$0xff]  ;;  %v4041_v55 = vld [vmem:[%s7344_s1 + $0x1d0] sm:$0xff] }
 0x357   : > { %1386 = vperm.xlu1 %4201, %v4024_v56   ;;  %1502 = vperm.xlu0 %4200, %v4030_v53   ;;  %v4040_v56 = vld [vmem:[%s7344_s1 + $0x1c8] sm:$0xff]  ;;  %v4035_v53 = vld [vmem:[%s7344_s1 + $0x1a0] sm:$0xff] }
 0x35b   : > { %1608 = vperm.xlu1 %4201, %v4034_v43   ;;  %1497 = vperm.xlu0 %4200, %v4029_v48   ;;  %v4050_v43 = vld [vmem:[%s7344_s1 + $0x218] sm:$0xff]  ;;  %v4045_v48 = vld [vmem:[%s7344_s1 + $0x1f0] sm:$0xff] }
 0x35f   : > { %1492 = vperm.xlu1 %4201, %v4028_v27   ;;  %1381 = vperm.xlu0 %4200, %v4023_v25   ;;  %v4044_v27 = vld [vmem:[%s7344_s1 + $0x1e8] sm:$0xff]  ;;  %v4039_v25 = vld [vmem:[%s7344_s1 + $0x1c0] sm:$0xff] }
 0x363   : > { %1714 = vperm.xlu1 %4201, %v4038_v31   ;;  %1603 = vperm.xlu0 %4200, %v4033_v32   ;;  %v4054_v31 = vld [vmem:[%s7344_s1 + $0x238] sm:$0xff]  ;;  %v4049_v32 = vld [vmem:[%s7344_s1 + $0x210] sm:$0xff] }
 0x367   : > { %1598 = vperm.xlu1 %4201, %v4032_v35   ;;  %1487 = vperm.xlu0 %4200, %v4027_v36   ;;  %v4048_v35 = vld [vmem:[%s7344_s1 + $0x208] sm:$0xff]  ;;  %v4043_v36 = vld [vmem:[%s7344_s1 + $0x1e0] sm:$0xff] }
 0x36b   : > { %1820 = vperm.xlu1 %4201, %v4042_v44   ;;  %1709 = vperm.xlu0 %4200, %v4037_v47   ;;  %v4058_v44 = vld [vmem:[%s7344_s1 + $0x258] sm:$0xff]  ;;  %v4053_v47 = vld [vmem:[%s7344_s1 + $0x230] sm:$0xff] }
 0x36f   : > { %1704 = vperm.xlu1 %4201, %v4036_v54   ;;  %1593 = vperm.xlu0 %4200, %v4031_v51   ;;  %v4052_v54 = vld [vmem:[%s7344_s1 + $0x228] sm:$0xff]  ;;  %v4047_v51 = vld [vmem:[%s7344_s1 + $0x200] sm:$0xff] }
 0x373   : > { %1926 = vperm.xlu1 %4201, %v4046_v42   ;;  %1815 = vperm.xlu0 %4200, %v4041_v55   ;;  %v4062_v42 = vld [vmem:[%s7344_s1 + $0x278] sm:$0xff]  ;;  %v4057_v55 = vld [vmem:[%s7344_s1 + $0x250] sm:$0xff] }
 0x377   : > { %1810 = vperm.xlu1 %4201, %v4040_v56   ;;  %1699 = vperm.xlu0 %4200, %v4035_v53   ;;  %v4056_v56 = vld [vmem:[%s7344_s1 + $0x248] sm:$0xff]  ;;  %v4051_v53 = vld [vmem:[%s7344_s1 + $0x220] sm:$0xff] }
 0x37b   : > { %2032 = vperm.xlu1 %4201, %v4050_v43   ;;  %1921 = vperm.xlu0 %4200, %v4045_v48   ;;  %v4066_v43 = vld [vmem:[%s7344_s1 + $0x298] sm:$0xff]  ;;  %v4061_v48 = vld [vmem:[%s7344_s1 + $0x270] sm:$0xff] }
 0x37f   : > { %1916 = vperm.xlu1 %4201, %v4044_v27   ;;  %1805 = vperm.xlu0 %4200, %v4039_v25   ;;  %v4060_v27 = vld [vmem:[%s7344_s1 + $0x268] sm:$0xff]  ;;  %v4055_v25 = vld [vmem:[%s7344_s1 + $0x240] sm:$0xff] }
 0x383   : > { %2138 = vperm.xlu1 %4201, %v4054_v31   ;;  %2027 = vperm.xlu0 %4200, %v4049_v32   ;;  %v4070_v31 = vld [vmem:[%s7344_s1 + $0x2b8] sm:$0xff]  ;;  %v4065_v32 = vld [vmem:[%s7344_s1 + $0x290] sm:$0xff] }
 0x387   : > { %2022 = vperm.xlu1 %4201, %v4048_v35   ;;  %1911 = vperm.xlu0 %4200, %v4043_v36   ;;  %v4064_v35 = vld [vmem:[%s7344_s1 + $0x288] sm:$0xff]  ;;  %v4059_v36 = vld [vmem:[%s7344_s1 + $0x260] sm:$0xff] }
 0x38b   : > { %2244 = vperm.xlu1 %4201, %v4058_v44   ;;  %2133 = vperm.xlu0 %4200, %v4053_v47  }
 0x38f   : > { %2128 = vperm.xlu1 %4201, %v4052_v54   ;;  %2017 = vperm.xlu0 %4200, %v4047_v51   ;;  %v4074_v54 = vld [vmem:[%s7344_s1 + $0x2d8] sm:$0xff]  ;;  %v4069_v51 = vld [vmem:[%s7344_s1 + $0x2b0] sm:$0xff] }
 0x393   : > { %2350 = vperm.xlu1 %4201, %v4062_v42   ;;  %2239 = vperm.xlu0 %4200, %v4057_v55  }
 0x397   : > { %2234 = vperm.xlu1 %4201, %v4056_v56   ;;  %2123 = vperm.xlu0 %4200, %v4051_v53   ;;  %v4068_v56 = vld [vmem:[%s7344_s1 + $0x2a8] sm:$0xff]  ;;  %v4063_v53 = vld [vmem:[%s7344_s1 + $0x280] sm:$0xff] }
 0x39b   : > { %2472 = vperm.xlu1 %4201, %v4066_v43   ;;  %2345 = vperm.xlu0 %4200, %v4061_v48  }
 0x39f   : > { %2340 = vperm.xlu1 %4201, %v4060_v27   ;;  %2229 = vperm.xlu0 %4200, %v4055_v25   ;;  %v4078_v27 = vld [vmem:[%s7344_s1 + $0x2f8] sm:$0xff]  ;;  %v4073_v25 = vld [vmem:[%s7344_s1 + $0x2d0] sm:$0xff] }
 0x3a3   : > { %2598 = vperm.xlu1 %4201, %v4070_v31   ;;  %2467 = vperm.xlu0 %4200, %v4065_v32   ;;  %v4072_v31 = vld [vmem:[%s7344_s1 + $0x2c8] sm:$0xff]  ;;  %v4067_v32 = vld [vmem:[%s7344_s1 + $0x2a0] sm:$0xff] }
 0x3a5   : > { %v4918_v44 = vpop.permute.xlu1 %1213  ;;  %v4920_v47 = vpop.permute.xlu0 %1211 }
 0x3a6   : > { %7664 = vst [vmem:[#allocation89_spill] sm:$0xff] %v4918_v44  ;;  %7665 = vst [vmem:[#allocation90_spill] sm:$0xff] %v4920_v47 }
 0x3a7   : > { %2462 = vperm.xlu1 %4201, %v4064_v35   ;;  %2335 = vperm.xlu0 %4200, %v4059_v36  }
 0x3a9   : > { %v4928_v42 = vpop.permute.xlu1 %1217  ;;  %v4930_v55 = vpop.permute.xlu0 %1215 }
 0x3aa   : > { %7666 = vst [vmem:[#allocation91_spill] sm:$0xff] %v4928_v42  ;;  %7667 = vst [vmem:[#allocation92_spill] sm:$0xff] %v4930_v55 }
 0x3ab   : > { %2724 = vperm.xlu1 %4201, %v4074_v54   ;;  %2593 = vperm.xlu0 %4200, %v4069_v51   ;;  %v4082_v54 = vld [vmem:[%s7344_s1 + $0x318] sm:$0xff]  ;;  %v4077_v51 = vld [vmem:[%s7344_s1 + $0x2f0] sm:$0xff] }
 0x3ad   : > { %v4938_v43 = vpop.permute.xlu1 %1221  ;;  %v4940_v48 = vpop.permute.xlu0 %1219 }
 0x3ae   : > { %7668 = vst [vmem:[#allocation93_spill] sm:$0xff] %v4938_v43  ;;  %7669 = vst [vmem:[#allocation94_spill] sm:$0xff] %v4940_v48 }
 0x3af   : > { %2588 = vperm.xlu1 %4201, %v4068_v56   ;;  %2457 = vperm.xlu0 %4200, %v4063_v53  }
 0x3b1   : > { %v4954_v35 = vpop.permute.xlu1 %1225  ;;  %v4956_v36 = vpop.permute.xlu0 %1223 }
 0x3b2   : > { %7670 = vst [vmem:[#allocation95_spill] sm:$0xff] %v4954_v35  ;;  %7671 = vst [vmem:[#allocation96_spill] sm:$0xff] %v4956_v36 }
 0x3b3   : > { %2850 = vperm.xlu1 %4201, %v4078_v27   ;;  %2719 = vperm.xlu0 %4200, %v4073_v25   ;;  %v4076_v27 = vld [vmem:[%s7344_s1 + $0x2e8] sm:$0xff]  ;;  %v4071_v25 = vld [vmem:[%s7344_s1 + $0x2c0] sm:$0xff] }
 0x3b5   : > { %v4964_v56 = vpop.permute.xlu1 %1229  ;;  %v4966_v53 = vpop.permute.xlu0 %1227 }
 0x3b6   : > { %7672 = vst [vmem:[#allocation97_spill] sm:$0xff] %v4964_v56  ;;  %7673 = vst [vmem:[#allocation98_spill] sm:$0xff] %v4966_v53  ;;  %v4079_v56 = vld [vmem:[%s7344_s1 + $0x300] sm:$0xff] }
 0x3b7   : > { %2714 = vperm.xlu1 %4201, %v4072_v31   ;;  %2583 = vperm.xlu0 %4200, %v4067_v32   ;;  %v4075_v31 = vld [vmem:[%s7344_s1 + $0x2e0] sm:$0xff]  ;;  %v4081_v32 = vld [vmem:[%s7344_s1 + $0x310] sm:$0xff] }
 0x3bb   : > { %2976 = vperm.xlu1 %4201, %v4082_v54   ;;  %2845 = vperm.xlu0 %4200, %v4077_v51   ;;  %v4980_v54 = vpop.permute.xlu1 %1233  ;;  %v4982_v51 = vpop.permute.xlu0 %1231 }
 0x3bc   : > { %7674 = vst [vmem:[#allocation99_spill] sm:$0xff] %v4980_v54  ;;  %7675 = vst [vmem:[#allocation100_spill] sm:$0xff] %v4982_v51 }
 0x3bf   : > { %2840 = vperm.xlu1 %4201, %v4076_v27   ;;  %2709 = vperm.xlu0 %4200, %v4071_v25   ;;  %v4080_v27 = vld [vmem:[%s7344_s1 + $0x308] sm:$0xff] }
 0x3c3   : > { %2835 = vperm.xlu1 %4201, %v4075_v31   ;;  %2971 = vperm.xlu0 %4200, %v4081_v32  }
 0x3c6   : > { %v1281_v25 = vpop.permute.xlu1 %1280  ;;  %v4990_v53 = vpop.permute.xlu0 %1275 }
 0x3c7   : > { %2961 = vperm.xlu1 %4201, %v4079_v56   ;;  %2966 = vperm.xlu0 %4200, %v4080_v27   ;;  %v1296_v39 = vmul.f32 %v5055_v52, %v1281_v25  ;;  %v1293_v16 = vmul.f32 %v5132_v13, %v4990_v53 }
 0x3ca   : > { %v1286_v36 = vpop.permute.xlu1 %1285  ;;  %v1291_v35 = vpop.permute.xlu0 %1290 }
 0x3cb   : > { %v1303_v54 = vmul.f32 %v1291_v35, %v4465_v49  ;;  %v1304_v31 = vmul.f32 %v1291_v35, %v4468_v50  ;;  %v1300_v43 = vmul.f32 %v1286_v36, %v4445_v40  ;;  %v1302_v42 = vmul.f32 %v1291_v35, %v4455_v45 }
 0x3cc   : > { %v1301_v48 = vmul.f32 %v1286_v36, %v4458_v46 }
 0x3cd   : > { %1339 = vrot.lane.b32.xlu1 %v1304_v31, %s4253_s20  ;;  %1337 = vrot.lane.b32.xlu0 %v1303_v54, %s4253_s20  ;;  %v5019_v54 = vld [vmem:[%s4412_s22 + $0x28] sm:$0xff] }
 0x3ce   : > { %v1392_v32 = vpop.permute.xlu1 %1391  ;;  %v1397_v51 = vpop.permute.xlu0 %1396 }
 0x3cf   : > { %v1409_v31 = vmul.f32 %v1397_v51, %v4465_v49  ;;  %v1408_v55 = vmul.f32 %v1397_v51, %v4455_v45  ;;  %v1405_v38 = vmul.f32 %v5069_v33, %v1392_v32 }
 0x3d1   : > { %1331 = vrot.lane.b32.xlu1 %v1300_v43, %s4253_s20  ;;  %1335 = vrot.lane.b32.xlu0 %v1302_v42, %s4253_s20  ;;  %v1299_v42 = vmul.f32 %v1286_v36, %v4448_v41  ;;  %v1410_v43 = vmul.f32 %v1397_v51, %v4468_v50  ;;  %v5030_v36 = vld [vmem:[%s4412_s22 + $0x30] sm:$0xff] }
 0x3d2   : > { %v5000_v56 = vpop.permute.xlu1 %1386  ;;  %v1503_v27 = vpop.permute.xlu0 %1502  ;;  %v5044_v51 = vld [vmem:[%s4412_s22 + $0x50] sm:$0xff] }
 0x3d3   : > { %v1515_v44 = vmul.f32 %v1503_v27, %v4465_v49  ;;  %v1516_v49 = vmul.f32 %v5059_v37, %v1503_v27  ;;  %v1404_v19 = vmul.f32 %v5030_v36, %v5000_v56  ;;  %v1402_v14 = vmul.f32 %v5055_v52, %v5000_v56 }
 0x3d5   : > { %1333 = vrot.lane.b32.xlu0 %v1301_v48, %s4253_s20  ;;  %1443 = vrot.lane.b32.xlu1 %v1409_v31, %s4254_s21  ;;  %v1297_v31 = vmul.f32 %v5019_v54, %v1281_v25 }
 0x3d6   : > { %v5006_v40 = vpop.permute.xlu1 %1608  ;;  %v5008_v35 = vpop.permute.xlu0 %1497 }
 0x3d7   : > { %v1513_v20 = vmul.f32 %v5044_v51, %v5008_v35  ;;  %v1622_v15 = vmul.f32 %v5059_v37, %v5006_v40  ;;  %v1511_v11 = vmul.f32 %v5069_v33, %v5008_v35 }
 0x3d9   : > { %1445 = vrot.lane.b32.xlu0 %v1410_v43, %s4254_s21  ;;  %1329 = vrot.lane.b32.xlu1 %v1299_v42, %s4253_s20  ;;  %v1298_v42 = vmul.f32 %v5030_v36, %v1281_v25  ;;  %v5034_v43 = vld [vmem:[%s4412_s22 + $0x48] sm:$0xff]  ;;  %v1514_v25 = vmul.f32 %v5073_v34, %v1503_v27 }
 0x3da   : > { %v5014_v46 = vpop.permute.xlu1 %1492  ;;  %v5016_v48 = vpop.permute.xlu0 %1381  ;;  %v1406_v47 = vmul.f32 %v5034_v43, %v1392_v32 }
 0x3db   : > { %v1399_v5 = vmul.f32 %v5132_v13, %v5016_v48 }
 0x3dd   : > { %1325 = vrot.lane.b32.xlu1 %v1297_v31, %s4253_s20  ;;  %1441 = vrot.lane.b32.xlu0 %v1408_v55, %s4254_s21  ;;  %v1407_v31 = vmul.f32 %v5044_v51, %v1392_v32  ;;  %v1295_v32 = vmul.f32 %v5088_v26, %v4990_v53 }
 0x3de   : > { %v5025_v41 = vpop.permute.xlu1 %1714  ;;  %v5027_v50 = vpop.permute.xlu0 %1603 }
 0x3e1   : > { %1437 = vrot.lane.b32.xlu1 %v1406_v47, %s4254_s21  ;;  %1327 = vrot.lane.b32.xlu0 %v1298_v42, %s4253_s20 }
 0x3e2   : > { %v5039_v45 = vpop.permute.xlu1 %1598  ;;  %v5041_v55 = vpop.permute.xlu0 %1487 }
 0x3e3   : > { %v1505_v61 = vmul.f32 %v5132_v13, %v5041_v55 }
 0x3e5   : > { %1439 = vrot.lane.b32.xlu0 %v1407_v31, %s4254_s21  ;;  %1549 = vrot.lane.b32.xlu1 %v1515_v44, %s4255_s23 }
 0x3e6   : > { %v5050_v47 = vpop.permute.xlu1 %1820  ;;  %v5052_v42 = vpop.permute.xlu0 %1709 }
 0x3e9   : > { %1551 = vrot.lane.b32.xlu0 %v1516_v49, %s4255_s23  ;;  %1323 = vrot.lane.b32.xlu1 %v1296_v39, %s4253_s20  ;;  %v5083_v39 = vld [vmem:[%s4412_s22 + $0x8] sm:$0xff] }
 0x3ea   : > { %v5064_v31 = vpop.permute.xlu1 %1704  ;;  %v5066_v44 = vpop.permute.xlu0 %1593  ;;  %v1294_v29 = vmul.f32 %v5083_v39, %v4990_v53 }
 0x3ed   : > { %1435 = vrot.lane.b32.xlu0 %v1405_v38, %s4254_s21  ;;  %1547 = vrot.lane.b32.xlu1 %v1514_v25, %s4255_s23  ;;  %v1403_v25 = vmul.f32 %v5019_v54, %v5000_v56 }
 0x3ee   : > { %v5078_v30 = vpop.permute.xlu1 %1926  ;;  %v5080_v49 = vpop.permute.xlu0 %1815 }
 0x3f1   : > { %1319 = vrot.lane.b32.xlu0 %v1294_v29, %s4253_s20  ;;  %1321 = vrot.lane.b32.xlu1 %v1295_v32, %s4253_s20  ;;  %v1512_v32 = vmul.f32 %v5034_v43, %v5008_v35 }
 0x3f2   : > { %v5094_v38 = vpop.permute.xlu1 %1810  ;;  %v5096_v27 = vpop.permute.xlu0 %1699 }
 0x3f5   : > { %1431 = vrot.lane.b32.xlu0 %v1403_v25, %s4254_s21  ;;  %1433 = vrot.lane.b32.xlu1 %v1404_v19, %s4254_s21  ;;  %v5119_v19 = vld [vmem:[%s4412_s22 + $0x68] sm:$0xff] }
 0x3f6   : > { %v5104_v28 = vpop.permute.xlu1 %2032  ;;  %v5106_v29 = vpop.permute.xlu0 %1921  ;;  %v1621_v17 = vmul.f32 %v5119_v19, %v5006_v40 }
 0x3f9   : > { %1545 = vrot.lane.b32.xlu1 %v1513_v20, %s4255_s23  ;;  %1543 = vrot.lane.b32.xlu0 %v1512_v32, %s4255_s23 }
 0x3fa   : > { %v5114_v18 = vpop.permute.xlu1 %1916  ;;  %v5116_v25 = vpop.permute.xlu0 %1805 }
 0x3fd   : > { %1657 = vrot.lane.b32.xlu1 %v1622_v15, %s4256_s24  ;;  %1655 = vrot.lane.b32.xlu0 %v1621_v17, %s4256_s24  ;;  %v1620_v17 = vmul.f32 %v5073_v34, %v5006_v40 }
 0x3fe   : > { %v5127_v20 = vpop.permute.xlu1 %2138  ;;  %v5129_v32 = vpop.permute.xlu0 %2027 }
 0x401   : > { %1429 = vrot.lane.b32.xlu1 %v1402_v14, %s4254_s21  ;;  %1317 = vrot.lane.b32.xlu0 %v1293_v16, %s4253_s20  ;;  %v1400_v14 = vmul.f32 %v5083_v39, %v5016_v48  ;;  %v1401_v16 = vmul.f32 %v5088_v26, %v5016_v48  ;;  %s4268_s20 = smov 44  }
 0x402   : > { %v5140_v12 = vpop.permute.xlu1 %2022  ;;  %v5142_v15 = vpop.permute.xlu0 %1911 }
 0x405   : > { %1653 = vrot.lane.b32.xlu1 %v1620_v17, %s4256_s24  ;;  %1541 = vrot.lane.b32.xlu0 %v1511_v11, %s4255_s23  ;;  %v1509_v11 = vmul.f32 %v5019_v54, %v5014_v46  ;;  %v1510_v17 = vmul.f32 %v5030_v36, %v5014_v46 }
 0x406   : > { %v5150_v53 = vpop.permute.xlu1 %2244  ;;  %v5152_v56 = vpop.permute.xlu0 %2133 }
 0x409   : > { %1427 = vrot.lane.b32.xlu1 %v1401_v16, %s4254_s21  ;;  %1425 = vrot.lane.b32.xlu0 %v1400_v14, %s4254_s21  ;;  %v1618_v14 = vmul.f32 %v5034_v43, %v5027_v50  ;;  %v1619_v16 = vmul.f32 %v5044_v51, %v5027_v50 }
 0x40a   : > { %v5160_v40 = vpop.permute.xlu1 %2128  ;;  %v5162_v35 = vpop.permute.xlu0 %2017 }
 0x40d   : > { %1539 = vrot.lane.b32.xlu1 %v1510_v17, %s4255_s23  ;;  %1537 = vrot.lane.b32.xlu0 %v1509_v11, %s4255_s23  ;;  %v1727_v11 = vmul.f32 %v5119_v19, %v5025_v41  ;;  %v1728_v17 = vmul.f32 %v5059_v37, %v5025_v41 }
 0x40e   : > { %v5170_v9 = vpop.permute.xlu1 %2350  ;;  %v5172_v7 = vpop.permute.xlu0 %2239 }
 0x411   : > { %1651 = vrot.lane.b32.xlu1 %v1619_v16, %s4256_s24  ;;  %1649 = vrot.lane.b32.xlu0 %v1618_v14, %s4256_s24  ;;  %v1508_v14 = vmul.f32 %v5055_v52, %v5014_v46 }
 0x412   : > { %v5180_v10 = vpop.permute.xlu1 %2234  ;;  %v5182_v8 = vpop.permute.xlu0 %2123 }
 0x415   : > { %1763 = vrot.lane.b32.xlu1 %v1728_v17, %s4257_s25  ;;  %1761 = vrot.lane.b32.xlu0 %v1727_v11, %s4257_s25  ;;  %v1726_v11 = vmul.f32 %v5073_v34, %v5025_v41  ;;  %v1617_v17 = vmul.f32 %v5069_v33, %v5027_v50 }
 0x416   : > { %v5190_v6 = vpop.permute.xlu1 %2472  ;;  %v5192_v16 = vpop.permute.xlu0 %2345 }
 0x419   : > { %1535 = vrot.lane.b32.xlu1 %v1508_v14, %s4255_s23  ;;  %1423 = vrot.lane.b32.xlu0 %v1399_v5, %s4254_s21  ;;  %v1506_v5 = vmul.f32 %v5083_v39, %v5041_v55  ;;  %v1507_v14 = vmul.f32 %v5088_v26, %v5041_v55 }
 0x41a   : > { %v5200_v3 = vpop.permute.xlu1 %2340  ;;  %v5202_v1 = vpop.permute.xlu0 %2229 }
 0x41d   : > { %1759 = vrot.lane.b32.xlu1 %v1726_v11, %s4257_s25  ;;  %1647 = vrot.lane.b32.xlu0 %v1617_v17, %s4256_s24  ;;  %v1615_v11 = vmul.f32 %v5019_v54, %v5039_v45  ;;  %v1616_v17 = vmul.f32 %v5030_v36, %v5039_v45 }
 0x41e   : > { %v5210_v46 = vpop.permute.xlu1 %2598  ;;  %v5212_v48 = vpop.permute.xlu0 %2467 }
 0x421   : > { %1533 = vrot.lane.b32.xlu1 %v1507_v14, %s4255_s23  ;;  %1531 = vrot.lane.b32.xlu0 %v1506_v5, %s4255_s23  ;;  %v1724_v5 = vmul.f32 %v5034_v43, %v5052_v42  ;;  %v1725_v14 = vmul.f32 %v5044_v51, %v5052_v42 }
 0x422   : > { %v5220_v41 = vpop.permute.xlu1 %2462  ;;  %v5222_v50 = vpop.permute.xlu0 %2335 }
 0x425   : > { %1645 = vrot.lane.b32.xlu1 %v1616_v17, %s4256_s24  ;;  %1643 = vrot.lane.b32.xlu0 %v1615_v11, %s4256_s24  ;;  %v1833_v11 = vmul.f32 %v5119_v19, %v5050_v47  ;;  %v1834_v17 = vmul.f32 %v5059_v37, %v5050_v47 }
 0x426   : > { %v5230_v4 = vpop.permute.xlu1 %2724  ;;  %v5232_v2 = vpop.permute.xlu0 %2593 }
 0x429   : > { %1757 = vrot.lane.b32.xlu1 %v1725_v14, %s4257_s25  ;;  %1755 = vrot.lane.b32.xlu0 %v1724_v5, %s4257_s25  ;;  %v1614_v5 = vmul.f32 %v5055_v52, %v5039_v45 }
 0x42a   : > { %v5240_v0 = vpop.permute.xlu1 %2588  ;;  %v5242_v63 = vpop.permute.xlu0 %2457 }
 0x42d   : > { %1869 = vrot.lane.b32.xlu1 %v1834_v17, %s4258_s26  ;;  %1867 = vrot.lane.b32.xlu0 %v1833_v11, %s4258_s26  ;;  %v1832_v11 = vmul.f32 %v5073_v34, %v5050_v47  ;;  %v1723_v17 = vmul.f32 %v5069_v33, %v5052_v42 }
 0x42e   : > { %v5250_v24 = vpop.permute.xlu1 %2850  ;;  %v5252_v14 = vpop.permute.xlu0 %2719 }
 0x431   : > { %1641 = vrot.lane.b32.xlu1 %v1614_v5, %s4256_s24  ;;  %1529 = vrot.lane.b32.xlu0 %v1505_v61, %s4255_s23  ;;  %v1612_v61 = vmul.f32 %v5083_v39, %v5066_v44  ;;  %v1613_v5 = vmul.f32 %v5088_v26, %v5066_v44 }
 0x432   : > { %v5260_v59 = vpop.permute.xlu1 %2714  ;;  %v5262_v62 = vpop.permute.xlu0 %2583 }
 0x435   : > { %1865 = vrot.lane.b32.xlu1 %v1832_v11, %s4258_s26  ;;  %1753 = vrot.lane.b32.xlu0 %v1723_v17, %s4257_s25  ;;  %v1721_v11 = vmul.f32 %v5019_v54, %v5064_v31  ;;  %v1722_v17 = vmul.f32 %v5030_v36, %v5064_v31 }
 0x436   : > { %v5270_v45 = vpop.permute.xlu1 %2976  ;;  %v5272_v55 = vpop.permute.xlu0 %2845 }
 0x439   : > { %1639 = vrot.lane.b32.xlu1 %v1613_v5, %s4256_s24  ;;  %1637 = vrot.lane.b32.xlu0 %v1612_v61, %s4256_s24  ;;  %v1830_v61 = vmul.f32 %v5034_v43, %v5080_v49  ;;  %v1831_v5 = vmul.f32 %v5044_v51, %v5080_v49 }
 0x43a   : > { %v5280_v47 = vpop.permute.xlu1 %2840  ;;  %v5282_v42 = vpop.permute.xlu0 %2709 }
 0x43b   : > { %7676 = vst [vmem:[#allocation101_spill] sm:$0xff] %v5280_v47  ;;  %7677 = vst [vmem:[#allocation102_spill] sm:$0xff] %v5282_v42 }
 0x43d   : > { %1751 = vrot.lane.b32.xlu1 %v1722_v17, %s4257_s25  ;;  %1749 = vrot.lane.b32.xlu0 %v1721_v11, %s4257_s25  ;;  %v1939_v11 = vmul.f32 %v5119_v19, %v5078_v30  ;;  %v1940_v17 = vmul.f32 %v5059_v37, %v5078_v30 }
 0x43e   : > { %v5290_v60 = vpop.permute.xlu1 %2835  ;;  %v5292_v58 = vpop.permute.xlu0 %2971 }
 0x43f   : > { %7678 = vst [vmem:[#allocation103_spill] sm:$0xff] %v5290_v60  ;;  %7679 = vst [vmem:[#allocation104_spill] sm:$0xff] %v5292_v58 }
 0x441   : > { %1863 = vrot.lane.b32.xlu1 %v1831_v5, %s4258_s26  ;;  %1861 = vrot.lane.b32.xlu0 %v1830_v61, %s4258_s26  ;;  %v1720_v61 = vmul.f32 %v5055_v52, %v5064_v31 }
 0x442   : > { %v5300_v47 = vpop.permute.xlu1 %2961  ;;  %v5302_v42 = vpop.permute.xlu0 %2966 }
 0x443   : > { %7680 = vst [vmem:[#allocation105_spill] sm:$0xff] %v5300_v47  ;;  %7681 = vst [vmem:[#allocation106_spill] sm:$0xff] %v5302_v42  ;;  %v1611_v47 = vmul.f32 %v5132_v13, %v5066_v44 }
 0x445   : > { %1975 = vrot.lane.b32.xlu1 %v1940_v17, %s4259_s27  ;;  %1973 = vrot.lane.b32.xlu0 %v1939_v11, %s4259_s27  ;;  %v1938_v11 = vmul.f32 %v5073_v34, %v5078_v30  ;;  %v1829_v17 = vmul.f32 %v5069_v33, %v5080_v49 }
 0x446   : > { %v5310_v60 = vpop.permute.xlu1 %1339  ;;  %v5312_v5 = vpop.permute.xlu0 %1337 }
 0x447   : > { %7682 = vst [vmem:[#allocation107_spill] sm:$0xff] %v5310_v60 }
 0x449   : > { %1747 = vrot.lane.b32.xlu1 %v1720_v61, %s4257_s25  ;;  %1635 = vrot.lane.b32.xlu0 %v1611_v47, %s4256_s24  ;;  %v1718_v47 = vmul.f32 %v5083_v39, %v5096_v27  ;;  %v1719_v61 = vmul.f32 %v5088_v26, %v5096_v27 }
 0x44a   : > { %v5320_v42 = vpop.permute.xlu1 %1331  ;;  %v5322_v58 = vpop.permute.xlu0 %1335 }
 0x44b   : > { %7683 = vst [vmem:[#allocation108_spill] sm:$0xff] %v5320_v42 }
 0x44d   : > { %1971 = vrot.lane.b32.xlu1 %v1938_v11, %s4259_s27  ;;  %1859 = vrot.lane.b32.xlu0 %v1829_v17, %s4258_s26  ;;  %v1827_v11 = vmul.f32 %v5019_v54, %v5094_v38  ;;  %v1828_v17 = vmul.f32 %v5030_v36, %v5094_v38 }
 0x44e   : > { %v5330_v31 = vpop.permute.xlu1 %1443  ;;  %v5332_v44 = vpop.permute.xlu0 %1333 }
 0x44f   : > { %7684 = vst [vmem:[#allocation109_spill] sm:$0xff] %v5330_v31  ;;  %7685 = vst [vmem:[#allocation110_spill] sm:$0xff] %v5332_v44 }
 0x451   : > { %1745 = vrot.lane.b32.xlu1 %v1719_v61, %s4257_s25  ;;  %1743 = vrot.lane.b32.xlu0 %v1718_v47, %s4257_s25  ;;  %v1936_v47 = vmul.f32 %v5034_v43, %v5106_v29  ;;  %v1937_v61 = vmul.f32 %v5044_v51, %v5106_v29 }
 0x452   : > { %v5340_v30 = vpop.permute.xlu1 %1329  ;;  %v5342_v49 = vpop.permute.xlu0 %1445 }
 0x453   : > { %7686 = vst [vmem:[#allocation111_spill] sm:$0xff] %v5340_v30  ;;  %7687 = vst [vmem:[#allocation112_spill] sm:$0xff] %v5342_v49 }
 0x455   : > { %1857 = vrot.lane.b32.xlu1 %v1828_v17, %s4258_s26  ;;  %1855 = vrot.lane.b32.xlu0 %v1827_v11, %s4258_s26  ;;  %v2045_v11 = vmul.f32 %v5119_v19, %v5104_v28  ;;  %v2046_v17 = vmul.f32 %v5059_v37, %v5104_v28 }
 0x456   : > { %v5350_v31 = vpop.permute.xlu1 %1325  ;;  %v5352_v42 = vpop.permute.xlu0 %1441 }
 0x457   : > { %7688 = vst [vmem:[#allocation113_spill] sm:$0xff] %v5350_v31  ;;  %7689 = vst [vmem:[#allocation114_spill] sm:$0xff] %v5352_v42 }
 0x459   : > { %1969 = vrot.lane.b32.xlu1 %v1937_v61, %s4259_s27  ;;  %1967 = vrot.lane.b32.xlu0 %v1936_v47, %s4259_s27  ;;  %v1826_v47 = vmul.f32 %v5055_v52, %v5094_v38 }
 0x45a   : > { %v5360_v49 = vpop.permute.xlu1 %1437  ;;  %v5362_v30 = vpop.permute.xlu0 %1327 }
 0x45b   : > { %7690 = vst [vmem:[#allocation115_spill] sm:$0xff] %v5360_v49  ;;  %7691 = vst [vmem:[#allocation116_spill] sm:$0xff] %v5362_v30  ;;  %v1717_v49 = vmul.f32 %v5132_v13, %v5096_v27 }
 0x45d   : > { %2081 = vrot.lane.b32.xlu1 %v2046_v17, %s4260_s28  ;;  %2079 = vrot.lane.b32.xlu0 %v2045_v11, %s4260_s28  ;;  %v2044_v11 = vmul.f32 %v5073_v34, %v5104_v28  ;;  %v1935_v17 = vmul.f32 %v5069_v33, %v5106_v29 }
 0x45e   : > { %v5370_v31 = vpop.permute.xlu1 %1549  ;;  %v5372_v61 = vpop.permute.xlu0 %1439 }
 0x45f   : > { %7692 = vst [vmem:[#allocation117_spill] sm:$0xff] %v5370_v31  ;;  %7693 = vst [vmem:[#allocation118_spill] sm:$0xff] %v5372_v61 }
 0x461   : > { %1853 = vrot.lane.b32.xlu1 %v1826_v47, %s4258_s26  ;;  %1741 = vrot.lane.b32.xlu0 %v1717_v49, %s4257_s25  ;;  %v1824_v49 = vmul.f32 %v5083_v39, %v5116_v25  ;;  %v1825_v47 = vmul.f32 %v5088_v26, %v5116_v25 }
 0x462   : > { %v5380_v30 = vpop.permute.xlu1 %1323  ;;  %v5382_v42 = vpop.permute.xlu0 %1551 }
 0x463   : > { %7694 = vst [vmem:[#allocation119_spill] sm:$0xff] %v5382_v42 }
 0x465   : > { %2077 = vrot.lane.b32.xlu1 %v2044_v11, %s4260_s28  ;;  %1965 = vrot.lane.b32.xlu0 %v1935_v17, %s4259_s27  ;;  %v1933_v11 = vmul.f32 %v5019_v54, %v5114_v18  ;;  %v1934_v17 = vmul.f32 %v5030_v36, %v5114_v18 }
 0x466   : > { %v5390_v38 = vpop.permute.xlu1 %1547  ;;  %v5392_v27 = vpop.permute.xlu0 %1435 }
 0x467   : > { %7695 = vst [vmem:[#allocation120_spill] sm:$0xff] %v5390_v38  ;;  %7696 = vst [vmem:[#allocation121_spill] sm:$0xff] %v5392_v27 }
 0x469   : > { %1851 = vrot.lane.b32.xlu1 %v1825_v47, %s4258_s26  ;;  %1849 = vrot.lane.b32.xlu0 %v1824_v49, %s4258_s26  ;;  %v2042_v49 = vmul.f32 %v5034_v43, %v5129_v32  ;;  %v2043_v47 = vmul.f32 %v5044_v51, %v5129_v32 }
 0x46a   : > { %v5400_v28 = vpop.permute.xlu1 %1321  ;;  %v5402_v29 = vpop.permute.xlu0 %1319 }
 0x46b   : > { %7697 = vst [vmem:[#allocation122_spill] sm:$0xff] %v5400_v28  ;;  %7698 = vst [vmem:[#allocation123_spill] sm:$0xff] %v5402_v29 }
 0x46d   : > { %1963 = vrot.lane.b32.xlu1 %v1934_v17, %s4259_s27  ;;  %1961 = vrot.lane.b32.xlu0 %v1933_v11, %s4259_s27  ;;  %v2151_v11 = vmul.f32 %v5119_v19, %v5127_v20  ;;  %v2152_v17 = vmul.f32 %v5059_v37, %v5127_v20 }
 0x46e   : > { %v5410_v27 = vpop.permute.xlu1 %1433  ;;  %v5412_v38 = vpop.permute.xlu0 %1431 }
 0x46f   : > { %7699 = vst [vmem:[#allocation124_spill] sm:$0xff] %v5410_v27  ;;  %7700 = vst [vmem:[#allocation125_spill] sm:$0xff] %v5412_v38 }
 0x471   : > { %2075 = vrot.lane.b32.xlu1 %v2043_v47, %s4260_s28  ;;  %2073 = vrot.lane.b32.xlu0 %v2042_v49, %s4260_s28  ;;  %v1932_v49 = vmul.f32 %v5055_v52, %v5114_v18 }
 0x472   : > { %v5420_v29 = vpop.permute.xlu1 %1545  ;;  %v5422_v28 = vpop.permute.xlu0 %1543 }
 0x473   : > { %7701 = vst [vmem:[#allocation126_spill] sm:$0xff] %v5420_v29  ;;  %7702 = vst [vmem:[#allocation127_spill] sm:$0xff] %v5422_v28  ;;  %v1823_v28 = vmul.f32 %v5132_v13, %v5116_v25 }
 0x475   : > { %2187 = vrot.lane.b32.xlu1 %v2152_v17, %s4261_s29  ;;  %2185 = vrot.lane.b32.xlu0 %v2151_v11, %s4261_s29  ;;  %v2150_v11 = vmul.f32 %v5073_v34, %v5127_v20  ;;  %v2041_v17 = vmul.f32 %v5069_v33, %v5129_v32 }
 0x476   : > { %v5430_v38 = vpop.permute.xlu1 %1657  ;;  %v5432_v47 = vpop.permute.xlu0 %1655 }
 0x477   : > { %7703 = vst [vmem:[#allocation128_spill] sm:$0xff] %v5430_v38  ;;  %7704 = vst [vmem:[#allocation129_spill] sm:$0xff] %v5432_v47  ;;  %v7832_v47 = vld [vmem:[#allocation31_spill] sm:$0xff] }
 0x479   : > { %1959 = vrot.lane.b32.xlu1 %v1932_v49, %s4259_s27  ;;  %1847 = vrot.lane.b32.xlu0 %v1823_v28, %s4258_s26  ;;  %v1930_v28 = vmul.f32 %v5083_v39, %v5142_v15  ;;  %v1931_v49 = vmul.f32 %v5088_v26, %v5142_v15 }
 0x47a   : > { %v5440_v29 = vpop.permute.xlu1 %1429  ;;  %v5442_v27 = vpop.permute.xlu0 %1317 }
 0x47b   : > { %7705 = vst [vmem:[#allocation130_spill] sm:$0xff] %v5440_v29  ;;  %7706 = vst [vmem:[#allocation131_spill] sm:$0xff] %v5442_v27 }
 0x47d   : > { %2183 = vrot.lane.b32.xlu1 %v2150_v11, %s4261_s29  ;;  %2071 = vrot.lane.b32.xlu0 %v2041_v17, %s4260_s28  ;;  %v2039_v11 = vmul.f32 %v5019_v54, %v5140_v12  ;;  %v2040_v17 = vmul.f32 %v5030_v36, %v5140_v12 }
 0x47e   : > { %v5450_v18 = vpop.permute.xlu1 %1653  ;;  %v5452_v25 = vpop.permute.xlu0 %1541 }
 0x47f   : > { %7707 = vst [vmem:[#allocation132_spill] sm:$0xff] %v5450_v18  ;;  %7708 = vst [vmem:[#allocation133_spill] sm:$0xff] %v5452_v25 }
 0x481   : > { %1957 = vrot.lane.b32.xlu1 %v1931_v49, %s4259_s27  ;;  %1955 = vrot.lane.b32.xlu0 %v1930_v28, %s4259_s27  ;;  %v2148_v28 = vmul.f32 %v5034_v43, %v5152_v56  ;;  %v2149_v49 = vmul.f32 %v5044_v51, %v5152_v56 }
 0x482   : > { %v5460_v20 = vpop.permute.xlu1 %1427  ;;  %v5462_v32 = vpop.permute.xlu0 %1425 }
 0x483   : > { %7709 = vst [vmem:[#allocation134_spill] sm:$0xff] %v5460_v20  ;;  %7710 = vst [vmem:[#allocation135_spill] sm:$0xff] %v5462_v32 }
 0x485   : > { %2069 = vrot.lane.b32.xlu1 %v2040_v17, %s4260_s28  ;;  %2067 = vrot.lane.b32.xlu0 %v2039_v11, %s4260_s28  ;;  %v2257_v11 = vmul.f32 %v5119_v19, %v5150_v53  ;;  %v2258_v17 = vmul.f32 %v5059_v37, %v5150_v53 }
 0x486   : > { %v5470_v25 = vpop.permute.xlu1 %1539  ;;  %v5472_v18 = vpop.permute.xlu0 %1537 }
 0x487   : > { %7711 = vst [vmem:[#allocation136_spill] sm:$0xff] %v5470_v25  ;;  %7712 = vst [vmem:[#allocation137_spill] sm:$0xff] %v5472_v18 }
 0x489   : > { %2181 = vrot.lane.b32.xlu1 %v2149_v49, %s4261_s29  ;;  %2179 = vrot.lane.b32.xlu0 %v2148_v28, %s4261_s29  ;;  %v2038_v28 = vmul.f32 %v5055_v52, %v5140_v12 }
 0x48a   : > { %v5480_v32 = vpop.permute.xlu1 %1651  ;;  %v5482_v20 = vpop.permute.xlu0 %1649 }
 0x48b   : > { %7713 = vst [vmem:[#allocation138_spill] sm:$0xff] %v5480_v32  ;;  %7714 = vst [vmem:[#allocation139_spill] sm:$0xff] %v5482_v20  ;;  %v1929_v20 = vmul.f32 %v5132_v13, %v5142_v15 }
 0x48d   : > { %2293 = vrot.lane.b32.xlu1 %v2258_v17, %s4262_s30  ;;  %2291 = vrot.lane.b32.xlu0 %v2257_v11, %s4262_s30  ;;  %v2256_v11 = vmul.f32 %v5073_v34, %v5150_v53  ;;  %v2147_v17 = vmul.f32 %v5069_v33, %v5152_v56 }
 0x48e   : > { %v5490_v18 = vpop.permute.xlu1 %1763  ;;  %v5492_v49 = vpop.permute.xlu0 %1761 }
 0x48f   : > { %7715 = vst [vmem:[#allocation140_spill] sm:$0xff] %v5490_v18  ;;  %7716 = vst [vmem:[#allocation141_spill] sm:$0xff] %v5492_v49  ;;  %v7813_v18 = vld [vmem:[#allocation18_spill] sm:$0xff] }
 0x491   : > { %2065 = vrot.lane.b32.xlu1 %v2038_v28, %s4260_s28  ;;  %1953 = vrot.lane.b32.xlu0 %v1929_v20, %s4259_s27  ;;  %v2036_v20 = vmul.f32 %v5083_v39, %v5162_v35  ;;  %v2037_v28 = vmul.f32 %v5088_v26, %v5162_v35  ;;  %s4164_s27 = smul.u32 96, %s8215_s14 }
 0x492   : > { %v5500_v32 = vpop.permute.xlu1 %1535  ;;  %v5502_v25 = vpop.permute.xlu0 %1423 }
 0x493   : > { %7717 = vst [vmem:[#allocation142_spill] sm:$0xff] %v5500_v32  ;;  %7718 = vst [vmem:[#allocation143_spill] sm:$0xff] %v5502_v25  ;;  %v4225_v25 = vld [vmem:[%s4412_s22 + $0x70] sm:$0xff] }
 0x495   : > { %2289 = vrot.lane.b32.xlu1 %v2256_v11, %s4262_s30  ;;  %2177 = vrot.lane.b32.xlu0 %v2147_v17, %s4261_s29  ;;  %v2145_v11 = vmul.f32 %v5019_v54, %v5160_v40  ;;  %v2146_v17 = vmul.f32 %v5030_v36, %v5160_v40 }
 0x496   : > { %v5510_v12 = vpop.permute.xlu1 %1759  ;;  %v5512_v15 = vpop.permute.xlu0 %1647 }
 0x497   : > { %7719 = vst [vmem:[#allocation144_spill] sm:$0xff] %v5510_v12  ;;  %7720 = vst [vmem:[#allocation145_spill] sm:$0xff] %v5512_v15 }
 0x499   : > { %2063 = vrot.lane.b32.xlu1 %v2037_v28, %s4260_s28  ;;  %2061 = vrot.lane.b32.xlu0 %v2036_v20, %s4260_s28  ;;  %v2254_v20 = vmul.f32 %v5034_v43, %v5172_v7  ;;  %v2255_v28 = vmul.f32 %v5044_v51, %v5172_v7 }
 0x49a   : > { %v5520_v53 = vpop.permute.xlu1 %1533  ;;  %v5522_v56 = vpop.permute.xlu0 %1531 }
 0x49b   : > { %7721 = vst [vmem:[#allocation146_spill] sm:$0xff] %v5520_v53  ;;  %7722 = vst [vmem:[#allocation147_spill] sm:$0xff] %v5522_v56 }
 0x49d   : > { %2175 = vrot.lane.b32.xlu1 %v2146_v17, %s4261_s29  ;;  %2173 = vrot.lane.b32.xlu0 %v2145_v11, %s4261_s29  ;;  %v2363_v11 = vmul.f32 %v5119_v19, %v5170_v9  ;;  %v2364_v17 = vmul.f32 %v5059_v37, %v5170_v9 }
 0x49e   : > { %v5530_v15 = vpop.permute.xlu1 %1645  ;;  %v5532_v12 = vpop.permute.xlu0 %1643 }
 0x49f   : > { %7723 = vst [vmem:[#allocation148_spill] sm:$0xff] %v5530_v15  ;;  %7724 = vst [vmem:[#allocation149_spill] sm:$0xff] %v5532_v12  ;;  %v7809_v15 = vld [vmem:[#allocation15_spill] sm:$0xff] }
 0x4a1   : > { %2287 = vrot.lane.b32.xlu1 %v2255_v28, %s4262_s30  ;;  %2285 = vrot.lane.b32.xlu0 %v2254_v20, %s4262_s30  ;;  %v2144_v20 = vmul.f32 %v5055_v52, %v5160_v40 }
 0x4a2   : > { %v5540_v56 = vpop.permute.xlu1 %1757  ;;  %v5542_v53 = vpop.permute.xlu0 %1755 }
 0x4a3   : > { %7725 = vst [vmem:[#allocation150_spill] sm:$0xff] %v5540_v56  ;;  %7726 = vst [vmem:[#allocation151_spill] sm:$0xff] %v5542_v53  ;;  %v2035_v53 = vmul.f32 %v5132_v13, %v5162_v35 }
 0x4a5   : > { %2399 = vrot.lane.b32.xlu1 %v2364_v17, %s4263_s11  ;;  %2397 = vrot.lane.b32.xlu0 %v2363_v11, %s4263_s11  ;;  %v2362_v11 = vmul.f32 %v5073_v34, %v5170_v9  ;;  %v2253_v17 = vmul.f32 %v5069_v33, %v5172_v7 }
 0x4a6   : > { %v5550_v12 = vpop.permute.xlu1 %1869  ;;  %v5552_v28 = vpop.permute.xlu0 %1867 }
 0x4a7   : > { %7727 = vst [vmem:[#allocation152_spill] sm:$0xff] %v5550_v12  ;;  %7728 = vst [vmem:[#allocation153_spill] sm:$0xff] %v5552_v28  ;;  %v7806_v28 = vld [vmem:[#allocation14_spill] sm:$0xff] }
 0x4a9   : > { %2171 = vrot.lane.b32.xlu1 %v2144_v20, %s4261_s29  ;;  %2059 = vrot.lane.b32.xlu0 %v2035_v53, %s4260_s28  ;;  %v2142_v53 = vmul.f32 %v5083_v39, %v5182_v8  ;;  %v2143_v20 = vmul.f32 %v5088_v26, %v5182_v8 }
 0x4aa   : > { %v5560_v37 = vpop.permute.xlu1 %1641  ;;  %v5562_v56 = vpop.permute.xlu0 %1529 }
 0x4ab   : > { %7729 = vst [vmem:[#allocation154_spill] sm:$0xff] %v5560_v37  ;;  %7730 = vst [vmem:[#allocation155_spill] sm:$0xff] %v5562_v56  ;;  %v7800_v56 = vld [vmem:[#allocation9_spill] sm:$0xff]  ;;  %v7805_v37 = vld [vmem:[#allocation12_spill] sm:$0xff] }
 0x4ad   : > { %2395 = vrot.lane.b32.xlu1 %v2362_v11, %s4263_s11  ;;  %2283 = vrot.lane.b32.xlu0 %v2253_v17, %s4262_s30  ;;  %v2251_v11 = vmul.f32 %v5019_v54, %v5180_v10  ;;  %v2252_v17 = vmul.f32 %v5030_v36, %v5180_v10 }
 0x4ae   : > { %v5570_v40 = vpop.permute.xlu1 %1865  ;;  %v5572_v35 = vpop.permute.xlu0 %1753 }
 0x4af   : > { %7731 = vst [vmem:[#allocation156_spill] sm:$0xff] %v5570_v40  ;;  %7732 = vst [vmem:[#allocation157_spill] sm:$0xff] %v5572_v35 }
 0x4b1   : > { %2169 = vrot.lane.b32.xlu1 %v2143_v20, %s4261_s29  ;;  %2167 = vrot.lane.b32.xlu0 %v2142_v53, %s4261_s29  ;;  %v2360_v53 = vmul.f32 %v5034_v43, %v5192_v16  ;;  %v2361_v20 = vmul.f32 %v5044_v51, %v5192_v16 }
 0x4b2   : > { %v5580_v7 = vpop.permute.xlu1 %1639  ;;  %v5582_v9 = vpop.permute.xlu0 %1637 }
 0x4b3   : > { %7733 = vst [vmem:[#allocation158_spill] sm:$0xff] %v5580_v7  ;;  %7734 = vst [vmem:[#allocation159_spill] sm:$0xff] %v5582_v9  ;;  %v5599_v9 = vld [vmem:[%s4412_s22 + $0x70] sm:$0xff]  ;;  %v5602_v7 = vld [vmem:[%s4412_s22 + $0x68] sm:$0xff] }
 0x4b4   : > { %v2488_v43 = vmul.f32 %v5190_v6, %v5602_v7 }
 0x4b5   : > { %2281 = vrot.lane.b32.xlu1 %v2252_v17, %s4262_s30  ;;  %2279 = vrot.lane.b32.xlu0 %v2251_v11, %s4262_s30 }
 0x4b6   : > { %v5590_v35 = vpop.permute.xlu1 %1751  ;;  %v5592_v40 = vpop.permute.xlu0 %1749 }
 0x4b7   : > { %7735 = vst [vmem:[#allocation160_spill] sm:$0xff] %v5590_v35  ;;  %7736 = vst [vmem:[#allocation161_spill] sm:$0xff] %v5592_v40  ;;  %v2489_v40 = vmul.f32 %v5190_v6, %v5599_v9 }
 0x4b9   : > { %2393 = vrot.lane.b32.xlu1 %v2361_v20, %s4263_s11  ;;  %2391 = vrot.lane.b32.xlu0 %v2360_v53, %s4263_s11  ;;  %v2250_v53 = vmul.f32 %v5055_v52, %v5180_v10 }
 0x4ba   : > { %v5606_v11 = vpop.permute.xlu1 %1863  ;;  %v5608_v17 = vpop.permute.xlu0 %1861 }
 0x4bb   : > { %7737 = vst [vmem:[#allocation162_spill] sm:$0xff] %v5606_v11  ;;  %7738 = vst [vmem:[#allocation163_spill] sm:$0xff] %v5608_v17  ;;  %v2141_v17 = vmul.f32 %v5132_v13, %v5182_v8  ;;  %v5625_v11 = vld [vmem:[%s4412_s22 + $0x60] sm:$0xff] }
 0x4bc   : > { %v2487_v10 = vmul.f32 %v5190_v6, %v5625_v11 }
 0x4bd   : > { %2535 = vrot.lane.b32.xlu1 %v2489_v40, %s4264_s12  ;;  %2533 = vrot.lane.b32.xlu0 %v2488_v43, %s4264_s12  ;;  %v2359_v43 = vmul.f32 %v5069_v33, %v5192_v16 }
 0x4be   : > { %v5616_v51 = vpop.permute.xlu1 %1975  ;;  %v5618_v20 = vpop.permute.xlu0 %1973 }
 0x4bf   : > { %7739 = vst [vmem:[#allocation164_spill] sm:$0xff] %v5616_v51  ;;  %7740 = vst [vmem:[#allocation165_spill] sm:$0xff] %v5618_v20 }
 0x4c1   : > { %2277 = vrot.lane.b32.xlu1 %v2250_v53, %s4262_s30  ;;  %2165 = vrot.lane.b32.xlu0 %v2141_v17, %s4261_s29  ;;  %v2248_v17 = vmul.f32 %v5083_v39, %v5202_v1 }
 0x4c2   : > { %v5629_v35 = vpop.permute.xlu1 %1747  ;;  %v5631_v40 = vpop.permute.xlu0 %1635 }
 0x4c3   : > { %7741 = vst [vmem:[#allocation166_spill] sm:$0xff] %v5629_v35  ;;  %7742 = vst [vmem:[#allocation167_spill] sm:$0xff] %v5631_v40  ;;  %v2249_v40 = vmul.f32 %v5088_v26, %v5202_v1 }
 0x4c5   : > { %2531 = vrot.lane.b32.xlu1 %v2487_v10, %s4264_s12  ;;  %2389 = vrot.lane.b32.xlu0 %v2359_v43, %s4263_s11  ;;  %v2357_v43 = vmul.f32 %v5019_v54, %v5200_v3  ;;  %v2358_v10 = vmul.f32 %v5030_v36, %v5200_v3 }
 0x4c6   : > { %v5639_v8 = vpop.permute.xlu1 %1971  ;;  %v5641_v53 = vpop.permute.xlu0 %1859 }
 0x4c7   : > { %7743 = vst [vmem:[#allocation168_spill] sm:$0xff] %v5639_v8  ;;  %7744 = vst [vmem:[#allocation169_spill] sm:$0xff] %v5641_v53  ;;  %v5658_v53 = vld [vmem:[%s4412_s22 + $0x50] sm:$0xff]  ;;  %v5661_v8 = vld [vmem:[%s4412_s22 + $0x48] sm:$0xff] }
 0x4c8   : > { %v2484_v54 = vmul.f32 %v5212_v48, %v5661_v8 }
 0x4c9   : > { %2275 = vrot.lane.b32.xlu1 %v2249_v40, %s4262_s30  ;;  %2273 = vrot.lane.b32.xlu0 %v2248_v17, %s4262_s30 }
 0x4ca   : > { %v5649_v16 = vpop.permute.xlu1 %1745  ;;  %v5651_v35 = vpop.permute.xlu0 %1743 }
 0x4cb   : > { %7745 = vst [vmem:[#allocation170_spill] sm:$0xff] %v5649_v16  ;;  %7746 = vst [vmem:[#allocation171_spill] sm:$0xff] %v5651_v35  ;;  %v2485_v35 = vmul.f32 %v5212_v48, %v5658_v53 }
 0x4cd   : > { %2387 = vrot.lane.b32.xlu1 %v2358_v10, %s4263_s11  ;;  %2385 = vrot.lane.b32.xlu0 %v2357_v43, %s4263_s11  ;;  %v2615_v43 = vmul.f32 %v5210_v46, %v5599_v9 }
 0x4ce   : > { %v5665_v40 = vpop.permute.xlu1 %1857  ;;  %v5667_v17 = vpop.permute.xlu0 %1855 }
 0x4cf   : > { %7747 = vst [vmem:[#allocation172_spill] sm:$0xff] %v5665_v40  ;;  %7748 = vst [vmem:[#allocation173_spill] sm:$0xff] %v5667_v17  ;;  %v2614_v17 = vmul.f32 %v5210_v46, %v5602_v7 }
 0x4d1   : > { %2527 = vrot.lane.b32.xlu1 %v2485_v35, %s4264_s12  ;;  %2525 = vrot.lane.b32.xlu0 %v2484_v54, %s4264_s12  ;;  %v2356_v54 = vmul.f32 %v5055_v52, %v5200_v3 }
 0x4d2   : > { %v5675_v36 = vpop.permute.xlu1 %1969  ;;  %v5677_v10 = vpop.permute.xlu0 %1967 }
 0x4d3   : > { %7749 = vst [vmem:[#allocation174_spill] sm:$0xff] %v5675_v36  ;;  %7750 = vst [vmem:[#allocation175_spill] sm:$0xff] %v5677_v10  ;;  %v2247_v10 = vmul.f32 %v5132_v13, %v5202_v1  ;;  %v5694_v36 = vld [vmem:[%s4412_s22 + $0x40] sm:$0xff] }
 0x4d4   : > { %v2483_v3 = vmul.f32 %v5212_v48, %v5694_v36 }
 0x4d5   : > { %2661 = vrot.lane.b32.xlu1 %v2615_v43, %s4265_s15  ;;  %2659 = vrot.lane.b32.xlu0 %v2614_v17, %s4265_s15 }
 0x4d6   : > { %v5685_v40 = vpop.permute.xlu1 %2081  ;;  %v5687_v35 = vpop.permute.xlu0 %2079 }
 0x4d7   : > { %7751 = vst [vmem:[#allocation176_spill] sm:$0xff] %v5685_v40  ;;  %7752 = vst [vmem:[#allocation177_spill] sm:$0xff] %v5687_v35  ;;  %v2613_v35 = vmul.f32 %v5210_v46, %v5625_v11 }
 0x4d9   : > { %2383 = vrot.lane.b32.xlu1 %v2356_v54, %s4263_s11  ;;  %2271 = vrot.lane.b32.xlu0 %v2247_v10, %s4262_s30  ;;  %v2354_v10 = vmul.f32 %v5083_v39, %v5222_v50  ;;  %v2355_v54 = vmul.f32 %v5088_v26, %v5222_v50 }
 0x4da   : > { %v5698_v43 = vpop.permute.xlu1 %1853  ;;  %v5700_v17 = vpop.permute.xlu0 %1741 }
 0x4db   : > { %7753 = vst [vmem:[#allocation178_spill] sm:$0xff] %v5698_v43  ;;  %7754 = vst [vmem:[#allocation179_spill] sm:$0xff] %v5700_v17  ;;  %v5717_v17 = vld [vmem:[%s4412_s22 + $0x30] sm:$0xff]  ;;  %v5720_v43 = vld [vmem:[%s4412_s22 + $0x28] sm:$0xff] }
 0x4dd   : > { %2657 = vrot.lane.b32.xlu1 %v2613_v35, %s4265_s15  ;;  %2523 = vrot.lane.b32.xlu0 %v2483_v3, %s4264_s12 }
 0x4de   : > { %v5708_v1 = vpop.permute.xlu1 %2077  ;;  %v5710_v52 = vpop.permute.xlu0 %1965 }
 0x4df   : > { %7755 = vst [vmem:[#allocation180_spill] sm:$0xff] %v5708_v1  ;;  %7756 = vst [vmem:[#allocation181_spill] sm:$0xff] %v5710_v52  ;;  %v2481_v52 = vmul.f32 %v5220_v41, %v5717_v17  ;;  %v2480_v1 = vmul.f32 %v5220_v41, %v5720_v43 }
 0x4e1   : > { %2381 = vrot.lane.b32.xlu1 %v2355_v54, %s4263_s11  ;;  %2379 = vrot.lane.b32.xlu0 %v2354_v10, %s4263_s11  ;;  %v2611_v10 = vmul.f32 %v5232_v2, %v5658_v53 }
 0x4e2   : > { %v5724_v35 = vpop.permute.xlu1 %1851  ;;  %v5726_v3 = vpop.permute.xlu0 %1849 }
 0x4e3   : > { %7757 = vst [vmem:[#allocation182_spill] sm:$0xff] %v5724_v35  ;;  %7758 = vst [vmem:[#allocation183_spill] sm:$0xff] %v5726_v3  ;;  %v2610_v3 = vmul.f32 %v5232_v2, %v5661_v8 }
 0x4e5   : > { %2519 = vrot.lane.b32.xlu1 %v2481_v52, %s4264_s12  ;;  %2517 = vrot.lane.b32.xlu0 %v2480_v1, %s4264_s12  ;;  %v2741_v1 = vmul.f32 %v5230_v4, %v5599_v9  ;;  %v2740_v52 = vmul.f32 %v5230_v4, %v5602_v7 }
 0x4e6   : > { %v5734_v26 = vpop.permute.xlu1 %1963  ;;  %v5736_v54 = vpop.permute.xlu0 %1961 }
 0x4e7   : > { %7759 = vst [vmem:[#allocation184_spill] sm:$0xff] %v5734_v26  ;;  %7760 = vst [vmem:[#allocation185_spill] sm:$0xff] %v5736_v54  ;;  %v5753_v26 = vld [vmem:[%s4412_s22 + $0x20] sm:$0xff] }
 0x4e9   : > { %2653 = vrot.lane.b32.xlu1 %v2611_v10, %s4265_s15  ;;  %2651 = vrot.lane.b32.xlu0 %v2610_v3, %s4265_s15 }
 0x4ea   : > { %v5744_v35 = vpop.permute.xlu1 %2075  ;;  %v5746_v40 = vpop.permute.xlu0 %2073 }
 0x4eb   : > { %7761 = vst [vmem:[#allocation186_spill] sm:$0xff] %v5744_v35  ;;  %7762 = vst [vmem:[#allocation187_spill] sm:$0xff] %v5746_v40  ;;  %v2353_v35 = vmul.f32 %v5132_v13, %v5222_v50  ;;  %v2479_v40 = vmul.f32 %v5220_v41, %v5753_v26  ;;  %v5779_v50 = vld [vmem:[%s4412_s22 + $0x8] sm:$0xff] }
 0x4ed   : > { %2787 = vrot.lane.b32.xlu1 %v2741_v1, %s4266_s16  ;;  %2785 = vrot.lane.b32.xlu0 %v2740_v52, %s4266_s16  ;;  %v2739_v1 = vmul.f32 %v5230_v4, %v5625_v11  ;;  %v2609_v52 = vmul.f32 %v5232_v2, %v5694_v36 }
 0x4ee   : > { %v5757_v3 = vpop.permute.xlu1 %2187  ;;  %v5759_v10 = vpop.permute.xlu0 %2185 }
 0x4ef   : > { %7763 = vst [vmem:[#allocation188_spill] sm:$0xff] %v5757_v3  ;;  %7764 = vst [vmem:[#allocation189_spill] sm:$0xff] %v5759_v10  ;;  %v5776_v10 = vld [vmem:[%s4412_s22 + $0x10] sm:$0xff] }
 0x4f1   : > { %2515 = vrot.lane.b32.xlu1 %v2479_v40, %s4264_s12  ;;  %2377 = vrot.lane.b32.xlu0 %v2353_v35, %s4263_s11 }
 0x4f2   : > { %v5767_v54 = vpop.permute.xlu1 %1959  ;;  %v5769_v16 = vpop.permute.xlu0 %1847 }
 0x4f3   : > { %7765 = vst [vmem:[#allocation190_spill] sm:$0xff] %v5767_v54  ;;  %7766 = vst [vmem:[#allocation191_spill] sm:$0xff] %v5769_v16  ;;  %v2477_v54 = vmul.f32 %v5242_v63, %v5776_v10  ;;  %v2476_v16 = vmul.f32 %v5242_v63, %v5779_v50 }
 0x4f5   : > { %2783 = vrot.lane.b32.xlu1 %v2739_v1, %s4266_s16  ;;  %2649 = vrot.lane.b32.xlu0 %v2609_v52, %s4265_s15  ;;  %v2607_v52 = vmul.f32 %v5240_v0, %v5717_v17 }
 0x4f6   : > { %v5783_v40 = vpop.permute.xlu1 %2183  ;;  %v5785_v35 = vpop.permute.xlu0 %2071 }
 0x4f7   : > { %7767 = vst [vmem:[#allocation192_spill] sm:$0xff] %v5783_v40  ;;  %7768 = vst [vmem:[#allocation193_spill] sm:$0xff] %v5785_v35  ;;  %v2606_v35 = vmul.f32 %v5240_v0, %v5720_v43 }
 0x4f9   : > { %2511 = vrot.lane.b32.xlu1 %v2477_v54, %s4264_s12  ;;  %2509 = vrot.lane.b32.xlu0 %v2476_v16, %s4264_s12  ;;  %v2737_v16 = vmul.f32 %v5252_v14, %v5658_v53 }
 0x4fa   : > { %v5793_v3 = vpop.permute.xlu1 %1957  ;;  %v5795_v1 = vpop.permute.xlu0 %1955 }
 0x4fb   : > { %7769 = vst [vmem:[#allocation194_spill] sm:$0xff] %v5793_v3  ;;  %7770 = vst [vmem:[#allocation195_spill] sm:$0xff] %v5795_v1  ;;  %v2736_v3 = vmul.f32 %v5252_v14, %v5661_v8 }
 0x4fd   : > { %2645 = vrot.lane.b32.xlu1 %v2607_v52, %s4265_s15  ;;  %2643 = vrot.lane.b32.xlu0 %v2606_v35, %s4265_s15  ;;  %v2867_v35 = vmul.f32 %v5250_v24, %v5599_v9  ;;  %v2866_v52 = vmul.f32 %v5250_v24, %v5602_v7 }
 0x4fe   : > { %v5803_v40 = vpop.permute.xlu1 %2069  ;;  %v5805_v54 = vpop.permute.xlu0 %2067 }
 0x4ff   : > { %7771 = vst [vmem:[#allocation196_spill] sm:$0xff] %v5803_v40  ;;  %7772 = vst [vmem:[#allocation197_spill] sm:$0xff] %v5805_v54  ;;  %v5822_v40 = vld [vmem:[%s4412_s22] sm:$0xff] }
 0x500   : > { %v2475_v54 = vmul.f32 %v5242_v63, %v5822_v40 }
 0x501   : > { %2779 = vrot.lane.b32.xlu1 %v2737_v16, %s4266_s16  ;;  %2777 = vrot.lane.b32.xlu0 %v2736_v3, %s4266_s16 }
 0x502   : > { %v5813_v1 = vpop.permute.xlu1 %2181  ;;  %v5815_v20 = vpop.permute.xlu0 %2179 }
 0x503   : > { %7773 = vst [vmem:[#allocation198_spill] sm:$0xff] %v5813_v1  ;;  %7774 = vst [vmem:[#allocation199_spill] sm:$0xff] %v5815_v20  ;;  %v3083_v1 = vld [vmem:[%s7345_s2 + $0x18] sm:$0xff] }
 0x505   : > { %2913 = vrot.lane.b32.xlu1 %v2867_v35, %s4267_s17  ;;  %2911 = vrot.lane.b32.xlu0 %v2866_v52, %s4267_s17  ;;  %v2735_v35 = vmul.f32 %v5252_v14, %v5694_v36  ;;  %v2605_v52 = vmul.f32 %v5240_v0, %v5753_v26 }
 0x506   : > { %v5826_v16 = vpop.permute.xlu1 %2293  ;;  %v5828_v3 = vpop.permute.xlu0 %2291 }
 0x507   : > { %7775 = vst [vmem:[#allocation200_spill] sm:$0xff] %v5826_v16  ;;  %7776 = vst [vmem:[#allocation201_spill] sm:$0xff] %v5828_v3 }
 0x509   : > { %2507 = vrot.lane.b32.xlu1 %v2475_v54, %s4264_s12  ;;  %3101 = vperm.xlu0 %4200, %v3083_v1   ;;  %v2602_v1 = vmul.f32 %v5262_v62, %v5779_v50  ;;  %v2865_v54 = vmul.f32 %v5250_v24, %v5625_v11 }
 0x50a   : > { %v5836_v20 = vpop.permute.xlu1 %2065  ;;  %v5838_v51 = vpop.permute.xlu0 %1953 }
 0x50b   : > { %7777 = vst [vmem:[#allocation202_spill] sm:$0xff] %v5836_v20  ;;  %7778 = vst [vmem:[#allocation203_spill] sm:$0xff] %v5838_v51 }
 0x50d   : > { %2775 = vrot.lane.b32.xlu1 %v2735_v35, %s4266_s16  ;;  %2641 = vrot.lane.b32.xlu0 %v2605_v52, %s4265_s15  ;;  %v2732_v35 = vmul.f32 %v5260_v59, %v5720_v43  ;;  %v2603_v52 = vmul.f32 %v5262_v62, %v5776_v10 }
 0x50e   : > { %v5846_v3 = vpop.permute.xlu1 %2289  ;;  %v5848_v16 = vpop.permute.xlu0 %2177 }
 0x50f   : > { %7779 = vst [vmem:[#allocation204_spill] sm:$0xff] %v5846_v3  ;;  %7780 = vst [vmem:[#allocation205_spill] sm:$0xff] %v5848_v16 }
 0x511   : > { %2635 = vrot.lane.b32.xlu1 %v2602_v1, %s4265_s15  ;;  %2909 = vrot.lane.b32.xlu0 %v2865_v54, %s4267_s17  ;;  %v2862_v1 = vmul.f32 %v5272_v55, %v5661_v8  ;;  %v2733_v54 = vmul.f32 %v5260_v59, %v5717_v17 }
 0x512   : > { %v5856_v20 = vpop.permute.xlu1 %2063  ;;  %v5858_v51 = vpop.permute.xlu0 %2061 }
 0x513   : > { %7781 = vst [vmem:[#allocation206_spill] sm:$0xff] %v5856_v20  ;;  %7782 = vst [vmem:[#allocation207_spill] sm:$0xff] %v5858_v51 }
 0x515   : > { %2769 = vrot.lane.b32.xlu1 %v2732_v35, %s4266_s16  ;;  %2637 = vrot.lane.b32.xlu0 %v2603_v52, %s4265_s15  ;;  %v2992_v35 = vmul.f32 %v5270_v45, %v5602_v7  ;;  %v2863_v52 = vmul.f32 %v5272_v55, %v5658_v53  ;;  %v2993_v7 = vmul.f32 %v5270_v45, %v5599_v9 }
 0x516   : > { %v5866_v3 = vpop.permute.xlu1 %2175  ;;  %v5868_v16 = vpop.permute.xlu0 %2173 }
 0x517   : > { %7783 = vst [vmem:[#allocation208_spill] sm:$0xff] %v5866_v3  ;;  %7784 = vst [vmem:[#allocation209_spill] sm:$0xff] %v5868_v16  ;;  %v2601_v16 = vmul.f32 %v5262_v62, %v5822_v40 }
 0x519   : > { %2903 = vrot.lane.b32.xlu1 %v2862_v1, %s4267_s17  ;;  %2771 = vrot.lane.b32.xlu0 %v2733_v54, %s4266_s16  ;;  %v3082_v54 = vld [vmem:[%s7345_s2 + $0x10] sm:$0xff] }
 0x51a   : > { %v5876_v20 = vpop.permute.xlu1 %2287  ;;  %v5878_v51 = vpop.permute.xlu0 %2285 }
 0x51b   : > { %7785 = vst [vmem:[#allocation210_spill] sm:$0xff] %v5876_v20  ;;  %7786 = vst [vmem:[#allocation211_spill] sm:$0xff] %v5878_v51 }
 0x51d   : > { %3037 = vrot.lane.b32.xlu1 %v2992_v35, %s4268_s20  ;;  %2905 = vrot.lane.b32.xlu0 %v2863_v52, %s4267_s17  ;;  %v3119_v52 = vld [vmem:[%s7346_s3 + $0x18] sm:$0xff] }
 0x51e   : > { %v5886_v3 = vpop.permute.xlu1 %2399  ;;  %v5888_v1 = vpop.permute.xlu0 %2397 }
 0x51f   : > { %7787 = vst [vmem:[#allocation212_spill] sm:$0xff] %v5886_v3  ;;  %7788 = vst [vmem:[#allocation213_spill] sm:$0xff] %v5888_v1  ;;  %v406_v1 = vmul.f32 %v5119_v19, %v4405_v23  ;;  %v7795_v3 = vld [vmem:[#allocation6_spill] sm:$0xff] }
 0x521   : > { %3096 = vperm.xlu1 %4201, %v3082_v54   ;;  %3039 = vrot.lane.b32.xlu0 %v2993_v7, %s4268_s20  ;;  %v2861_v54 = vmul.f32 %v5272_v55, %v5694_v36  ;;  %v2731_v7 = vmul.f32 %v5260_v59, %v5753_v26 }
 0x522   : > { %v5896_v20 = vpop.permute.xlu1 %2171  ;;  %v5898_v35 = vpop.permute.xlu0 %2059 }
 0x523   : > { %7789 = vst [vmem:[#allocation214_spill] sm:$0xff] %v5896_v20  ;;  %7790 = vst [vmem:[#allocation215_spill] sm:$0xff] %v5898_v35  ;;  %v5915_v20 = vld [vmem:[%s4412_s22 + $0x48] sm:$0xff] }
 0x524   : > { %7793 = vst [vmem:[#allocation218_spill] sm:$0xff] %v5915_v20  ;;  %v403_v35 = vmul.f32 %v5915_v20, %v4400_v21  ;;  %v402_v20 = vmul.f32 %v5069_v33, %v4400_v21  ;;  %v7802_v33 = vld [vmem:[#allocation5_spill] sm:$0xff] }
 0x525   : > { %2633 = vrot.lane.b32.xlu1 %v2601_v16, %s4265_s15  ;;  %3137 = vperm.xlu0 %4200, %v3119_v52   ;;  %v397_v16 = vmul.f32 %v5083_v39, %v4402_v22  ;;  %v396_v52 = vmul.f32 %v5132_v13, %v4402_v22  ;;  %v494_v39 = vsel %vm493_vm0, %v7795_v3, %v4522_v57  ;;  %v7798_v22 = vld [vmem:[#allocation10_spill] sm:$0xff] }
 0x526   : > { %v5906_v51 = vpop.permute.xlu1 %2395  ;;  %v5908_v9 = vpop.permute.xlu0 %2283  ;;  %v497_v19 = vsel %vm493_vm0, %v7798_v22, %v7800_v56  ;;  %v2991_v3 = vmul.f32 %v5270_v45, %v5625_v11  ;;  %v7807_v11 = vld [vmem:[#allocation16_spill] sm:$0xff]  ;;  %v7808_v56 = vld [vmem:[#allocation13_spill] sm:$0xff] }
 0x527   : > { %7791 = vst [vmem:[#allocation216_spill] sm:$0xff] %v5906_v51  ;;  %7792 = vst [vmem:[#allocation217_spill] sm:$0xff] %v5908_v9  ;;  %v405_v9 = vmul.f32 %v5073_v34, %v4405_v23  ;;  %v5950_v23 = vld [vmem:[%s4412_s22 + $0x20] sm:$0xff]  ;;  %v500_v12 = vsel %vm493_vm0, %v7808_v56, %v7807_v11  ;;  %v7812_v56 = vld [vmem:[#allocation17_spill] sm:$0xff] }
 0x528   : > { %7801 = vst [vmem:[#allocation10_spill] sm:$0xff] %v5950_v23  ;;  %v399_v21 = vmul.f32 %v5950_v23, %v7802_v33  ;;  %v501_v23 = vsel %vm493_vm0, %v7807_v11, %v7809_v15  ;;  %v600_v27 = vsel %vm599_vm1, %v7813_v18, %v7812_v56  ;;  %v7814_v11 = vld [vmem:[#allocation102_spill] sm:$0xff] }
 0x529   : > { %2901 = vrot.lane.b32.xlu1 %v2861_v54, %s4267_s17  ;;  %2767 = vrot.lane.b32.xlu0 %v2731_v7, %s4266_s16  ;;  %v7797_v54 = vld [vmem:[#allocation8_spill] sm:$0xff]  ;;  %v2729_v15 = vmul.f32 %v7814_v11, %v5776_v10  ;;  %v523_v29 = vadd.f32 %v500_v12, %v405_v9 }
 0x52a   : > { %v5925_v51 = vpop.permute.xlu1 %2169  ;;  %v5936_v13 = vpop.permute.xlu0 %2167  ;;  %v495_v7 = vsel %vm493_vm0, %v4522_v57, %v7797_v54  ;;  %v7804_v54 = vld [vmem:[#allocation11_spill] sm:$0xff]  ;;  %v7823_v9 = vld [vmem:[#allocation28_spill] sm:$0xff] }
 0x52b   : > { %7794 = vst [vmem:[#allocation219_spill] sm:$0xff] %v5925_v51  ;;  %7796 = vst [vmem:[#allocation6_spill] sm:$0xff] %v5936_v13  ;;  %v7799_v51 = vld [vmem:[#allocation7_spill] sm:$0xff] }
 0x52c   : > { %v496_v34 = vsel %vm493_vm0, %v7799_v51, %v7798_v22  ;;  %v5955_v13 = vld [vmem:[%s4412_s22 + $0x28] sm:$0xff]  ;;  %v498_v51 = vsel %vm493_vm0, %v7805_v37, %v7804_v54  ;;  %v499_v22 = vsel %vm493_vm0, %v7804_v54, %v7806_v28  ;;  %vm2083_vm0 = vcmask 547840  }
 0x52d   : > { %7803 = vst [vmem:[#allocation7_spill] sm:$0xff] %v5955_v13  ;;  %v400_v57 = vmul.f32 %v5955_v13, %v7802_v33  ;;  %3206 = vrot.lane.b32.xlu1 %v4225_v25, %s4256_s24  ;;  %3035 = vrot.lane.b32.xlu0 %v2991_v3, %s4268_s20  ;;  %v514_v33 = vadd.f32 %v494_v39, %v396_v52  ;;  %v7815_v52 = vld [vmem:[#allocation20_spill] sm:$0xff]  ;;  %v7817_v39 = vld [vmem:[#allocation19_spill] sm:$0xff] }
 0x52e   : > { %v5974_v37 = vpop.permute.xlu1 %2281  ;;  %v515_v13 = vadd.f32 %v495_v7, %v397_v16  ;;  %v517_v32 = vadd.f32 %v496_v34, %v399_v21  ;;  %v5976_v28 = vpop.permute.xlu0 %2279  ;;  %v520_v49 = vadd.f32 %v498_v51, %v402_v20  ;;  %v2728_v25 = vmul.f32 %v7814_v11, %v5779_v50  ;;  %v7816_v16 = vld [vmem:[#allocation22_spill] sm:$0xff]  ;;  %v7818_v7 = vld [vmem:[#allocation21_spill] sm:$0xff]  ;;  %v7819_v34 = vld [vmem:[#allocation23_spill] sm:$0xff] }
 0x52f   : > { %7810 = vst [vmem:[#allocation11_spill] sm:$0xff] %v5974_v37  ;;  %v518_v54 = vadd.f32 %v497_v19, %v400_v57  ;;  %7811 = vst [vmem:[#allocation12_spill] sm:$0xff] %v5976_v28  ;;  %v521_v3 = vadd.f32 %v499_v22, %v403_v35  ;;  %v524_v37 = vadd.f32 %v501_v23, %v406_v1  ;;  %v7820_v19 = vld [vmem:[#allocation24_spill] sm:$0xff]  ;;  %v7822_v1 = vld [vmem:[#allocation26_spill] sm:$0xff] }
 0x530   : > { %v601_v21 = vsel %vm599_vm1, %v7812_v56, %v7815_v52  ;;  %v602_v20 = vsel %vm599_vm1, %v7817_v39, %v7816_v16  ;;  %v603_v18 = vsel %vm599_vm1, %v7816_v16, %v7818_v7  ;;  %v604_v57 = vsel %vm599_vm1, %v7820_v19, %v7819_v34  ;;  %v7824_v51 = vld [vmem:[#allocation25_spill] sm:$0xff]  ;;  %v7825_v56 = vld [vmem:[#allocation27_spill] sm:$0xff]  ;;  %v7828_v19 = vld [vmem:[#allocation30_spill] sm:$0xff] }
 0x531   : > { %2763 = vrot.lane.b32.xlu1 %v2729_v15, %s4266_s16  ;;  %2761 = vrot.lane.b32.xlu0 %v2728_v25, %s4266_s16  ;;  %v620_v12 = vadd.f32 %v600_v27, %v514_v33  ;;  %v605_v35 = vsel %vm599_vm1, %v7819_v34, %v7822_v1  ;;  %v606_v22 = vsel %vm599_vm1, %v7824_v51, %v7823_v9  ;;  %v7827_v15 = vld [vmem:[#allocation29_spill] sm:$0xff]  ;;  %v7829_v7 = vld [vmem:[#allocation32_spill] sm:$0xff] }
 0x532   : > { %v5999_v23 = vpop.permute.xlu1 %2393  ;;  %v607_v16 = vsel %vm599_vm1, %v7823_v9, %v7825_v56  ;;  %v6010_v39 = vpop.permute.xlu0 %2391  ;;  %v706_v25 = vsel %vm705_vm2, %v7828_v19, %v7827_v15  ;;  %v707_v27 = vsel %vm705_vm2, %v7827_v15, %v7829_v7  ;;  %v7830_v33 = vld [vmem:[#allocation101_spill] sm:$0xff]  ;;  %v621_v52 = vadd.f32 %v601_v21, %v515_v13 }
 0x533   : > { %7821 = vst [vmem:[#allocation16_spill] sm:$0xff] %v5999_v23  ;;  %7826 = vst [vmem:[#allocation13_spill] sm:$0xff] %v6010_v39  ;;  %v2859_v34 = vmul.f32 %v7830_v33, %v5717_v17  ;;  %v2858_v51 = vmul.f32 %v7830_v33, %v5720_v43  ;;  %v623_v1 = vadd.f32 %v602_v20, %v517_v32  ;;  %v7831_v39 = vld [vmem:[#allocation34_spill] sm:$0xff]  ;;  %v7834_v13 = vld [vmem:[#allocation33_spill] sm:$0xff]  ;;  %vm2189_vm1 = vcmask 539648  }
 0x534   : > { %v624_v23 = vadd.f32 %v603_v18, %v518_v54  ;;  %v626_v9 = vadd.f32 %v604_v57, %v520_v49  ;;  %v627_v56 = vadd.f32 %v605_v35, %v521_v3  ;;  %v629_v28 = vadd.f32 %v606_v22, %v523_v29  ;;  %v7836_v29 = vld [vmem:[#allocation35_spill] sm:$0xff]  ;;  %v7837_v54 = vld [vmem:[#allocation36_spill] sm:$0xff]  ;;  %v7838_v3 = vld [vmem:[#allocation38_spill] sm:$0xff] }
 0x535   : > { %v708_v19 = vsel %vm705_vm2, %v7832_v47, %v7831_v39  ;;  %2897 = vrot.lane.b32.xlu1 %v2859_v34, %s4267_s17  ;;  %2895 = vrot.lane.b32.xlu0 %v2858_v51, %s4267_s17  ;;  %v630_v7 = vadd.f32 %v607_v16, %v524_v37  ;;  %v726_v38 = vadd.f32 %v706_v25, %v620_v12  ;;  %v7839_v20 = vld [vmem:[#allocation104_spill] sm:$0xff]  ;;  %v7841_v12 = vld [vmem:[#allocation37_spill] sm:$0xff]  ;;  %v7842_v22 = vld [vmem:[#allocation39_spill] sm:$0xff] }
 0x536   : > { %v6027_v15 = vpop.permute.xlu1 %2535  ;;  %v727_v31 = vadd.f32 %v707_v27, %v621_v52  ;;  %v709_v32 = vsel %vm705_vm2, %v7831_v39, %v7834_v13  ;;  %v6032_v49 = vpop.permute.xlu0 %2533  ;;  %v710_v47 = vsel %vm705_vm2, %v7837_v54, %v7836_v29  ;;  %v711_v21 = vsel %vm705_vm2, %v7836_v29, %v7838_v3  ;;  %v7840_v57 = vld [vmem:[#allocation40_spill] sm:$0xff]  ;;  %v7843_v39 = vld [vmem:[#allocation42_spill] sm:$0xff]  ;;  %v7844_v25 = vld [vmem:[#allocation41_spill] sm:$0xff] }
 0x537   : > { %7833 = vst [vmem:[#allocation17_spill] sm:$0xff] %v6027_v15  ;;  %7835 = vst [vmem:[#allocation18_spill] sm:$0xff] %v6032_v49  ;;  %v2989_v18 = vmul.f32 %v7839_v20, %v5658_v53  ;;  %v2988_v37 = vmul.f32 %v7839_v20, %v5661_v8  ;;  %v729_v52 = vadd.f32 %v708_v19, %v623_v1  ;;  %v7845_v34 = vld [vmem:[#allocation43_spill] sm:$0xff]  ;;  %v7846_v51 = vld [vmem:[#allocation45_spill] sm:$0xff] }
 0x538   : > { %v712_v35 = vsel %vm705_vm2, %v7841_v12, %v7840_v57  ;;  %v713_v16 = vsel %vm705_vm2, %v7840_v57, %v7842_v22  ;;  %v812_v27 = vsel %vm811_vm3, %v7844_v25, %v7843_v39  ;;  %v813_v53 = vsel %vm811_vm3, %v7843_v39, %v7845_v34  ;;  %v7847_v29 = vld [vmem:[#allocation44_spill] sm:$0xff]  ;;  %v7848_v1 = vld [vmem:[#allocation46_spill] sm:$0xff]  ;;  %v7851_v3 = vld [vmem:[#allocation47_spill] sm:$0xff] }
 0x539   : > { %v814_v8 = vsel %vm811_vm3, %v7847_v29, %v7846_v51  ;;  %v815_v19 = vsel %vm811_vm3, %v7846_v51, %v7848_v1  ;;  %3031 = vrot.lane.b32.xlu1 %v2989_v18, %s4268_s20  ;;  %3029 = vrot.lane.b32.xlu0 %v2988_v37, %s4268_s20  ;;  %v730_v57 = vadd.f32 %v709_v32, %v624_v23  ;;  %v7850_v13 = vld [vmem:[#allocation48_spill] sm:$0xff]  ;;  %v3081_v18 = vld [vmem:[%s7345_s2 + $0x8] sm:$0xff]  ;;  %v7853_v1 = vld [vmem:[#allocation49_spill] sm:$0xff]  ;;  %vm2295_vm2 = vcmask 531456  }
 0x53a   : > { %v6064_v54 = vpop.permute.xlu1 %2277  ;;  %v732_v12 = vadd.f32 %v710_v47, %v626_v9  ;;  %v733_v25 = vadd.f32 %v711_v21, %v627_v56  ;;  %v816_v39 = vsel %vm811_vm3, %v7851_v3, %v7850_v13  ;;  %v6069_v34 = vpop.permute.xlu0 %2165  ;;  %v3118_v29 = vld [vmem:[%s7346_s3 + $0x10] sm:$0xff]  ;;  %v735_v37 = vadd.f32 %v712_v35, %v629_v28  ;;  %v7854_v21 = vld [vmem:[#allocation51_spill] sm:$0xff]  ;;  %v7855_v22 = vld [vmem:[#allocation50_spill] sm:$0xff] }
 0x53b   : > { %7849 = vst [vmem:[#allocation22_spill] sm:$0xff] %v6064_v54  ;;  %7852 = vst [vmem:[#allocation19_spill] sm:$0xff] %v6069_v34  ;;  %v736_v51 = vadd.f32 %v713_v16, %v630_v7  ;;  %v817_v23 = vsel %vm811_vm3, %v7850_v13, %v7853_v1  ;;  %v832_v56 = vadd.f32 %v812_v27, %v726_v38  ;;  %v7856_v34 = vld [vmem:[#allocation52_spill] sm:$0xff]  ;;  %v7858_v13 = vld [vmem:[#allocation54_spill] sm:$0xff] }
 0x53c   : > { %v833_v9 = vadd.f32 %v813_v53, %v727_v31  ;;  %v835_v32 = vadd.f32 %v814_v8, %v729_v52  ;;  %v836_v47 = vadd.f32 %v815_v19, %v730_v57  ;;  %v838_v3 = vadd.f32 %v816_v39, %v732_v12  ;;  %v7859_v35 = vld [vmem:[#allocation53_spill] sm:$0xff]  ;;  %v7860_v38 = vld [vmem:[#allocation55_spill] sm:$0xff]  ;;  %v7862_v27 = vld [vmem:[#allocation56_spill] sm:$0xff] }
 0x53d   : > { %v818_v54 = vsel %vm811_vm3, %v7855_v22, %v7854_v21  ;;  %v819_v49 = vsel %vm811_vm3, %v7854_v21, %v7856_v34  ;;  %3132 = vperm.xlu1 %4201, %v3118_v29   ;;  %3091 = vperm.xlu0 %4200, %v3081_v18   ;;  %v839_v7 = vadd.f32 %v817_v23, %v733_v25  ;;  %v7861_v22 = vld [vmem:[#allocation57_spill] sm:$0xff]  ;;  %v7863_v8 = vld [vmem:[#allocation58_spill] sm:$0xff]  ;;  %v7864_v29 = vld [vmem:[#allocation60_spill] sm:$0xff]  ;;  %vm2401_vm3 = vcmask 523264  }
 0x53e   : > { %v6086_v28 = vpop.permute.xlu1 %2531  ;;  %v918_v31 = vsel %vm917_vm4, %v7859_v35, %v7858_v13  ;;  %v919_v52 = vsel %vm917_vm4, %v7858_v13, %v7860_v38  ;;  %v6094_v16 = vpop.permute.xlu0 %2389  ;;  %v920_v53 = vsel %vm917_vm4, %v7862_v27, %v7861_v22  ;;  %v921_v19 = vsel %vm917_vm4, %v7861_v22, %v7863_v8  ;;  %v7865_v18 = vld [vmem:[#allocation59_spill] sm:$0xff]  ;;  %v7866_v21 = vld [vmem:[#allocation61_spill] sm:$0xff]  ;;  %v7868_v27 = vld [vmem:[#allocation62_spill] sm:$0xff] }
 0x53f   : > { %7857 = vst [vmem:[#allocation23_spill] sm:$0xff] %v6086_v28  ;;  %v2857_v57 = vmul.f32 %v7830_v33, %v5753_v26  ;;  %v2727_v12 = vmul.f32 %v7814_v11, %v5822_v40  ;;  %v841_v25 = vadd.f32 %v818_v54, %v735_v37  ;;  %v842_v39 = vadd.f32 %v819_v49, %v736_v51  ;;  %v7867_v35 = vld [vmem:[#allocation63_spill] sm:$0xff]  ;;  %v7869_v8 = vld [vmem:[#allocation64_spill] sm:$0xff]  ;;  %v7870_v1 = vld [vmem:[#allocation66_spill] sm:$0xff] }
 0x540   : > { %v922_v23 = vsel %vm917_vm4, %v7865_v18, %v7864_v29  ;;  %v923_v13 = vsel %vm917_vm4, %v7864_v29, %v7866_v21  ;;  %v924_v22 = vsel %vm917_vm4, %v7868_v27, %v7867_v35  ;;  %v925_v38 = vsel %vm917_vm4, %v7867_v35, %v7869_v8  ;;  %v7871_v34 = vld [vmem:[#allocation65_spill] sm:$0xff]  ;;  %v7873_v35 = vld [vmem:[#allocation67_spill] sm:$0xff] }
 0x541   : > { %v1024_v49 = vsel %vm1023_vm5, %v7871_v34, %v7870_v1  ;;  %2893 = vrot.lane.b32.xlu1 %v2857_v57, %s4267_s17  ;;  %2759 = vrot.lane.b32.xlu0 %v2727_v12, %s4266_s16  ;;  %v938_v37 = vadd.f32 %v918_v31, %v832_v56  ;;  %v939_v51 = vadd.f32 %v919_v52, %v833_v9  ;;  %v7874_v56 = vld [vmem:[#allocation69_spill] sm:$0xff]  ;;  %v7875_v31 = vld [vmem:[#allocation68_spill] sm:$0xff]  ;;  %vm2791_vm4 = vcmask 375808  }
 0x542   : > { %v6123_v54 = vpop.permute.xlu1 %2275  ;;  %v941_v29 = vadd.f32 %v920_v53, %v835_v32  ;;  %v942_v18 = vadd.f32 %v921_v19, %v836_v47  ;;  %v6125_v27 = vpop.permute.xlu0 %2273  ;;  %v944_v21 = vadd.f32 %v922_v23, %v838_v3  ;;  %v945_v11 = vadd.f32 %v923_v13, %v839_v7  ;;  %v7876_v32 = vld [vmem:[#allocation70_spill] sm:$0xff]  ;;  %v7877_v3 = vld [vmem:[#allocation72_spill] sm:$0xff]  ;;  %v7878_v7 = vld [vmem:[#allocation71_spill] sm:$0xff] }
 0x543   : > { %7872 = vst [vmem:[#allocation24_spill] sm:$0xff] %v6123_v54  ;;  %v1025_v8 = vsel %vm1023_vm5, %v7870_v1, %v7873_v35  ;;  %v2987_v34 = vmul.f32 %v7839_v20, %v5694_v36  ;;  %v947_v57 = vadd.f32 %v924_v22, %v841_v25  ;;  %v948_v12 = vadd.f32 %v925_v38, %v842_v39  ;;  %v4226_v1 = vld [vmem:[%s4412_s22 + $0x50] sm:$0xff]  ;;  %v7880_v53 = vld [vmem:[#allocation73_spill] sm:$0xff]  ;;  %v7881_v25 = vld [vmem:[#allocation75_spill] sm:$0xff] }
 0x544   : > { %v1044_v33 = vadd.f32 %v1024_v49, %v938_v37  ;;  %v1026_v9 = vsel %vm1023_vm5, %v7875_v31, %v7874_v56  ;;  %v1027_v47 = vsel %vm1023_vm5, %v7874_v56, %v7876_v32  ;;  %v1028_v52 = vsel %vm1023_vm5, %v7878_v7, %v7877_v3  ;;  %v7882_v39 = vld [vmem:[#allocation74_spill] sm:$0xff]  ;;  %v7883_v13 = vld [vmem:[#allocation76_spill] sm:$0xff]  ;;  %v7886_v56 = vld [vmem:[#allocation77_spill] sm:$0xff] }
 0x545   : > { %3200 = vrot.lane.b32.xlu1 %v4226_v1, %s4256_s24  ;;  %3027 = vrot.lane.b32.xlu0 %v2987_v34, %s4268_s20  ;;  %v1045_v38 = vadd.f32 %v1025_v8, %v939_v51  ;;  %v1029_v19 = vsel %vm1023_vm5, %v7877_v3, %v7880_v53  ;;  %v1030_v23 = vsel %vm1023_vm5, %v7882_v39, %v7881_v25  ;;  %v7885_v37 = vld [vmem:[#allocation78_spill] sm:$0xff]  ;;  %v7887_v31 = vld [vmem:[#allocation79_spill] sm:$0xff]  ;;  %v7890_v35 = vld [vmem:[#allocation80_spill] sm:$0xff] }
 0x546   : > { %v6144_v36 = vpop.permute.xlu1 %2387  ;;  %v1031_v22 = vsel %vm1023_vm5, %v7881_v25, %v7883_v13  ;;  %v6155_v49 = vpop.permute.xlu0 %2385  ;;  %v1130_v34 = vsel %vm1129_vm6, %v7886_v56, %v7885_v37  ;;  %v1131_v8 = vsel %vm1129_vm6, %v7885_v37, %v7887_v31  ;;  %v7888_v51 = vld [vmem:[#allocation103_spill] sm:$0xff]  ;;  %v1047_v1 = vadd.f32 %v1026_v9, %v941_v29  ;;  %v7889_v25 = vld [vmem:[#allocation81_spill] sm:$0xff]  ;;  %v7891_v56 = vld [vmem:[#allocation82_spill] sm:$0xff] }
 0x547   : > { %7879 = vst [vmem:[#allocation28_spill] sm:$0xff] %v6144_v36  ;;  %7884 = vst [vmem:[#allocation25_spill] sm:$0xff] %v6155_v49  ;;  %v2855_v3 = vmul.f32 %v7888_v51, %v5776_v10  ;;  %v2854_v7 = vmul.f32 %v7888_v51, %v5779_v50  ;;  %v1048_v39 = vadd.f32 %v1027_v47, %v942_v18  ;;  %v7895_v47 = vld [vmem:[#allocation106_spill] sm:$0xff]  ;;  %v2454_v49 = vld [vmem:[%s4412_s22 + $0x78] sm:$0xff]  ;;  %vm2539_vm5 = vcmask 392192  }
 0x548   : > { %v1050_v32 = vadd.f32 %v1028_v52, %v944_v21  ;;  %v1132_v53 = vsel %vm1129_vm6, %v7890_v35, %v7889_v25  ;;  %v1051_v13 = vadd.f32 %v1029_v19, %v945_v11  ;;  %v1053_v20 = vadd.f32 %v1030_v23, %v947_v57  ;;  %v7893_v35 = vld [vmem:[#allocation84_spill] sm:$0xff]  ;;  %v7894_v11 = vld [vmem:[#allocation83_spill] sm:$0xff] }
 0x549   : > { %v1133_v36 = vsel %vm1129_vm6, %v7889_v25, %v7891_v56  ;;  %2889 = vrot.lane.b32.xlu1 %v2855_v3, %s4267_s17  ;;  %2887 = vrot.lane.b32.xlu0 %v2854_v7, %s4267_s17  ;;  %v1054_v31 = vadd.f32 %v1031_v22, %v948_v12  ;;  %v1150_v29 = vadd.f32 %v1130_v34, %v1044_v33  ;;  %v7896_v3 = vld [vmem:[#allocation85_spill] sm:$0xff]  ;;  %v7897_v12 = vld [vmem:[#allocation87_spill] sm:$0xff]  ;;  %v7901_v7 = vld [vmem:[#allocation90_spill] sm:$0xff] }
 0x54a   : > { %v6175_v37 = vpop.permute.xlu1 %2527  ;;  %v1151_v18 = vadd.f32 %v1131_v8, %v1045_v38  ;;  %v6177_v21 = vpop.permute.xlu0 %2525  ;;  %v1153_v9 = vadd.f32 %v1132_v53, %v1047_v1  ;;  %v1134_v57 = vsel %vm1129_vm6, %v7894_v11, %v7893_v35  ;;  %v2985_v52 = vmul.f32 %v7895_v47, %v5717_v17  ;;  %v7898_v38 = vld [vmem:[#allocation86_spill] sm:$0xff]  ;;  %v7899_v53 = vld [vmem:[#allocation88_spill] sm:$0xff]  ;;  %v7900_v8 = vld [vmem:[#allocation89_spill] sm:$0xff] }
 0x54b   : > { %7892 = vst [vmem:[#allocation29_spill] sm:$0xff] %v6175_v37  ;;  %v2984_v19 = vmul.f32 %v7895_v47, %v5720_v43  ;;  %v1154_v23 = vadd.f32 %v1133_v36, %v1048_v39  ;;  %v1135_v33 = vsel %vm1129_vm6, %v7893_v35, %v7896_v3  ;;  %v1136_v22 = vsel %vm1129_vm6, %v7898_v38, %v7897_v12  ;;  %v7902_v1 = vld [vmem:[#allocation92_spill] sm:$0xff]  ;;  %v7903_v36 = vld [vmem:[#allocation94_spill] sm:$0xff]  ;;  %v7904_v39 = vld [vmem:[#allocation91_spill] sm:$0xff] }
 0x54c   : > { %v1137_v34 = vsel %vm1129_vm6, %v7897_v12, %v7899_v53  ;;  %v1236_v17 = vsel %vm1235_vm7, %v7901_v7, %v7900_v8  ;;  %v1237_v43 = vsel %vm1235_vm7, %v7900_v8, %v7902_v1  ;;  %v1238_v25 = vsel %vm1235_vm7, %v7904_v39, %v7903_v36  ;;  %v7906_v12 = vld [vmem:[#allocation93_spill] sm:$0xff]  ;;  %v7907_v7 = vld [vmem:[#allocation95_spill] sm:$0xff]  ;;  %v7908_v56 = vld [vmem:[#allocation96_spill] sm:$0xff] }
 0x54d   : > { %3023 = vrot.lane.b32.xlu1 %v2985_v52, %s4268_s20  ;;  %3021 = vrot.lane.b32.xlu0 %v2984_v19, %s4268_s20  ;;  %v1156_v11 = vadd.f32 %v1134_v57, %v1050_v32  ;;  %v1239_v38 = vsel %vm1235_vm7, %v7903_v36, %v7906_v12  ;;  %v1240_v8 = vsel %vm1235_vm7, %v7908_v56, %v7907_v7  ;;  %v7909_v1 = vld [vmem:[#allocation98_spill] sm:$0xff]  ;;  %v3117_v52 = vld [vmem:[%s7346_s3 + $0x8] sm:$0xff]  ;;  %v7910_v36 = vld [vmem:[#allocation100_spill] sm:$0xff]  ;;  %vm2665_vm6 = vcmask 384000  }
 0x54e   : > { %v6206_v35 = vpop.permute.xlu1 %2661  ;;  %v1241_v39 = vsel %vm1235_vm7, %v7907_v7, %v7909_v1  ;;  %v6217_v3 = vpop.permute.xlu0 %2659  ;;  %v3080_v32 = vld [vmem:[%s7345_s2] sm:$0xff]  ;;  %v1157_v57 = vadd.f32 %v1135_v33, %v1051_v13  ;;  %v1159_v19 = vadd.f32 %v1136_v22, %v1053_v20  ;;  %v7911_v56 = vld [vmem:[#allocation97_spill] sm:$0xff]  ;;  %v7912_v53 = vld [vmem:[#allocation99_spill] sm:$0xff]  ;;  %v1160_v1 = vadd.f32 %v1137_v34, %v1054_v31 }
 0x54f   : > { %7905 = vst [vmem:[#allocation30_spill] sm:$0xff] %v6206_v35  ;;  %v1242_v12 = vsel %vm1235_vm7, %v7911_v56, %v7910_v36  ;;  %v1243_v7 = vsel %vm1235_vm7, %v7910_v36, %v7912_v53  ;;  %v6231_v37 = vadd.f32 %v1236_v17, %v1150_v29  ;;  %v6233_v54 = vadd.f32 %v1237_v43, %v1151_v18  ;;  %v6243_v56 = vld [vmem:[%s4412_s22 + $0x58] sm:$0xff] }
 0x550   : > { %v6235_v28 = vadd.f32 %v1238_v25, %v1153_v9  ;;  %v6238_v13 = vadd.f32 %v1239_v38, %v1154_v23  ;;  %v1262_v20 = vadd.f32 %v1240_v8, %v1156_v11  ;;  %v1263_v33 = vadd.f32 %v1241_v39, %v1157_v57  ;;  %7913 = vst [vmem:[#allocation34_spill] sm:$0xff] %v6243_v56  ;;  %v6246_v36 = vld [vmem:[%s4412_s22 + $0x38] sm:$0xff]  ;;  %v7917_v8 = vld [vmem:[#allocation108_spill] sm:$0xff]  ;;  %v7918_v39 = vld [vmem:[#allocation111_spill] sm:$0xff] }
 0x551   : > { %3127 = vperm.xlu1 %4201, %v3117_v52   ;;  %3086 = vperm.xlu0 %4200, %v3080_v32   ;;  %7914 = vst [vmem:[#allocation31_spill] sm:$0xff] %v6246_v36  ;;  %v1265_v31 = vadd.f32 %v1242_v12, %v1159_v19  ;;  %v1266_v29 = vadd.f32 %v1243_v7, %v1160_v1  ;;  %v6251_v9 = vld [vmem:[%s4412_s22 + $0x18] sm:$0xff]  ;;  %v7922_v7 = vld [vmem:[#allocation114_spill] sm:$0xff]  ;;  %vm2917_vm7 = vcmask 367616  }
 0x552   : > { %v6240_v22 = vpop.permute.xlu1 %2383  ;;  %v6248_v18 = vpop.permute.xlu0 %2271  ;;  %7915 = vst [vmem:[#allocation35_spill] sm:$0xff] %v6251_v9  ;;  %v2983_v23 = vmul.f32 %v7895_v47, %v5753_v26  ;;  %v2853_v34 = vmul.f32 %v7888_v51, %v5822_v40  ;;  %v6258_v17 = vmul.f32 %v5190_v6, %v2454_v49  ;;  %v6262_v43 = vmul.f32 %v5212_v48, %v6243_v56  ;;  %v7916_v26 = vld [vmem:[#allocation105_spill] sm:$0xff]  ;;  %v7934_v47 = vld [vmem:[#allocation126_spill] sm:$0xff]  ;;  %v7975_v51 = vld [vmem:[#allocation163_spill] sm:$0xff] }
 0x553   : > { %v6265_v1 = vmul.f32 %v5210_v46, %v2454_v49  ;;  %v6269_v25 = vmul.f32 %v5220_v41, %v6246_v36  ;;  %v6272_v11 = vmul.f32 %v5230_v4, %v2454_v49  ;;  %v6280_v48 = vmul.f32 %v5232_v2, %v6243_v56  ;;  %v7921_v57 = vld [vmem:[#allocation109_spill] sm:$0xff] }
 0x554   : > { %v6284_v46 = vmul.f32 %v5240_v0, %v6246_v36  ;;  %v6288_v41 = vmul.f32 %v5242_v63, %v6251_v9  ;;  %v2980_v12 = vmul.f32 %v7916_v26, %v5779_v50  ;;  %v6295_v38 = vmul.f32 %v5250_v24, %v2454_v49 }
 0x555   : > { %3019 = vrot.lane.b32.xlu1 %v2983_v23, %s4268_s20  ;;  %2885 = vrot.lane.b32.xlu0 %v2853_v34, %s4267_s17  ;;  %v6299_v2 = vmul.f32 %v5252_v14, %v6243_v56  ;;  %v6303_v0 = vmul.f32 %v5260_v59, %v6246_v36  ;;  %v1349_v63 = vsel %vm1341_vm8, %v5312_v5, %v5310_v60  ;;  %v8003_v36 = vld [vmem:[#allocation213_spill] sm:$0xff] }
 0x556   : > { %v6276_v6 = vpop.permute.xlu1 %2657  ;;  %v6290_v4 = vpop.permute.xlu0 %2523  ;;  %v1348_v50 = vsel %vm1341_vm8, %v5322_v58, %v5312_v5  ;;  %v1347_v24 = vsel %vm1341_vm8, %v7917_v8, %v5332_v44  ;;  %v1346_v14 = vsel %vm1341_vm8, %v7918_v39, %v7917_v8  ;;  %v2981_v59 = vmul.f32 %v7916_v26, %v5776_v10  ;;  %v7920_v5 = vld [vmem:[#allocation112_spill] sm:$0xff] }
 0x557   : > { %v6321_v52 = vmul.f32 %v5262_v62, %v6251_v9  ;;  %v6324_v32 = vmul.f32 %v5270_v45, %v2454_v49  ;;  %v6328_v58 = vmul.f32 %v5272_v55, %v6243_v56  ;;  %v1455_v19 = vsel %vm1447_vm9, %v7921_v57, %v7920_v5  ;;  %v6338_v62 = vld [vmem:[%s4412_s22 + $0x30] sm:$0xff]  ;;  %v7926_v5 = vld [vmem:[#allocation115_spill] sm:$0xff] }
 0x558   : > { %v1454_v23 = vsel %vm1447_vm9, %v7922_v7, %v7921_v57  ;;  %7923 = vst [vmem:[#allocation40_spill] sm:$0xff] %v6338_v62  ;;  %v2979_v55 = vmul.f32 %v7916_v26, %v5822_v40  ;;  %v1372_v10 = vadd.f32 %v1349_v63, %v1266_v29  ;;  %v1371_v49 = vadd.f32 %v1348_v50, %v1265_v31  ;;  %v7924_v57 = vld [vmem:[#allocation116_spill] sm:$0xff]  ;;  %v7925_v7 = vld [vmem:[#allocation113_spill] sm:$0xff]  ;;  %v7990_v9 = vld [vmem:[#allocation175_spill] sm:$0xff] }
 0x559   : > { %7919 = vst [vmem:[#allocation36_spill] sm:$0xff] %v6328_v58  ;;  %3013 = vrot.lane.b32.xlu1 %v2980_v12, %s4268_s20  ;;  %3194 = vrot.lane.b32.xlu0 %v6338_v62, %s4256_s24  ;;  %v1369_v34 = vadd.f32 %v1347_v24, %v1263_v33  ;;  %v1368_v8 = vadd.f32 %v1346_v14, %v1262_v20  ;;  %v3116_v12 = vld [vmem:[%s7346_s3] sm:$0xff]  ;;  %v7927_v20 = vld [vmem:[#allocation117_spill] sm:$0xff]  ;;  %v7928_v63 = vld [vmem:[#allocation120_spill] sm:$0xff] }
 0x55a   : > { %v6342_v45 = vpop.permute.xlu1 %2381  ;;  %v6346_v39 = vpop.permute.xlu0 %2379  ;;  %v1345_v44 = vsel %vm1341_vm8, %v7925_v7, %v7924_v57  ;;  %v1453_v60 = vsel %vm1447_vm9, %v7926_v5, %v5372_v61  ;;  %v1344_v40 = vsel %vm1341_vm8, %v5380_v30, %v7925_v7  ;;  %v1561_v33 = vsel %vm1553_vm10, %v7927_v20, %v5382_v42  ;;  %v7929_v24 = vld [vmem:[#allocation121_spill] sm:$0xff]  ;;  %v7930_v57 = vld [vmem:[#allocation122_spill] sm:$0xff]  ;;  %v7931_v61 = vld [vmem:[#allocation123_spill] sm:$0xff] }
 0x55b   : > { %v1478_v31 = vadd.f32 %v1455_v19, %v1372_v10  ;;  %v1477_v29 = vadd.f32 %v1454_v23, %v1371_v49  ;;  %v1560_v50 = vsel %vm1553_vm10, %v7928_v63, %v7927_v20  ;;  %v1452_v14 = vsel %vm1447_vm9, %v7929_v24, %v7926_v5  ;;  %v7932_v62 = vld [vmem:[#allocation124_spill] sm:$0xff]  ;;  %v7933_v30 = vld [vmem:[#allocation125_spill] sm:$0xff]  ;;  %v7935_v42 = vld [vmem:[#allocation127_spill] sm:$0xff] }
 0x55c   : > { %v1343_v53 = vsel %vm1341_vm8, %v7931_v61, %v7930_v57  ;;  %v1451_v7 = vsel %vm1447_vm9, %v7933_v30, %v7932_v62  ;;  %v1559_v19 = vsel %vm1553_vm10, %v7935_v42, %v7934_v47  ;;  %v1366_v5 = vadd.f32 %v1345_v44, %v6238_v13  ;;  %v7937_v62 = vld [vmem:[#allocation128_spill] sm:$0xff]  ;;  %v7938_v57 = vld [vmem:[#allocation129_spill] sm:$0xff]  ;;  %v7939_v47 = vld [vmem:[#allocation130_spill] sm:$0xff] }
 0x55d   : > { %3122 = vperm.xlu1 %4201, %v3116_v12   ;;  %3015 = vrot.lane.b32.xlu0 %v2981_v59, %s4268_s20  ;;  %v1475_v10 = vadd.f32 %v1453_v60, %v1369_v34  ;;  %v1365_v49 = vadd.f32 %v1344_v40, %v6235_v28  ;;  %v1584_v20 = vadd.f32 %v1561_v33, %v1478_v31  ;;  %v7940_v59 = vld [vmem:[#allocation131_spill] sm:$0xff]  ;;  %v7941_v34 = vld [vmem:[#allocation132_spill] sm:$0xff]  ;;  %v7942_v33 = vld [vmem:[#allocation133_spill] sm:$0xff] }
 0x55e   : > { %v6379_v23 = vpop.permute.xlu1 %2519  ;;  %v6383_v63 = vpop.permute.xlu0 %2517  ;;  %v1583_v24 = vadd.f32 %v1560_v50, %v1477_v29  ;;  %v1667_v26 = vsel %vm1659_vm11, %v7938_v57, %v7937_v62  ;;  %v1450_v12 = vsel %vm1447_vm9, %v7939_v47, %v7933_v30  ;;  %v1342_v56 = vsel %vm1341_vm8, %v7940_v59, %v7931_v61  ;;  %v7943_v29 = vld [vmem:[#allocation134_spill] sm:$0xff]  ;;  %v7944_v50 = vld [vmem:[#allocation135_spill] sm:$0xff] }
 0x55f   : > { %7936 = vst [vmem:[#allocation37_spill] sm:$0xff] %v6379_v23  ;;  %v1474_v44 = vadd.f32 %v1452_v14, %v1368_v8  ;;  %v1363_v60 = vadd.f32 %v1343_v53, %v6233_v54  ;;  %v1472_v28 = vadd.f32 %v1451_v7, %v1366_v5  ;;  %v1581_v13 = vadd.f32 %v1559_v19, %v1475_v10  ;;  %v7947_v14 = vld [vmem:[#allocation137_spill] sm:$0xff]  ;;  %v7948_v7 = vld [vmem:[#allocation138_spill] sm:$0xff]  ;;  %v7949_v19 = vld [vmem:[#allocation139_spill] sm:$0xff] }
 0x560   : > { %v1666_v40 = vsel %vm1659_vm11, %v7941_v34, %v7938_v57  ;;  %v1558_v31 = vsel %vm1553_vm10, %v7942_v33, %v7935_v42  ;;  %v1449_v47 = vsel %vm1447_vm9, %v7944_v50, %v7943_v29  ;;  %v1690_v54 = vadd.f32 %v1667_v26, %v1584_v20  ;;  %v7946_v57 = vld [vmem:[#allocation136_spill] sm:$0xff]  ;;  %v7951_v10 = vld [vmem:[#allocation141_spill] sm:$0xff]  ;;  %v7952_v26 = vld [vmem:[#allocation142_spill] sm:$0xff] }
 0x561   : > { %3011 = vrot.lane.b32.xlu1 %v2979_v55, %s4268_s20  ;;  %2537 = vrot.lane.b32.xlu0 %v6258_v17, %s4264_s12  ;;  %v1471_v53 = vadd.f32 %v1450_v12, %v1365_v49  ;;  %v1362_v8 = vadd.f32 %v1342_v56, %v6231_v37  ;;  %v1557_v42 = vsel %vm1553_vm10, %v7947_v14, %v7946_v57  ;;  %v7950_v5 = vld [vmem:[#allocation140_spill] sm:$0xff]  ;;  %v6427_v56 = vld [vmem:[%s7348_s5] sm:$0xff]  ;;  %v7954_v59 = vld [vmem:[#allocation143_spill] sm:$0xff]  ;;  %vm3043_vm8 = vcmask 359424  }
 0x562   : > { %v6407_v61 = vpop.permute.xlu1 %2653  ;;  %v6413_v30 = vpop.permute.xlu0 %2651  ;;  %v1665_v55 = vsel %vm1659_vm11, %v7949_v19, %v7948_v7  ;;  %v1773_v17 = vsel %vm1765_vm12, %v7951_v10, %v7950_v5  ;;  %v1556_v37 = vsel %vm1553_vm10, %v7952_v26, %v7947_v14  ;;  %7953 = vst [vmem:[#allocation41_spill] sm:$0xff] %v6427_v56  ;;  %v1689_v49 = vadd.f32 %v1666_v40, %v1583_v24  ;;  %v7955_v57 = vld [vmem:[#allocation144_spill] sm:$0xff]  ;;  %v7956_v26 = vld [vmem:[#allocation145_spill] sm:$0xff]  ;;  %v4228_v24 = vld [vmem:[%s4412_s22 + $0x68] sm:$0xff] }
 0x563   : > { %7945 = vst [vmem:[#allocation42_spill] sm:$0xff] %v6407_v61  ;;  %v1580_v20 = vadd.f32 %v1558_v31, %v1474_v44  ;;  %v1469_v12 = vadd.f32 %v1449_v47, %v1363_v60  ;;  %v1448_v34 = vsel %vm1447_vm9, %v7954_v59, %v7944_v50  ;;  %4133 = vmatprep.mubr.msk.f32.mxu1 %vm3228_vm15, %v6427_v56  ;;  %v6443_v44 = vld [vmem:[%s4412_s22 + $0x10] sm:$0xff]  ;;  %v7958_v50 = vld [vmem:[#allocation146_spill] sm:$0xff]  ;;  %v7959_v47 = vld [vmem:[#allocation147_spill] sm:$0xff]  ;;  %vm4270_vm9 = vmmov 0  }
 0x564   : > { %v1578_v33 = vadd.f32 %v1557_v42, %v1472_v28  ;;  %v1772_v14 = vsel %vm1765_vm12, %v7955_v57, %v7951_v10  ;;  %v1664_v7 = vsel %vm1659_vm11, %v7956_v26, %v7949_v19  ;;  %7957 = vst [vmem:[#allocation45_spill] sm:$0xff] %v6443_v44  ;;  %v1687_v28 = vadd.f32 %v1665_v55, %v1581_v13  ;;  %v7960_v10 = vld [vmem:[#allocation148_spill] sm:$0xff]  ;;  %v7961_v59 = vld [vmem:[#allocation149_spill] sm:$0xff]  ;;  %v7963_v56 = vld [vmem:[#allocation151_spill] sm:$0xff] }
 0x565   : > { %3204 = vrot.lane.b32.xlu1 %v4228_v24, %s4256_s24  ;;  %3188 = vrot.lane.b32.xlu0 %v6443_v44, %s4256_s24  ;;  %v1796_v40 = vadd.f32 %v1773_v17, %v1690_v54  ;;  %v1577_v31 = vadd.f32 %v1556_v37, %v1471_v53  ;;  %v1555_v57 = vsel %vm1553_vm10, %v7959_v47, %v7958_v50  ;;  %v7962_v24 = vld [vmem:[#allocation150_spill] sm:$0xff]  ;;  %v7964_v13 = vld [vmem:[#allocation152_spill] sm:$0xff]  ;;  %v7965_v54 = vld [vmem:[#allocation153_spill] sm:$0xff] }
 0x566   : > { %v6447_v60 = vpop.permute.xlu1 %2787  ;;  %v6452_v42 = vpop.permute.xlu0 %2785  ;;  %v1468_v19 = vadd.f32 %v1448_v34, %v1362_v8  ;;  %v1663_v26 = vsel %vm1659_vm11, %v7961_v59, %v7960_v10  ;;  %v1771_v29 = vsel %vm1765_vm12, %v7963_v56, %v7962_v24  ;;  %v1879_v53 = vsel %vm1871_vm13, %v7965_v54, %v7964_v13  ;;  %v7966_v37 = vld [vmem:[#allocation154_spill] sm:$0xff]  ;;  %v7967_v8 = vld [vmem:[#allocation155_spill] sm:$0xff]  ;;  %v7968_v10 = vld [vmem:[#allocation156_spill] sm:$0xff] }
 0x567   : > { %v1795_v55 = vadd.f32 %v1772_v14, %v1689_v49  ;;  %v1686_v17 = vadd.f32 %v1664_v7, %v1580_v20  ;;  %v1662_v50 = vsel %vm1659_vm11, %v7966_v37, %v7961_v59  ;;  %v1554_v34 = vsel %vm1553_vm10, %v7967_v8, %v7959_v47  ;;  %v7969_v24 = vld [vmem:[#allocation157_spill] sm:$0xff]  ;;  %v4230_v7 = vld [vmem:[%s4412_s22 + $0x60] sm:$0xff] }
 0x568   : > { %v1575_v5 = vadd.f32 %v1555_v57, %v1469_v12  ;;  %v1878_v62 = vsel %vm1871_vm13, %v7968_v10, %v7965_v54  ;;  %v1770_v44 = vsel %vm1765_vm12, %v7969_v24, %v7963_v56  ;;  %v1684_v20 = vadd.f32 %v1663_v26, %v1578_v33  ;;  %v7970_v59 = vld [vmem:[#allocation158_spill] sm:$0xff]  ;;  %v7971_v54 = vld [vmem:[#allocation159_spill] sm:$0xff]  ;;  %v7972_v24 = vld [vmem:[#allocation160_spill] sm:$0xff] }
 0x569   : > { %2529 = vrot.lane.b32.xlu1 %v6262_v43, %s4264_s12  ;;  %3202 = vrot.lane.b32.xlu0 %v4230_v7, %s4256_s24  ;;  %v1793_v14 = vadd.f32 %v1771_v29, %v1687_v28  ;;  %v1902_v12 = vadd.f32 %v1879_v53, %v1796_v40  ;;  %v1683_v57 = vadd.f32 %v1662_v50, %v1577_v31  ;;  %v7973_v37 = vld [vmem:[#allocation161_spill] sm:$0xff]  ;;  %v7974_v13 = vld [vmem:[#allocation162_spill] sm:$0xff]  ;;  %v7976_v33 = vld [vmem:[#allocation164_spill] sm:$0xff]  ;;  %vm3847_vm10 = vcmask 1040384  }
 0x56a   : > { %v6479_v49 = vpop.permute.xlu1 %2515  ;;  %v6481_v47 = vpop.permute.xlu0 %2377  ;;  %v1574_v10 = vadd.f32 %v1554_v34, %v1468_v19  ;;  %v1661_v56 = vsel %vm1659_vm11, %v7971_v54, %v7970_v59  ;;  %v1769_v43 = vsel %vm1765_vm12, %v7973_v37, %v7972_v24  ;;  %v1901_v8 = vadd.f32 %v1878_v62, %v1795_v55  ;;  %v7977_v28 = vld [vmem:[#allocation165_spill] sm:$0xff]  ;;  %v7978_v31 = vld [vmem:[#allocation166_spill] sm:$0xff]  ;;  %v7979_v19 = vld [vmem:[#allocation167_spill] sm:$0xff] }
 0x56b   : > { %v1792_v7 = vadd.f32 %v1770_v44, %v1686_v17  ;;  %v1877_v29 = vsel %vm1871_vm13, %v7975_v51, %v7974_v13  ;;  %v1985_v40 = vsel %vm1977_vm14, %v7977_v28, %v7976_v33  ;;  %v1768_v50 = vsel %vm1765_vm12, %v7978_v31, %v7973_v37  ;;  %v7980_v53 = vld [vmem:[#allocation168_spill] sm:$0xff]  ;;  %v7981_v44 = vld [vmem:[#allocation218_spill] sm:$0xff]  ;;  %v7982_v37 = vld [vmem:[#allocation169_spill] sm:$0xff] }
 0x56c   : > { %v1660_v26 = vsel %vm1659_vm11, %v7979_v19, %v7971_v54  ;;  %v1984_v62 = vsel %vm1977_vm14, %v7980_v53, %v7977_v28  ;;  %v1681_v17 = vadd.f32 %v1661_v56, %v1575_v5  ;;  %v1790_v34 = vadd.f32 %v1769_v43, %v1684_v20  ;;  %v7984_v24 = vld [vmem:[#allocation171_spill] sm:$0xff]  ;;  %v7985_v13 = vld [vmem:[#allocation176_spill] sm:$0xff]  ;;  %v7986_v5 = vld [vmem:[#allocation177_spill] sm:$0xff] }
 0x56d   : > { %3198 = vrot.lane.b32.xlu1 %v7981_v44, %s4256_s24  ;;  %2663 = vrot.lane.b32.xlu0 %v6265_v1, %s4265_s15  ;;  %v1876_v31 = vsel %vm1871_vm13, %v7982_v37, %v7975_v51  ;;  %v1899_v19 = vadd.f32 %v1877_v29, %v1793_v14  ;;  %v2008_v53 = vadd.f32 %v1985_v40, %v1902_v12  ;;  %v7983_v44 = vld [vmem:[#allocation170_spill] sm:$0xff]  ;;  %v7987_v37 = vld [vmem:[#allocation172_spill] sm:$0xff]  ;;  %v7988_v59 = vld [vmem:[#allocation173_spill] sm:$0xff] }
 0x56e   : > { %v2784_v55 = vpop.permute.xlu1 %2783  ;;  %v6515_v28 = vpop.permute.xlu0 %2649  ;;  %v1767_v1 = vsel %vm1765_vm12, %v7984_v24, %v7983_v44  ;;  %v2091_v20 = vsel %vm2083_vm0, %v7986_v5, %v7985_v13  ;;  %v1789_v56 = vadd.f32 %v1768_v50, %v1683_v57  ;;  %v1680_v43 = vadd.f32 %v1660_v26, %v1574_v10  ;;  %v7989_v61 = vld [vmem:[#allocation174_spill] sm:$0xff]  ;;  %v7991_v12 = vld [vmem:[#allocation188_spill] sm:$0xff]  ;;  %v7992_v29 = vld [vmem:[#allocation189_spill] sm:$0xff] }
 0x56f   : > { %v6513_v54 = vsel %vm2791_vm4, %v2784_v55, %v6452_v42  ;;  %v2007_v51 = vadd.f32 %v1984_v62, %v1901_v8  ;;  %v1875_v55 = vsel %vm1871_vm13, %v7988_v59, %v7987_v37  ;;  %v1898_v33 = vadd.f32 %v1876_v31, %v1792_v7  ;;  %v4231_v57 = vld [vmem:[%s4412_s22 + $0x40] sm:$0xff]  ;;  %v7994_v62 = vld [vmem:[#allocation179_spill] sm:$0xff]  ;;  %v7996_v44 = vld [vmem:[#allocation181_spill] sm:$0xff] }
 0x570   : > { %v1983_v14 = vsel %vm1977_vm14, %v7990_v9, %v7989_v61  ;;  %v2197_v40 = vsel %vm2189_vm1, %v7992_v29, %v7991_v12  ;;  %v1787_v8 = vadd.f32 %v1767_v1, %v1681_v17  ;;  %v2114_v50 = vadd.f32 %v2091_v20, %v2008_v53  ;;  %v7993_v7 = vld [vmem:[#allocation178_spill] sm:$0xff]  ;;  %v7997_v53 = vld [vmem:[#allocation200_spill] sm:$0xff]  ;;  %v7998_v1 = vld [vmem:[#allocation201_spill] sm:$0xff] }
 0x571   : > { %2521 = vrot.lane.b32.xlu1 %v6269_v25, %s4264_s12  ;;  %3196 = vrot.lane.b32.xlu0 %v4231_v57, %s4256_s24  ;;  %v1874_v26 = vsel %vm1871_vm13, %v7993_v7, %v7988_v59  ;;  %v1766_v31 = vsel %vm1765_vm12, %v7994_v62, %v7984_v24  ;;  %v6546_v61 = vadd.f32 %v1875_v55, %v1790_v34  ;;  %v7995_v25 = vld [vmem:[#allocation180_spill] sm:$0xff]  ;;  %v7999_v7 = vld [vmem:[#allocation182_spill] sm:$0xff]  ;;  %v8000_v24 = vld [vmem:[#allocation183_spill] sm:$0xff] }
 0x572   : > { %v6536_v10 = vpop.permute.xlu1 %2511  ;;  %v6544_v37 = vpop.permute.xlu0 %2509  ;;  %v2090_v57 = vsel %vm2083_vm0, %v7995_v25, %v7986_v5  ;;  %v1982_v17 = vsel %vm1977_vm14, %v7996_v44, %v7990_v9  ;;  %v2303_v59 = vsel %vm2295_vm2, %v7998_v1, %v7997_v53  ;;  %v6557_v20 = vadd.f32 %v1983_v14, %v1899_v19  ;;  %v8001_v55 = vld [vmem:[#allocation191_spill] sm:$0xff]  ;;  %v8002_v13 = vld [vmem:[#allocation212_spill] sm:$0xff] }
 0x573   : > { %v1873_v62 = vsel %vm1871_vm13, %v8000_v24, %v7999_v7  ;;  %v2220_v34 = vadd.f32 %v2197_v40, %v2114_v50  ;;  %v1872_v12 = vsel %vm1871_vm13, %v8001_v55, %v8000_v24  ;;  %v1895_v5 = vadd.f32 %v1874_v26, %v1789_v56  ;;  %v8005_v50 = vld [vmem:[#allocation195_spill] sm:$0xff]  ;;  %v8008_v55 = vld [vmem:[#allocation190_spill] sm:$0xff]  ;;  %v8015_v53 = vld [vmem:[#allocation184_spill] sm:$0xff] }
 0x574   : > { %v1786_v25 = vadd.f32 %v1766_v31, %v1680_v43  ;;  %v2409_v9 = vsel %vm2401_vm3, %v8003_v36, %v8002_v13  ;;  %v2113_v44 = vadd.f32 %v2090_v57, %v2007_v51  ;;  %v2004_v14 = vadd.f32 %v1982_v17, %v1898_v33  ;;  %v8006_v24 = vld [vmem:[#allocation203_spill] sm:$0xff]  ;;  %v8007_v31 = vld [vmem:[#allocation185_spill] sm:$0xff]  ;;  %v8010_v33 = vld [vmem:[#allocation192_spill] sm:$0xff] }
 0x575   : > { %2789 = vrot.lane.b32.xlu1 %v6272_v11, %s4266_s16  ;;  %2655 = vrot.lane.b32.xlu0 %v6280_v48, %s4265_s15  ;;  %v2326_v40 = vadd.f32 %v2303_v59, %v2220_v34  ;;  %v1978_v56 = vsel %vm1977_vm14, %v8006_v24, %v8005_v50  ;;  %v6579_v26 = vadd.f32 %v1873_v62, %v1787_v8  ;;  %v8009_v48 = vld [vmem:[#allocation18_spill] sm:$0xff]  ;;  %v8011_v57 = vld [vmem:[#allocation187_spill] sm:$0xff]  ;;  %v8012_v17 = vld [vmem:[#allocation193_spill] sm:$0xff] }
 0x576   : > { %v6572_v19 = vpop.permute.xlu1 %2645  ;;  %v6577_v43 = vpop.permute.xlu0 %2643  ;;  %v1980_v11 = vsel %vm1977_vm14, %v8008_v55, %v8007_v31  ;;  %v1892_v7 = vadd.f32 %v1872_v12, %v1786_v25  ;;  %v2550_v13 = vsel %vm2539_vm5, %v8009_v48, %v6027_v15  ;;  %v2196_v51 = vsel %vm2189_vm1, %v8010_v33, %v7992_v29  ;;  %v8013_v8 = vld [vmem:[#allocation207_spill] sm:$0xff]  ;;  %v8016_v29 = vld [vmem:[#allocation10_spill] sm:$0xff] }
 0x577   : > { %8004 = vst [vmem:[#allocation44_spill] sm:$0xff] %v6572_v19  ;;  %v2088_v59 = vsel %vm2083_vm0, %v8012_v17, %v8011_v57  ;;  %v2432_v34 = vadd.f32 %v2409_v9, %v2326_v40  ;;  %v8014_v62 = vld [vmem:[#allocation215_spill] sm:$0xff]  ;;  %v1981_v12 = vsel %vm1977_vm14, %v8007_v31, %v8015_v53  ;;  %v2676_v55 = vsel %vm2665_vm6, %v6217_v3, %v6206_v35  ;;  %v8021_v31 = vld [vmem:[#allocation6_spill] sm:$0xff] }
 0x578   : > { %v2084_v24 = vsel %vm2083_vm0, %v8014_v62, %v8013_v8  ;;  %v1998_v25 = vadd.f32 %v1978_v56, %v1892_v7  ;;  %v8017_v33 = vld [vmem:[#allocation7_spill] sm:$0xff]  ;;  %v2001_v40 = vadd.f32 %v1980_v11, %v1895_v5  ;;  %v8020_v62 = vld [vmem:[#allocation205_spill] sm:$0xff]  ;;  %v2219_v35 = vadd.f32 %v2196_v51, %v2113_v44 }
 0x579   : > { %3190 = vrot.lane.b32.xlu1 %v8016_v29, %s4256_s24  ;;  %3192 = vrot.lane.b32.xlu0 %v8017_v33, %s4256_s24  ;;  %v8019_v17 = vld [vmem:[#allocation199_spill] sm:$0xff]  ;;  %v2574_v19 = vadd.f32 %v2550_v13, %v2432_v34  ;;  %v2110_v23 = vadd.f32 %v2088_v59, %v2004_v14  ;;  %v2802_v33 = vsel %vm2791_vm4, %v6452_v42, %v6447_v60  ;;  %v8024_v5 = vld [vmem:[#allocation217_spill] sm:$0xff] }
 0x57a   : > { %v6606_v9 = vpop.permute.xlu1 %2779  ;;  %v2194_v15 = vsel %vm2189_vm1, %v8020_v62, %v8019_v17  ;;  %v8022_v7 = vld [vmem:[#allocation19_spill] sm:$0xff]  ;;  %v6614_v53 = vpop.permute.xlu0 %2777  ;;  %v2104_v29 = vadd.f32 %v2084_v24, %v1998_v25  ;;  %v2296_v13 = vsel %vm2295_vm2, %v6248_v18, %v6125_v27  ;;  %v8025_v34 = vld [vmem:[#allocation197_spill] sm:$0xff]  ;;  %v8026_v62 = vld [vmem:[#allocation202_spill] sm:$0xff] }
 0x57b   : > { %8018 = vst [vmem:[#allocation48_spill] sm:$0xff] %v6606_v9  ;;  %v2190_v56 = vsel %vm2189_vm1, %v8022_v7, %v8021_v31  ;;  %v8023_v9 = vld [vmem:[#allocation211_spill] sm:$0xff]  ;;  %v2700_v58 = vadd.f32 %v2676_v55, %v2574_v19  ;;  %v2086_v44 = vsel %vm2083_vm0, %v8026_v62, %v8025_v34  ;;  %v2216_v14 = vadd.f32 %v2194_v15, %v2110_v23  ;;  %v8027_v19 = vld [vmem:[#allocation194_spill] sm:$0xff]  ;;  %v8028_v18 = vld [vmem:[#allocation13_spill] sm:$0xff] }
 0x57c   : > { %v2300_v11 = vsel %vm2295_vm2, %v8024_v5, %v8023_v9  ;;  %v2210_v51 = vadd.f32 %v2190_v56, %v2104_v29  ;;  %v1979_v59 = vsel %vm1977_vm14, %v8005_v50, %v8027_v19  ;;  %v2406_v24 = vsel %vm2401_vm3, %v6094_v16, %v8028_v18  ;;  %v8030_v55 = vld [vmem:[#allocation214_spill] sm:$0xff]  ;;  %v8031_v16 = vld [vmem:[#allocation204_spill] sm:$0xff] }
 0x57d   : > { %2647 = vrot.lane.b32.xlu1 %v6284_v46, %s4265_s15  ;;  %2513 = vrot.lane.b32.xlu0 %v6288_v41, %s4264_s12  ;;  %v2826_v25 = vadd.f32 %v2802_v33, %v2700_v58  ;;  %v2402_v15 = vsel %vm2401_vm3, %v6481_v47, %v6346_v39  ;;  %v8029_v46 = vld [vmem:[#allocation209_spill] sm:$0xff]  ;;  %v2322_v7 = vadd.f32 %v2300_v11, %v2216_v14  ;;  %v8032_v5 = vld [vmem:[#allocation12_spill] sm:$0xff]  ;;  %v8033_v62 = vld [vmem:[#allocation22_spill] sm:$0xff]  ;;  %s359_s12 = scalar_lea.vmem %s7353_s10, %s4164_s27 }
 0x57e   : > { %v6632_v42 = vpop.permute.xlu1 %2913  ;;  %v6643_v23 = vpop.permute.xlu0 %2911  ;;  %v2192_v41 = vsel %vm2189_vm1, %v8030_v55, %v8029_v46  ;;  %v2316_v56 = vadd.f32 %v2296_v13, %v2210_v51  ;;  %v2107_v29 = vadd.f32 %v2086_v44, %v2001_v40  ;;  %v2302_v58 = vsel %vm2295_vm2, %v8031_v16, %v7998_v1  ;;  %v8034_v44 = vld [vmem:[#allocation216_spill] sm:$0xff] }
 0x57f   : > { %v2928_v50 = vsel %vm2917_vm7, %v6643_v23, %v6632_v42  ;;  %v2546_v47 = vsel %vm2539_vm5, %v6290_v4, %v6177_v21  ;;  %v2298_v11 = vsel %vm2295_vm2, %v8033_v62, %v8032_v5  ;;  %v2428_v13 = vadd.f32 %v2406_v24, %v2322_v7 }
 0x580   : > { %v6657_v33 = vadd.f32 %v2928_v50, %v2826_v25  ;;  %v2422_v14 = vadd.f32 %v2402_v15, %v2316_v56  ;;  %v2213_v1 = vadd.f32 %v2192_v41, %v2107_v29  ;;  %v2408_v4 = vsel %vm2401_vm3, %v8034_v44, %v8003_v36  ;;  %v8035_v25 = vld [vmem:[#allocation25_spill] sm:$0xff]  ;;  %v8036_v36 = vld [vmem:[#allocation206_spill] sm:$0xff]  ;;  %v8037_v29 = vld [vmem:[#allocation23_spill] sm:$0xff] }
 0x581   : > { %2915 = vrot.lane.b32.xlu1 %v6295_v38, %s4267_s17  ;;  %2781 = vrot.lane.b32.xlu0 %v6299_v2, %s4266_s16  ;;  %v2672_v51 = vsel %vm2665_vm6, %v6515_v28, %v6413_v30  ;;  %v2404_v38 = vsel %vm2401_vm3, %v6240_v22, %v8035_v25  ;;  %v2570_v2 = vadd.f32 %v2546_v47, %v2428_v13  ;;  %v7537_v50 = vmov 0.0  }
 0x582   : > { %v2508_v40 = vpop.permute.xlu1 %2507  ;;  %v2002_v55 = vadd.f32 %v1981_v12, %v6546_v61  ;;  %v2325_v41 = vadd.f32 %v2302_v58, %v2219_v35  ;;  %v2085_v7 = vsel %vm2083_vm0, %v8013_v8, %v8036_v36  ;;  %v2319_v56 = vadd.f32 %v2298_v11, %v2213_v1  ;;  %3305 = vmatprep.mubr.f32.mxu0 %v7537_v50  ;;  %v4232_v35 = vld [vmem:[%s4412_s22] sm:$0xff]  ;;  %v4233_v12 = vld [vmem:[%s4412_s22 + $0x8] sm:$0xff] }
 0x583   : > { %v2540_v24 = vsel %vm2539_vm5, %v2508_v40, %v6544_v37  ;;  %v2549_v22 = vsel %vm2539_vm5, %v8037_v29, %v8009_v48  ;;  %v2543_v16 = vsel %vm2539_vm5, %v6479_v49, %v6383_v63  ;;  %v2696_v61 = vadd.f32 %v2672_v51, %v2570_v2  ;;  %v8038_v48 = vld [vmem:[#allocation196_spill] sm:$0xff]  ;;  %v8039_v49 = vld [vmem:[#allocation219_spill] sm:$0xff]  ;;  %v8043_v29 = vld [vmem:[#allocation198_spill] sm:$0xff] }
 0x584   : > { %v6677_v15 = vadd.f32 %v2540_v24, %v2422_v14  ;;  %v6683_v28 = vpop.permute.xlu0 %3101  ;;  %v1999_v58 = vadd.f32 %v1979_v59, %v6579_v26  ;;  %v2431_v47 = vadd.f32 %v2408_v4, %v2325_v41  ;;  %v2425_v62 = vadd.f32 %v2404_v38, %v2319_v56  ;;  %v8040_v26 = vld [vmem:[#allocation186_spill] sm:$0xff]  ;;  %v8041_v38 = vld [vmem:[#allocation208_spill] sm:$0xff] }
 0x585   : > { %3184 = vrot.lane.b32.xlu1 %v4232_v35, %s4256_s24  ;;  %3186 = vrot.lane.b32.xlu0 %v4233_v12, %s4256_s24  ;;  %v2087_v13 = vsel %vm2083_vm0, %v8025_v34, %v8038_v48  ;;  %v2191_v14 = vsel %vm2189_vm1, %v8021_v31, %v8039_v49  ;;  %v2675_v40 = vsel %vm2665_vm6, %v6276_v6, %v6217_v3  ;;  %v8042_v2 = vld [vmem:[#allocation24_spill] sm:$0xff] }
 0x586   : > { %v2776_v8 = vpop.permute.xlu1 %2775  ;;  %v2089_v59 = vsel %vm2083_vm0, %v8011_v57, %v8040_v26  ;;  %v2105_v44 = vadd.f32 %v2085_v7, %v1999_v58  ;;  %v2573_v4 = vadd.f32 %v2549_v22, %v2431_v47  ;;  %v2567_v51 = vadd.f32 %v2543_v16, %v2425_v62  ;;  %v8044_v22 = vld [vmem:[#allocation11_spill] sm:$0xff] }
 0x587   : > { %v2798_v11 = vsel %vm2791_vm4, %v2776_v8, %v6614_v53  ;;  %v2193_v34 = vsel %vm2189_vm1, %v8029_v46, %v8041_v38  ;;  %v2297_v31 = vsel %vm2295_vm2, %v6125_v27, %v8042_v2  ;;  %v2108_v57 = vadd.f32 %v2087_v13, %v2002_v55  ;;  %v8045_v55 = vld [vmem:[#allocation210_spill] sm:$0xff]  ;;  %v8046_v8 = vld [vmem:[#allocation28_spill] sm:$0xff]  ;;  %v8049_v13 = vld [vmem:[#allocation37_spill] sm:$0xff] }
 0x588   : > { %v6708_v1 = vadd.f32 %v2798_v11, %v2696_v61  ;;  %v2642_v24 = vpop.permute.xlu0 %2641  ;;  %v2211_v41 = vadd.f32 %v2191_v14, %v2105_v44  ;;  %v2699_v7 = vadd.f32 %v2675_v40, %v2573_v4  ;;  %v2111_v46 = vadd.f32 %v2089_v59, %v6557_v20  ;;  %v8050_v14 = vld [vmem:[#allocation31_spill] sm:$0xff]  ;;  %v8053_v44 = vld [vmem:[#allocation102_spill] sm:$0xff] }
 0x589   : > { %v2669_v3 = vsel %vm2665_vm6, %v2642_v24, %v6577_v43  ;;  %2773 = vrot.lane.b32.xlu1 %v6303_v0, %s4266_s16  ;;  %2639 = vrot.lane.b32.xlu0 %v6321_v52, %s4265_s15  ;;  %v2195_v27 = vsel %vm2189_vm1, %v8019_v17, %v8043_v29  ;;  %v2299_v0 = vsel %vm2295_vm2, %v8032_v5, %v8044_v22  ;;  %v8052_v59 = vld [vmem:[#allocation35_spill] sm:$0xff] }
 0x58a   : > { %v6725_v6 = vpop.permute.xlu1 %2635  ;;  %v6727_v56 = vadd.f32 %v2669_v3, %v2567_v51  ;;  %v2403_v52 = vsel %vm2401_vm3, %v6346_v39, %v6342_v45  ;;  %v2214_v16 = vadd.f32 %v2193_v34, %v2108_v57  ;;  %v2301_v61 = vsel %vm2295_vm2, %v8023_v9, %v8045_v55  ;;  %v8047_v9 = vld [vmem:[#allocation36_spill] sm:$0xff]  ;;  %v8055_v3 = vld [vmem:[#allocation29_spill] sm:$0xff] }
 0x58b   : > { %v2317_v35 = vadd.f32 %v2297_v31, %v2211_v41  ;;  %v2825_v20 = vadd.f32 %v6513_v54, %v2699_v7  ;;  %v2405_v17 = vsel %vm2401_vm3, %v8035_v25, %v8046_v8  ;;  %v2541_v5 = vsel %vm2539_vm5, %v6544_v37, %v6536_v10  ;;  %v8048_v25 = vld [vmem:[#allocation16_spill] sm:$0xff] }
 0x58c   : > { %v2910_v12 = vpop.permute.xlu0 %2909  ;;  %v2217_v54 = vadd.f32 %v2195_v27, %v2111_v46  ;;  %v2320_v47 = vadd.f32 %v2299_v0, %v2214_v16  ;;  %v2407_v37 = vsel %vm2401_vm3, %v8028_v18, %v8048_v25  ;;  %v2730_v4 = vmul.f32 %v8053_v44, %v8052_v59  ;;  %v8056_v18 = vld [vmem:[#allocation44_spill] sm:$0xff]  ;;  %v8058_v16 = vld [vmem:[#allocation103_spill] sm:$0xff] }
 0x58d   : > { %v2927_v39 = vsel %vm2917_vm7, %v2910_v12, %v6643_v23  ;;  %3041 = vrot.lane.b32.xlu1 %v6324_v32, %s4268_s20  ;;  %2907 = vrot.lane.b32.xlu0 %v8047_v9, %s4267_s17  ;;  %v2423_v62 = vadd.f32 %v2403_v52, %v2317_v35  ;;  %v2544_v23 = vsel %vm2539_vm5, %v6383_v63, %v8049_v13  ;;  %v8051_v32 = vld [vmem:[#allocation101_spill] sm:$0xff]  ;;  %v8057_v52 = vld [vmem:[#allocation42_spill] sm:$0xff]  ;;  %v8060_v35 = vld [vmem:[#allocation104_spill] sm:$0xff] }
 0x58e   : > { %v6755_v58 = vpop.permute.xlu1 %2769  ;;  %v6757_v11 = vadd.f32 %v2927_v39, %v2825_v20  ;;  %v2860_v40 = vmul.f32 %v8051_v32, %v8050_v14  ;;  %v2323_v51 = vadd.f32 %v2301_v61, %v2217_v54  ;;  %v2426_v24 = vadd.f32 %v2405_v17, %v2320_v47  ;;  %v8059_v61 = vld [vmem:[#allocation34_spill] sm:$0xff]  ;;  %v8062_v39 = vld [vmem:[#allocation48_spill] sm:$0xff] }
 0x58f   : > { %v2565_v34 = vadd.f32 %v2541_v5, %v2423_v62  ;;  %v2547_v57 = vsel %vm2539_vm5, %v6177_v21, %v8055_v3  ;;  %v2670_v41 = vsel %vm2665_vm6, %v6577_v43, %v8056_v18  ;;  %v2673_v21 = vsel %vm2665_vm6, %v6413_v30, %v8057_v52  ;;  %v8063_v62 = vld [vmem:[#allocation105_spill] sm:$0xff] }
 0x590   : > { %v6769_v31 = vpop.permute.xlu0 %2637  ;;  %v2429_v7 = vadd.f32 %v2407_v37, %v2323_v51  ;;  %v2568_v46 = vadd.f32 %v2544_v23, %v2426_v24  ;;  %v2856_v43 = vmul.f32 %v8058_v16, %v8052_v59  ;;  %v2990_v20 = vmul.f32 %v8060_v35, %v8059_v61  ;;  %v8064_v23 = vld [vmem:[#allocation106_spill] sm:$0xff]  ;;  %v3639_v61 = vld [vmem:[%s7350_s7 + $0x10] sm:$0xff] }
 0x591   : > { %8054 = vst [vmem:[#allocation47_spill] sm:$0xff] %v6769_v31  ;;  %v2667_v63 = vsel %vm2665_vm6, %v6725_v6, %v6769_v31  ;;  %2899 = vrot.lane.b32.xlu1 %v2860_v40, %s4267_s17  ;;  %2765 = vrot.lane.b32.xlu0 %v2730_v4, %s4266_s16  ;;  %v2799_v9 = vsel %vm2791_vm4, %v6614_v53, %v8062_v39 }
 0x592   : > { %v6782_v27 = vadd.f32 %v2667_v63, %v2565_v34  ;;  %v2904_v0 = vpop.permute.xlu1 %2903  ;;  %v2571_v12 = vadd.f32 %v2547_v57, %v2429_v7  ;;  %v2694_v17 = vadd.f32 %v2670_v41, %v2568_v46  ;;  %v2982_v37 = vmul.f32 %v8063_v62, %v8052_v59  ;;  %v3603_v59 = vld [vmem:[%s7349_s6 + $0x10] sm:$0xff]  ;;  %v3602_v63 = vld [vmem:[%s7349_s6 + $0x8] sm:$0xff]  ;;  %v3640_v7 = vld [vmem:[%s7350_s7 + $0x18] sm:$0xff] }
 0x593   : > { %v2986_v32 = vmul.f32 %v8064_v23, %v8050_v14  ;;  %v3604_v14 = vld [vmem:[%s7349_s6 + $0x18] sm:$0xff] }
 0x594   : > { %v6791_v5 = vpop.permute.xlu0 %2771  ;;  %v2697_v30 = vadd.f32 %v2673_v21, %v2571_v12 }
 0x595   : > { %8061 = vst [vmem:[#allocation51_spill] sm:$0xff] %v6791_v5  ;;  %v2796_v54 = vsel %vm2791_vm4, %v6755_v58, %v6791_v5  ;;  %2891 = vrot.lane.b32.xlu1 %v2856_v43, %s4267_s17  ;;  %3033 = vrot.lane.b32.xlu0 %v2990_v20, %s4268_s20 }
 0x596   : > { %v6801_v47 = vadd.f32 %v2796_v54, %v2694_v17  ;;  %v2823_v40 = vadd.f32 %v2799_v9, %v2697_v30  ;;  %v3038_v44 = vpop.permute.xlu1 %3037  ;;  %v3637_v9 = vld [vmem:[%s7350_s7] sm:$0xff]  ;;  %v3638_v54 = vld [vmem:[%s7350_s7 + $0x8] sm:$0xff] }
 0x598   : > { %v6807_v53 = vpop.permute.xlu0 %2905 }
 0x599   : > { %8065 = vst [vmem:[#allocation50_spill] sm:$0xff] %v6807_v53  ;;  %v2925_v4 = vsel %vm2917_vm7, %v2904_v0, %v6807_v53  ;;  %3017 = vrot.lane.b32.xlu1 %v2982_v37, %s4268_s20  ;;  %3025 = vrot.lane.b32.xlu0 %v2986_v32, %s4268_s20 }
 0x59a   : > { %v6813_v51 = vadd.f32 %v2925_v4, %v2823_v40 }
 0x59c   : > { %v6821_v24 = vpop.permute.xlu1 %3096  ;;  %v6823_v34 = vpop.permute.xlu0 %3039 }
 0x59d   : > { %v3054_v57 = vsel %vm3043_vm8, %v3038_v44, %v6823_v34  ;;  %3617 = vperm.xlu1 %4201, %v3603_v59   ;;  %3622 = vperm.xlu0 %4200, %v3604_v14  }
 0x59e   : > { %v6828_v41 = vadd.f32 %v3054_v57, %v6657_v33  ;;  %v3601_v33 = vld [vmem:[%s7349_s6] sm:$0xff] }
 0x5a0   : > { %v2634_v46 = vpop.permute.xlu1 %2633  ;;  %v6836_v21 = vpop.permute.xlu0 %3137 }
 0x5a1   : > { %v2666_v16 = vsel %vm2665_vm6, %v2634_v46, %v6725_v6  ;;  %3612 = vperm.xlu1 %4201, %v3602_v63   ;;  %3658 = vperm.xlu0 %4200, %v3640_v7  }
 0x5a2   : > { %v6841_v43 = vadd.f32 %v2666_v16, %v6677_v15 }
 0x5a4   : > { %v2902_v35 = vpop.permute.xlu1 %2901  ;;  %v2768_v20 = vpop.permute.xlu0 %2767 }
 0x5a5   : > { %v2924_v12 = vsel %vm2917_vm7, %v2902_v35, %v2904_v0  ;;  %v2795_v6 = vsel %vm2791_vm4, %v2768_v20, %v6755_v58  ;;  %3607 = vperm.xlu1 %4201, %v3601_v33   ;;  %3653 = vperm.xlu0 %4200, %v3639_v61  }
 0x5a6   : > { %v2948_v15 = vadd.f32 %v2924_v12, %v6708_v1  ;;  %v2819_v17 = vadd.f32 %v2795_v6, %v6727_v56 }
 0x5a8   : > { %v6860_v30 = vpop.permute.xlu1 %3206  ;;  %v3036_v0 = vpop.permute.xlu0 %3035 }
 0x5a9   : > { %8066 = vst [vmem:[#allocation54_spill] sm:$0xff] %v6860_v30  ;;  %v3053_v62 = vsel %vm3043_vm8, %v3036_v0, %v3038_v44  ;;  %4125 = vmatprep.subr.mxu1 %v6860_v30  ;;  %3643 = vperm.xlu1 %4201, %v3637_v9  }
 0x5aa   : > { %v3077_v1 = vadd.f32 %v3053_v62, %v6757_v11  ;;  %3648 = vperm.xlu0 %4200, %v3638_v54   ;;  %4126 = vmatpush3.msra.mxu1 %v6860_v30 }
 0x5ac   : > { %v6866_v56 = vpop.permute.xlu1 %2763  ;;  %v2762_v58 = vpop.permute.xlu0 %2761 }
 0x5ad   : > { %8067 = vst [vmem:[#allocation53_spill] sm:$0xff] %v6866_v56  ;;  %v2793_v12 = vsel %vm2791_vm4, %v2762_v58, %v6866_v56 }
 0x5ae   : > { %v2817_v5 = vadd.f32 %v2793_v12, %v6782_v27  ;;  %v3114_v27 = vmul.f32 %v6683_v28, %v6828_v41 }
 0x5b0   : > { %v6868_v37 = vpop.permute.xlu1 %2897  ;;  %v2896_v23 = vpop.permute.xlu0 %2895 }
 0x5b1   : > { %8068 = vst [vmem:[#allocation57_spill] sm:$0xff] %v6868_v37  ;;  %v2922_v6 = vsel %vm2917_vm7, %v2896_v23, %v6868_v37 }
 0x5b4   : > { %v6870_v32 = vpop.permute.xlu1 %3031  ;;  %v3030_v40 = vpop.permute.xlu0 %3029 }
 0x5b5   : > { %8069 = vst [vmem:[#allocation56_spill] sm:$0xff] %v6870_v32  ;;  %v3051_v9 = vsel %vm3043_vm8, %v3030_v40, %v6870_v32  ;;  %v2946_v32 = vadd.f32 %v2922_v6, %v6801_v47 }
 0x5b6   : > { %v3075_v53 = vadd.f32 %v3051_v9, %v6813_v51  ;;  %v4234_v51 = vld [vmem:[%s4412_s22 + $0x70] sm:$0xff] }
 0x5b8   : > { %v6872_v4 = vpop.permute.xlu1 %3132  ;;  %v6874_v44 = vpop.permute.xlu0 %3091 }
 0x5b9   : > { %8070 = vst [vmem:[#allocation60_spill] sm:$0xff] %v6872_v4  ;;  %8071 = vst [vmem:[#allocation59_spill] sm:$0xff] %v6874_v44 }
 0x5bc   : > { %v2894_v59 = vpop.permute.xlu1 %2893  ;;  %v2760_v14 = vpop.permute.xlu0 %2759 }
 0x5bd   : > { %v2921_v62 = vsel %vm2917_vm7, %v2894_v59, %v2896_v23  ;;  %v2792_v23 = vsel %vm2791_vm4, %v2760_v14, %v2762_v58  ;;  %v8079_v58 = vld [vmem:[#allocation4_spill] sm:$0xff] }
 0x5be   : > { %v2945_v59 = vadd.f32 %v2921_v62, %v2819_v17  ;;  %v407_v14 = vmul.f32 %v4234_v51, %v8079_v58  ;;  %v2816_v41 = vadd.f32 %v2792_v23, %v6841_v43  ;;  %v8082_v43 = vld [vmem:[#allocation27_spill] sm:$0xff] }
 0x5c0   : > { %v6876_v57 = vpop.permute.xlu1 %3200  ;;  %v3028_v11 = vpop.permute.xlu0 %3027 }
 0x5c1   : > { %8072 = vst [vmem:[#allocation63_spill] sm:$0xff] %v6876_v57  ;;  %4127 = vmatprep.subr.mxu1 %v6876_v57  ;;  %v3050_v50 = vsel %vm3043_vm8, %v3028_v11, %v3030_v40 }
 0x5c2   : > { %4128 = vmatpush3.msra.mxu1 %v6876_v57  ;;  %v3074_v11 = vadd.f32 %v3050_v50, %v2948_v15  ;;  %v3111_v50 = vmul.f32 %v6821_v24, %v3075_v53 }
 0x5c4   : > { %v6880_v63 = vpop.permute.xlu1 %2889  ;;  %v2888_v7 = vpop.permute.xlu0 %2887 }
 0x5c5   : > { %8073 = vst [vmem:[#allocation62_spill] sm:$0xff] %v6880_v63  ;;  %v2919_v56 = vsel %vm2917_vm7, %v2888_v7, %v6880_v63 }
 0x5c8   : > { %v6882_v46 = vpop.permute.xlu1 %3023  ;;  %v3022_v16 = vpop.permute.xlu0 %3021 }
 0x5c9   : > { %8074 = vst [vmem:[#allocation66_spill] sm:$0xff] %v6882_v46  ;;  %v3048_v37 = vsel %vm3043_vm8, %v3022_v16, %v6882_v46  ;;  %v2943_v46 = vadd.f32 %v2919_v56, %v2817_v5  ;;  %v3110_v5 = vmul.f32 %v6821_v24, %v3074_v11 }
 0x5ca   : > { %v3072_v31 = vadd.f32 %v3048_v37, %v2946_v32 }
 0x5cc   : > { %v6884_v33 = vpop.permute.xlu1 %3127  ;;  %v6886_v61 = vpop.permute.xlu0 %3086 }
 0x5cd   : > { %8075 = vst [vmem:[#allocation65_spill] sm:$0xff] %v6884_v33  ;;  %8076 = vst [vmem:[#allocation69_spill] sm:$0xff] %v6886_v61 }
 0x5d0   : > { %v3020_v35 = vpop.permute.xlu1 %3019  ;;  %v2886_v20 = vpop.permute.xlu0 %2885 }
 0x5d1   : > { %v3047_v40 = vsel %vm3043_vm8, %v3020_v35, %v3022_v16  ;;  %v2918_v18 = vsel %vm2917_vm7, %v2886_v20, %v2888_v7  ;;  %v3113_v16 = vmul.f32 %v6683_v28, %v3077_v1  ;;  %v8080_v35 = vld [vmem:[#allocation15_spill] sm:$0xff]  ;;  %v6928_v7 = vadd.f32 %v6836_v21, %v3114_v27 }
 0x5d2   : > { %v3071_v17 = vadd.f32 %v3047_v40, %v2945_v59  ;;  %v525_v6 = vadd.f32 %v8080_v35, %v407_v14  ;;  %v2942_v56 = vadd.f32 %v2918_v18, %v2816_v41  ;;  %v3108_v20 = vmul.f32 %v6874_v44, %v3072_v31  ;;  %v8085_v40 = vld [vmem:[#allocation39_spill] sm:$0xff]  ;;  %v4235_v41 = vld [vmem:[%s4412_s22 + $0x50] sm:$0xff] }
 0x5d3   : > { %8081 = vst [vmem:[#allocation71_spill] sm:$0xff] %v6928_v7  ;;  %v6934_v53 = vadd.f32 %v6836_v21, %v3113_v16  ;;  %v6938_v18 = vadd.f32 %v6872_v4, %v3111_v50  ;;  %v6943_v31 = vadd.f32 %v6872_v4, %v3110_v5  ;;  %v7547_v14 = vmax.f32 %v6928_v7, 0.0  ;;  %v6965_v16 = vld [vmem:[%s7348_s5 + $0x10] sm:$0xff]  ;;  %v8159_v4 = vld [vmem:[#allocation158_spill] sm:$0xff] }
 0x5d4   : > { %v3014_v54 = vpop.permute.xlu1 %3013  ;;  %v6894_v0 = vpop.permute.xlu0 %3194  ;;  %v631_v9 = vadd.f32 %v8082_v43, %v525_v6  ;;  %v6954_v51 = vadd.f32 %v6884_v33, %v3108_v20  ;;  %v8093_v20 = vld [vmem:[#allocation14_spill] sm:$0xff]  ;;  %v8094_v43 = vld [vmem:[#allocation64_spill] sm:$0xff] }
 0x5d5   : > { %8077 = vst [vmem:[#allocation68_spill] sm:$0xff] %v6894_v0  ;;  %4129 = vmatprep.subr.mxu1 %v6894_v0  ;;  %8083 = vst [vmem:[#allocation75_spill] sm:$0xff] %v6934_v53  ;;  %v7548_v6 = vmax.f32 %v6934_v53, 0.0 }
 0x5d6   : > { %4130 = vmatpush3.msra.mxu1 %v6894_v0  ;;  %8084 = vst [vmem:[#allocation74_spill] sm:$0xff] %v6938_v18  ;;  %v737_v27 = vadd.f32 %v8085_v40, %v631_v9  ;;  %8086 = vst [vmem:[#allocation78_spill] sm:$0xff] %v6943_v31 }
 0x5d7   : > { %8087 = vst [vmem:[#allocation77_spill] sm:$0xff] %v6954_v51 }
 0x5d8   : > { %v6911_v12 = vpop.permute.xlu1 %3122  ;;  %v6913_v63 = vpop.permute.xlu0 %3015 }
 0x5d9   : > { %8078 = vst [vmem:[#allocation72_spill] sm:$0xff] %v6911_v12  ;;  %v3045_v47 = vsel %vm3043_vm8, %v3014_v54, %v6913_v63 }
 0x5da   : > { %v3069_v15 = vadd.f32 %v3045_v47, %v2943_v46  ;;  %v3107_v46 = vmul.f32 %v6874_v44, %v3071_v17  ;;  %v6951_v47 = vld [vmem:[%s7348_s5 + $0x8] sm:$0xff]  ;;  %v8089_v17 = vld [vmem:[#allocation2_spill] sm:$0xff]  ;;  %v8158_v44 = vld [vmem:[#allocation148_spill] sm:$0xff] }
 0x5db   : > { %v404_v50 = vmul.f32 %v4235_v41, %v8089_v17  ;;  %v8096_v41 = vld [vmem:[#allocation3_spill] sm:$0xff]  ;;  %v8097_v17 = vld [vmem:[#allocation45_spill] sm:$0xff] }
 0x5dc   : > { %v3012_v37 = vpop.permute.xlu1 %3011  ;;  %v6925_v32 = vpop.permute.xlu0 %2537  ;;  %v3105_v23 = vmul.f32 %v6886_v61, %v3069_v15  ;;  %v8090_v15 = vld [vmem:[#allocation52_spill] sm:$0xff]  ;;  %v6972_v5 = vadd.f32 %v6884_v33, %v3107_v46 }
 0x5dd   : > { %v3044_v1 = vsel %vm3043_vm8, %v3012_v37, %v3014_v54  ;;  %v843_v35 = vadd.f32 %v8090_v15, %v737_v27  ;;  %v7552_v15 = vmax.f32 %v6954_v51, 0.0  ;;  %v8102_v46 = vld [vmem:[#allocation76_spill] sm:$0xff] }
 0x5de   : > { %v3068_v62 = vadd.f32 %v3044_v1, %v2942_v56  ;;  %8091 = vst [vmem:[#allocation80_spill] sm:$0xff] %v6972_v5  ;;  %v7551_v56 = vmax.f32 %v6938_v18, 0.0  ;;  %v6982_v37 = vadd.f32 %v6911_v12, %v3105_v23  ;;  %v522_v1 = vadd.f32 %v8093_v20, %v404_v50  ;;  %v6999_v23 = vld [vmem:[%s7348_s5 + $0x18] sm:$0xff]  ;;  %v8100_v20 = vld [vmem:[#allocation40_spill] sm:$0xff] }
 0x5df   : > { %v949_v9 = vadd.f32 %v8094_v43, %v843_v35  ;;  %v398_v50 = vmul.f32 %v8097_v17, %v8096_v41  ;;  %v8099_v35 = vld [vmem:[#allocation5_spill] sm:$0xff]  ;;  %v8103_v41 = vmax.f32 %v6943_v31, 0.0  ;;  %v8104_v17 = vld [vmem:[#allocation8_spill] sm:$0xff] }
 0x5e0   : > { %v3104_v54 = vmul.f32 %v6886_v61, %v3068_v62  ;;  %v3205_v59 = vpop.permute.xlu1 %3204  ;;  %v6946_v11 = vpop.permute.xlu0 %3188  ;;  %8092 = vst [vmem:[#allocation84_spill] sm:$0xff] %v6982_v37  ;;  %v401_v43 = vmul.f32 %v8100_v20, %v8099_v35  ;;  %v8114_v20 = vld [vmem:[#allocation99_spill] sm:$0xff] }
 0x5e1   : > { %4131 = vmatprep.subr.mxu1 %v6946_v11  ;;  %v6959_v58 = vsel %vm1659_vm11, %v3205_v59, %v6860_v30  ;;  %v1055_v7 = vadd.f32 %v8102_v46, %v949_v9  ;;  %v8106_v9 = vld [vmem:[#allocation38_spill] sm:$0xff] }
 0x5e2   : > { %8088 = vst [vmem:[#allocation81_spill] sm:$0xff] %v6959_v58  ;;  %3265 = vmatprep.subr.mxu0 %v6959_v58  ;;  %4132 = vmatpush3.msra.mxu1 %v6946_v11  ;;  %v6988_v62 = vadd.f32 %v6911_v12, %v3104_v54  ;;  %v8127_v30 = vld [vmem:[#allocation58_spill] sm:$0xff] }
 0x5e3   : > { %3451 = vmatprep.subr.mxu1 %v7547_v14  ;;  %4134 = vmatmul.mubr.msk.f32.vlgmr.msra.gmra.mxu1 %vm3228_vm15, %v6951_v47  ;;  %v8101_v14 = vld [vmem:[#allocation26_spill] sm:$0xff] }
 0x5e4   : > { %8095 = vst [vmem:[#allocation83_spill] sm:$0xff] %v6988_v62  ;;  %v6990_v40 = vpop.permute.xlu1 %2529  ;;  %3452 = vmatpush1.msra.mxu1 %v7548_v6  ;;  %v3203_v27 = vpop.permute.xlu0 %3202  ;;  %4136 = vmatprep.mubr.msk.f32.mxu1 %vm3228_vm15, %v6965_v16  ;;  %v628_v6 = vadd.f32 %v8101_v14, %v522_v1  ;;  %v8105_v14 = vld [vmem:[#allocation9_spill] sm:$0xff]  ;;  %v8115_v31 = vmax.f32 %v6988_v62, 0.0 }
 0x5e5   : > { %3453 = vmatprep.subr.mxu1 %v7551_v56  ;;  %v7006_v54 = vsel %vm1659_vm11, %v3203_v27, %v3205_v59  ;;  %v516_v56 = vadd.f32 %v8104_v17, %v398_v50  ;;  %v7555_v59 = vmax.f32 %v6982_v37, 0.0  ;;  %v519_v1 = vadd.f32 %v8105_v14, %v401_v43  ;;  %v8107_v27 = vld [vmem:[#allocation88_spill] sm:$0xff]  ;;  %v8126_v37 = vld [vmem:[#allocation55_spill] sm:$0xff] }
 0x5e6   : > { %8098 = vst [vmem:[#allocation87_spill] sm:$0xff] %v7006_v54  ;;  %3266 = vmatpush1.msra.mxu0 %v7006_v54  ;;  %3454 = vmatpush1.msra.mxu1 %v8103_v41  ;;  %v734_v46 = vadd.f32 %v8106_v9, %v628_v6  ;;  %v1161_v35 = vadd.f32 %v8107_v27, %v1055_v7  ;;  %v8108_v41 = vmax.f32 %v6972_v5, 0.0  ;;  %v8109_v17 = vmov 0.0   ;;  %v8110_v43 = vld [vmem:[#allocation20_spill] sm:$0xff]  ;;  %v8112_v6 = vld [vmem:[#allocation21_spill] sm:$0xff] }
 0x5e7   : > { %3455 = vmatprep.subr.mxu1 %v7552_v15  ;;  %4137 = vmatmul.mubr.msk.f32.gmra.mxu1 %vm3228_vm15, %v6999_v23  ;;  %v7035_v15 = vld [vmem:[%s7347_s4] sm:$0xff]  ;;  %v622_v14 = vadd.f32 %v8110_v43, %v516_v56  ;;  %v625_v9 = vadd.f32 %v8112_v6, %v519_v1  ;;  %v8113_v27 = vld [vmem:[#allocation49_spill] sm:$0xff]  ;;  %v8116_v56 = vld [vmem:[#allocation32_spill] sm:$0xff] }
 0x5e8   : > { %v3199_v53 = vpop.permute.xlu1 %3198  ;;  %3456 = vmatpush1.msra.mxu1 %v8108_v41  ;;  %v7029_v50 = vpop.permute.xlu0 %2663  ;;  %3491 = vmatprep.mubr.f32.mxu1 %v8109_v17  ;;  %v840_v41 = vadd.f32 %v8113_v27, %v734_v46  ;;  %v1267_v18 = vadd.f32 %v8114_v20, %v1161_v35  ;;  %v8118_v5 = vld [vmem:[#allocation61_spill] sm:$0xff]  ;;  %v8119_v6 = vld [vmem:[#allocation107_spill] sm:$0xff] }
 0x5e9   : > { %3457 = vmatprep.subr.mxu1 %v7555_v59  ;;  %v7042_v7 = vsel %vm1659_vm11, %v3199_v53, %v6876_v57  ;;  %v728_v43 = vadd.f32 %v8116_v56, %v622_v14  ;;  %v8117_v59 = vld [vmem:[#allocation33_spill] sm:$0xff]  ;;  %v8122_v14 = vld [vmem:[#allocation43_spill] sm:$0xff] }
 0x5ea   : > { %8111 = vst [vmem:[#allocation86_spill] sm:$0xff] %v7042_v7  ;;  %3267 = vmatprep.subr.mxu0 %v7042_v7  ;;  %3458 = vmatpush1.msra.mxu1 %v8115_v31  ;;  %v731_v51 = vadd.f32 %v8117_v59, %v625_v9  ;;  %v946_v1 = vadd.f32 %v8118_v5, %v840_v41  ;;  %v7063_v31 = vld [vmem:[%s7347_s4 + $0x8] sm:$0xff]  ;;  %v8123_v59 = vld [vmem:[#allocation46_spill] sm:$0xff]  ;;  %v8124_v5 = vld [vmem:[#allocation73_spill] sm:$0xff] }
 0x5eb   : > { %4091 = vmatmul.mubr.msk.f32.vlgmr.msra.gmra.mxu1 %vm3228_vm15, %v7035_v15  ;;  %4153 = vmatprep.subr.mxu1 %v8109_v17  ;;  %v1373_v46 = vadd.f32 %v8119_v6, %v1267_v18  ;;  %8120 = vst [vmem:[#allocation89_spill] sm:$0xff] %v7063_v31  ;;  %v834_v56 = vadd.f32 %v8122_v14, %v728_v43  ;;  %v8125_v18 = vld [vmem:[#allocation112_spill] sm:$0xff]  ;;  %v8128_v54 = vld [vmem:[#allocation85_spill] sm:$0xff] }
 0x5ec   : > { %v7057_v27 = vpop.permute.xlu1 %2521  ;;  %v3197_v35 = vpop.permute.xlu0 %3196  ;;  %3497 = vmatprep.mubr.f32.mxu1 %v8109_v17  ;;  %v837_v9 = vadd.f32 %v8123_v59, %v731_v51  ;;  %v1052_v41 = vadd.f32 %v8124_v5, %v946_v1  ;;  %v7085_v51 = vld [vmem:[%s7347_s4 + $0x10] sm:$0xff]  ;;  %v8131_v1 = vld [vmem:[#allocation67_spill] sm:$0xff]  ;;  %v8132_v59 = vld [vmem:[#allocation70_spill] sm:$0xff] }
 0x5ed   : > { %v7066_v20 = vsel %vm1659_vm11, %v3197_v35, %v3199_v53  ;;  %v1479_v6 = vadd.f32 %v8125_v18, %v1373_v46  ;;  %v940_v62 = vadd.f32 %v8126_v37, %v834_v56  ;;  %v8129_v35 = vld [vmem:[#allocation119_spill] sm:$0xff]  ;;  %8130 = vst [vmem:[#allocation94_spill] sm:$0xff] %v7085_v51  ;;  %v8133_v56 = vld [vmem:[#allocation98_spill] sm:$0xff] }
 0x5ee   : > { %8121 = vst [vmem:[#allocation90_spill] sm:$0xff] %v7066_v20  ;;  %3268 = vmatpush1.msra.mxu0 %v7066_v20  ;;  %v943_v58 = vadd.f32 %v8127_v30, %v837_v9  ;;  %v1158_v53 = vadd.f32 %v8128_v54, %v1052_v41  ;;  %v8134_v9 = vld [vmem:[#allocation128_spill] sm:$0xff]  ;;  %v8135_v5 = vld [vmem:[#allocation79_spill] sm:$0xff]  ;;  %v8136_v18 = vld [vmem:[#allocation82_spill] sm:$0xff] }
 0x5ef   : > { %4092 = vmatmul.mubr.msk.f32.gmra.mxu1 %vm3228_vm15, %v7063_v31  ;;  %v1585_v57 = vadd.f32 %v8129_v35, %v1479_v6  ;;  %v1046_v46 = vadd.f32 %v8131_v1, %v940_v62  ;;  %v8137_v35 = vld [vmem:[#allocation110_spill] sm:$0xff]  ;;  %v8138_v20 = vld [vmem:[#allocation140_spill] sm:$0xff] }
 0x5f0   : > { %v2790_v43 = vpop.permute.xlu1 %2789  ;;  %v7079_v14 = vpop.permute.xlu0 %2655  ;;  %3503 = vmatprep.mubr.f32.mxu1 %v8109_v17  ;;  %v1049_v37 = vadd.f32 %v8132_v59, %v943_v58  ;;  %v1264_v30 = vadd.f32 %v8133_v56, %v1158_v53  ;;  %v7101_v58 = vld [vmem:[%s7347_s4 + $0x18] sm:$0xff]  ;;  %v8142_v53 = vld [vmem:[#allocation92_spill] sm:$0xff]  ;;  %v8144_v59 = vld [vmem:[#allocation118_spill] sm:$0xff] }
 0x5f1   : > { %v1691_v54 = vadd.f32 %v8134_v9, %v1585_v57  ;;  %v1152_v41 = vadd.f32 %v8135_v5, %v1046_v46  ;;  %8139 = vst [vmem:[#allocation91_spill] sm:$0xff] %v7101_v58  ;;  %v8143_v46 = vld [vmem:[#allocation93_spill] sm:$0xff]  ;;  %v8145_v56 = vld [vmem:[#allocation152_spill] sm:$0xff]  ;;  %v8147_v5 = vld [vmem:[#allocation122_spill] sm:$0xff] }
 0x5f2   : > { %v1155_v6 = vadd.f32 %v8136_v18, %v1049_v37  ;;  %v1370_v7 = vadd.f32 %v8137_v35, %v1264_v30  ;;  %v8146_v9 = vld [vmem:[#allocation116_spill] sm:$0xff] }
 0x5f3   : > { %4093 = vmatmul.mubr.msk.f32.gmra.mxu1 %vm3228_vm15, %v7085_v51  ;;  %v1797_v31 = vadd.f32 %v8138_v20, %v1691_v54  ;;  %v1258_v1 = vadd.f32 %v8142_v53, %v1152_v41  ;;  %v8149_v41 = vld [vmem:[#allocation164_spill] sm:$0xff] }
 0x5f4   : > { %v3191_v12 = vpop.permute.xlu1 %3190  ;;  %v3193_v33 = vpop.permute.xlu0 %3192  ;;  %3509 = vmatprep.mubr.f32.mxu1 %v8109_v17  ;;  %v1261_v20 = vadd.f32 %v8143_v46, %v1155_v6  ;;  %v1476_v37 = vadd.f32 %v8144_v59, %v1370_v7  ;;  %v8150_v53 = vld [vmem:[#allocation124_spill] sm:$0xff]  ;;  %v8151_v46 = vld [vmem:[#allocation134_spill] sm:$0xff] }
 0x5f5   : > { %v7105_v57 = vsel %vm1659_vm11, %v3193_v33, %v6894_v0  ;;  %v7108_v62 = vsel %vm1659_vm11, %v3191_v12, %v3193_v33  ;;  %v1903_v30 = vadd.f32 %v8145_v56, %v1797_v31  ;;  %v1364_v33 = vadd.f32 %v8147_v5, %v1258_v1  ;;  %v8148_v12 = vld [vmem:[#allocation126_spill] sm:$0xff] }
 0x5f6   : > { %8140 = vst [vmem:[#allocation95_spill] sm:$0xff] %v7105_v57  ;;  %8141 = vst [vmem:[#allocation96_spill] sm:$0xff] %v7108_v62  ;;  %3269 = vmatprep.subr.mxu0 %v7105_v57  ;;  %v1367_v54 = vadd.f32 %v8146_v9, %v1261_v20  ;;  %v1582_v18 = vadd.f32 %v8148_v12, %v1476_v37  ;;  %v8152_v56 = vld [vmem:[#allocation138_spill] sm:$0xff]  ;;  %v8153_v57 = vld [vmem:[#allocation176_spill] sm:$0xff] }
 0x5f7   : > { %3270 = vmatpush1.msra.mxu0 %v7108_v62  ;;  %4094 = vmatmul.mubr.msk.f32.gmra.mxu1 %vm3228_vm15, %v7101_v58  ;;  %v2009_v35 = vadd.f32 %v8149_v41, %v1903_v30  ;;  %v1470_v59 = vadd.f32 %v8151_v46, %v1364_v33  ;;  %v8154_v58 = vld [vmem:[#allocation136_spill] sm:$0xff]  ;;  %v8155_v20 = vld [vmem:[#allocation146_spill] sm:$0xff] }
 0x5f8   : > { %v7122_v6 = vpop.permute.xlu1 %2647  ;;  %v2514_v7 = vpop.permute.xlu0 %2513  ;;  %v1473_v31 = vadd.f32 %v8150_v53, %v1367_v54  ;;  %v1688_v0 = vadd.f32 %v8152_v56, %v1582_v18  ;;  %v8156_v1 = vld [vmem:[#allocation150_spill] sm:$0xff]  ;;  %v8157_v37 = vld [vmem:[#allocation188_spill] sm:$0xff]  ;;  %4161 = vmatprep.mubr.msk.f32.mxu1 %vm4270_vm9, %v8109_v17 }
 0x5f9   : > { %v2115_v62 = vadd.f32 %v8153_v57, %v2009_v35  ;;  %v1576_v9 = vadd.f32 %v8155_v20, %v1470_v59  ;;  %v8160_v53 = vld [vmem:[#allocation162_spill] sm:$0xff]  ;;  %v8161_v46 = vld [vmem:[#allocation200_spill] sm:$0xff]  ;;  %v8162_v57 = vld [vmem:[#allocation17_spill] sm:$0xff] }
 0x5fa   : > { %v1579_v51 = vadd.f32 %v8154_v58, %v1473_v31  ;;  %v1794_v5 = vadd.f32 %v8156_v1, %v1688_v0  ;;  %v2551_v58 = vsel %vm2539_vm5, %v8162_v57, %v6925_v32  ;;  %v8163_v35 = vld [vmem:[#allocation160_spill] sm:$0xff]  ;;  %v8164_v59 = vld [vmem:[#allocation170_spill] sm:$0xff] }
 0x5fb   : > { %v2221_v12 = vadd.f32 %v8157_v37, %v2115_v62  ;;  %v1682_v54 = vadd.f32 %v8159_v4, %v1576_v9  ;;  %v8165_v56 = vld [vmem:[#allocation174_spill] sm:$0xff]  ;;  %v8166_v20 = vld [vmem:[#allocation212_spill] sm:$0xff] }
 0x5fc   : > { %v2916_v30 = vpop.permute.xlu1 %2915  ;;  %v2782_v41 = vpop.permute.xlu0 %2781  ;;  %v1685_v61 = vadd.f32 %v8158_v44, %v1579_v51  ;;  %v1900_v33 = vadd.f32 %v8160_v53, %v1794_v5  ;;  %v8167_v4 = vld [vmem:[#allocation30_spill] sm:$0xff] }
 0x5fd   : > { %v2327_v18 = vadd.f32 %v8161_v46, %v2221_v12  ;;  %v1788_v0 = vadd.f32 %v8164_v59, %v1682_v54  ;;  %v2677_v51 = vsel %vm2665_vm6, %v8167_v4, %v7029_v50  ;;  %v8169_v12 = vld [vmem:[#allocation182_spill] sm:$0xff]  ;;  %v2803_v46 = vsel %vm2791_vm4, %v6447_v60, %v2790_v43  ;;  %v8170_v50 = vld [vmem:[#allocation184_spill] sm:$0xff] }
 0x5fe   : > { %v1791_v31 = vadd.f32 %v8163_v35, %v1685_v61  ;;  %v2006_v62 = vadd.f32 %v8165_v56, %v1900_v33  ;;  %v8168_v61 = vld [vmem:[#allocation172_spill] sm:$0xff]  ;;  %v8171_v56 = vld [vmem:[#allocation41_spill] sm:$0xff] }
 0x5ff   : > { %v2433_v1 = vadd.f32 %v8166_v20, %v2327_v18  ;;  %v1894_v54 = vadd.f32 %v8169_v12, %v1788_v0 }
 0x600   : > { %v3185_v37 = vpop.permute.xlu1 %3184  ;;  %v3187_v44 = vpop.permute.xlu0 %3186  ;;  %v1897_v5 = vadd.f32 %v8168_v61, %v1791_v31  ;;  %v2112_v53 = vadd.f32 %v8040_v26, %v2006_v62  ;;  %v8176_v61 = vld [vmem:[#allocation53_spill] sm:$0xff] }
 0x601   : > { %v7148_v9 = vsel %vm1659_vm11, %v3187_v44, %v6946_v11  ;;  %v7151_v32 = vsel %vm1659_vm11, %v3185_v37, %v3187_v44  ;;  %v2575_v33 = vadd.f32 %v2551_v58, %v2433_v1  ;;  %v2000_v57 = vadd.f32 %v8027_v19, %v1894_v54 }
 0x602   : > { %3271 = vmatprep.subr.mxu0 %v7148_v9  ;;  %v2003_v18 = vadd.f32 %v8170_v50, %v1897_v5  ;;  %v2218_v35 = vadd.f32 %v8043_v29, %v2112_v53  ;;  %v2929_v58 = vsel %vm2917_vm7, %v6632_v42, %v2916_v30  ;;  %v2548_v29 = vsel %vm2539_vm5, %v8055_v3, %v6990_v40  ;;  %v8177_v50 = vld [vmem:[#allocation57_spill] sm:$0xff] }
 0x603   : > { %3272 = vmatpush1.msra.mxu0 %v7151_v32  ;;  %v2701_v59 = vadd.f32 %v2677_v51, %v2575_v33  ;;  %v2106_v43 = vadd.f32 %v8036_v36, %v2000_v57  ;;  %v2674_v36 = vsel %vm2665_vm6, %v8057_v52, %v7079_v14  ;;  %v2542_v40 = vsel %vm2539_vm5, %v6536_v10, %v2514_v7  ;;  %v8173_v10 = vld [vmem:[#allocation47_spill] sm:$0xff] }
 0x604   : > { %v2774_v31 = vpop.permute.xlu1 %2773  ;;  %4083 = vmatmul.mubr.msk.f32.vlgmr.msra.gmra.mxu0 %vm3228_vm15, %v8171_v56  ;;  %v2640_v26 = vpop.permute.xlu0 %2639  ;;  %v2109_v60 = vadd.f32 %v8038_v48, %v2003_v18  ;;  %v2324_v0 = vadd.f32 %v8045_v55, %v2218_v35  ;;  %v2800_v52 = vsel %vm2791_vm4, %v8062_v39, %v2782_v41  ;;  %v8174_v39 = vld [vmem:[#allocation50_spill] sm:$0xff]  ;;  %v8175_v51 = vld [vmem:[#allocation51_spill] sm:$0xff]  ;;  %v8179_v35 = vld [vmem:[#allocation56_spill] sm:$0xff]  ;;  %vm3850_vm11 = vcmask 516096  }
 0x605   : > { %3311 = vmatprep.mubr.f32.mxu0 %v8109_v17  ;;  %v2827_v19 = vadd.f32 %v2803_v46, %v2701_v59  ;;  %v2212_v20 = vadd.f32 %v8039_v49, %v2106_v43  ;;  %v2668_v7 = vsel %vm2665_vm6, %v8173_v10, %v2640_v26 }
 0x606   : > { %v2215_v62 = vadd.f32 %v8041_v38, %v2109_v60  ;;  %v2430_v1 = vadd.f32 %v8048_v25, %v2324_v0 }
 0x607   : > { %v2953_v42 = vadd.f32 %v2929_v58, %v2827_v19  ;;  %v2318_v49 = vadd.f32 %v8042_v2, %v2212_v20 }
 0x608   : > { %v3042_v30 = vpop.permute.xlu1 %3041  ;;  %4084 = vmatmul.mubr.msk.f32.gmra.mxu0 %vm3228_vm15, %v6951_v47  ;;  %v2908_v48 = vpop.permute.xlu0 %2907  ;;  %v2321_v38 = vadd.f32 %v8044_v22, %v2215_v62  ;;  %v2572_v25 = vadd.f32 %v2548_v29, %v2430_v1  ;;  %v2545_v47 = vsel %vm2539_vm5, %v8049_v13, %v7057_v27  ;;  %v8172_v13 = vld [vmem:[#allocation44_spill] sm:$0xff]  ;;  %v8180_v29 = vld [vmem:[#allocation66_spill] sm:$0xff] }
 0x609   : > { %v3055_v55 = vsel %vm3043_vm8, %v6823_v34, %v3042_v30  ;;  %3317 = vmatprep.mubr.f32.mxu0 %v8109_v17  ;;  %v2424_v14 = vadd.f32 %v6342_v45, %v2318_v49  ;;  %v2671_v27 = vsel %vm2665_vm6, %v8172_v13, %v7122_v6  ;;  %v8181_v1 = vld [vmem:[#allocation60_spill] sm:$0xff]  ;;  %v8182_v30 = vld [vmem:[#allocation69_spill] sm:$0xff] }
 0x60a   : > { %v3079_v3 = vadd.f32 %v3055_v55, %v2953_v42  ;;  %v2427_v34 = vadd.f32 %v8046_v8, %v2321_v38  ;;  %v2698_v37 = vadd.f32 %v2674_v36, %v2572_v25  ;;  %v2926_v8 = vsel %vm2917_vm7, %v8174_v39, %v2908_v48  ;;  %v8183_v36 = vld [vmem:[#allocation59_spill] sm:$0xff]  ;;  %v8185_v25 = vld [vmem:[#allocation72_spill] sm:$0xff] }
 0x60b   : > { %v2566_v41 = vadd.f32 %v2542_v40, %v2424_v14  ;;  %v8186_v40 = vld [vmem:[#allocation89_spill] sm:$0xff] }
 0x60c   : > { %v3115_v22 = vmul.f32 %v6683_v28, %v3079_v3  ;;  %v2900_v2 = vpop.permute.xlu1 %2899  ;;  %4085 = vmatmul.mubr.msk.f32.gmra.mxu0 %vm3228_vm15, %v6965_v16  ;;  %v2766_v44 = vpop.permute.xlu0 %2765  ;;  %v2569_v45 = vadd.f32 %v2545_v47, %v2427_v34  ;;  %v2824_v28 = vadd.f32 %v2800_v52, %v2698_v37  ;;  %v2797_v16 = vsel %vm2791_vm4, %v8175_v51, %v2774_v31  ;;  %v8187_v52 = vld [vmem:[#allocation94_spill] sm:$0xff]  ;;  %v8188_v34 = vld [vmem:[#allocation91_spill] sm:$0xff] }
 0x60d   : > { %3323 = vmatprep.mubr.f32.mxu0 %v8109_v17  ;;  %v2794_v5 = vsel %vm2791_vm4, %v8176_v61, %v2766_v44  ;;  %v2692_v12 = vadd.f32 %v2668_v7, %v2566_v41  ;;  %v2923_v18 = vsel %vm2917_vm7, %v8177_v50, %v2900_v2 }
 0x60e   : > { %v3151_v4 = vadd.f32 %v6836_v21, %v3115_v22  ;;  %v2695_v6 = vadd.f32 %v2671_v27, %v2569_v45  ;;  %v2950_v54 = vadd.f32 %v2926_v8, %v2824_v28  ;;  %v8178_v21 = vld [vmem:[#allocation62_spill] sm:$0xff] }
 0x60f   : > { %v2818_v56 = vadd.f32 %v2794_v5, %v2692_v12 }
 0x610   : > { %v2892_v53 = vpop.permute.xlu1 %2891  ;;  %4086 = vmatmul.mubr.msk.f32.gmra.mxu0 %vm3228_vm15, %v6999_v23  ;;  %v3034_v33 = vpop.permute.xlu0 %3033  ;;  %v7214_v46 = vmax.f32 %v3151_v4, 0.0  ;;  %v2821_v31 = vadd.f32 %v2797_v16, %v2695_v6 }
 0x611   : > { %v2920_v57 = vsel %vm2917_vm7, %v8178_v21, %v2892_v53  ;;  %v3052_v59 = vsel %vm3043_vm8, %v8179_v35, %v3034_v33  ;;  %4147 = vmatprep.mubr.msk.f32.mxu0 %vm3228_vm15, %v7035_v15 }
 0x612   : > { %v3076_v26 = vadd.f32 %v3052_v59, %v2950_v54  ;;  %4139 = vmatprep.subr.mxu0 %v7214_v46  ;;  %v2947_v23 = vadd.f32 %v2923_v18, %v2821_v31  ;;  %v2944_v58 = vadd.f32 %v2920_v57, %v2818_v56 }
 0x613   : > { %4140 = vmatpush3.msra.mxu0 %v7214_v46 }
 0x614   : > { %v3112_v60 = vmul.f32 %v6821_v24, %v3076_v26  ;;  %v3018_v43 = vpop.permute.xlu1 %3017  ;;  %v3026_v0 = vpop.permute.xlu0 %3025  ;;  %v8184_v24 = vld [vmem:[#allocation65_spill] sm:$0xff] }
 0x615   : > { %v3046_v19 = vsel %vm3043_vm8, %v6913_v63, %v3018_v43  ;;  %v3049_v62 = vsel %vm3043_vm8, %v8180_v29, %v3026_v0 }
 0x616   : > { %v3070_v15 = vadd.f32 %v3046_v19, %v2944_v58  ;;  %v3073_v20 = vadd.f32 %v3049_v62, %v2947_v23  ;;  %v3148_v42 = vadd.f32 %v8181_v1, %v3112_v60 }
 0x618   : > { %v3106_v48 = vmul.f32 %v8182_v30, %v3070_v15  ;;  %v3109_v55 = vmul.f32 %v8183_v36, %v3073_v20  ;;  %v7234_v38 = vmax.f32 %v3148_v42, 0.0  ;;  %v7264_v8 = vpop.permute.xlu0 %3622  ;;  %v7266_v41 = vpop.permute.xlu1 %3617 }
 0x61a   : > { %4141 = vmatprep.subr.mxu0 %v7234_v38  ;;  %v3145_v49 = vadd.f32 %v8184_v24, %v3109_v55  ;;  %v3142_v3 = vadd.f32 %v8185_v25, %v3106_v48 }
 0x61b   : > { %4142 = vmatpush3.msra.mxu0 %v7234_v38 }
 0x61c   : > { %v7240_v63 = vmax.f32 %v3145_v49, 0.0  ;;  %v7243_v47 = vmax.f32 %v3142_v3, 0.0  ;;  %v7268_v16 = vpop.permute.xlu0 %3658  ;;  %v3613_v6 = vpop.permute.xlu1 %3612 }
 0x61e   : > { %4143 = vmatprep.subr.mxu0 %v7240_v63 }
 0x61f   : > { %4144 = vmatpush3.msra.mxu0 %v7240_v63 }
 0x620   : > { %4145 = vmatprep.subr.mxu0 %v7243_v47  ;;  %v3654_v57 = vpop.permute.xlu0 %3653  ;;  %v3608_v58 = vpop.permute.xlu1 %3607 }
 0x621   : > { %4146 = vmatpush3.msra.mxu0 %v7243_v47 }
 0x622   : > { %4148 = vmatmul.mubr.msk.f32.vlgmr.msra.gmra.mxu0 %vm3228_vm15, %v8186_v40 }
 0x623   : > { %4150 = vmatprep.mubr.msk.f32.mxu0 %vm3228_vm15, %v8187_v52 }
 0x624   : > { %v3644_v24 = vpop.permute.xlu1 %3643 }
 0x625   : > { %v3649_v42 = vpop.permute.xlu0 %3648 }
 0x626   : > { %4151 = vmatmul.mubr.msk.f32.gmra.mxu0 %vm3228_vm15, %v8188_v34 }
 0x627   : > { %3770 = vmatprep.mubr.f32.mxu0 %v8109_v17 }
 0x6a3   : > { %v7256_v14 = vpop.f32.mrf.mxu1 }
 0x6a5   : > { %v7258_v37 = vpop.f32.mrf.mxu1 }
 0x6a7   : > { %v7260_v22 = vpop.f32.mrf.mxu1 }
 0x6a9   : > { %v7262_v2 = vpop.f32.mrf.mxu1 }
 0x6ab   : > { %v3493_v44 = vpop.f32.mrf.mxu1 }
 0x6ad   : > { %v3495_v13 = vpop.f32.mrf.mxu1 }
 0x6af   : > { %v3499_v27 = vpop.f32.mrf.mxu1 }
 0x6b1   : > { %v3501_v10 = vpop.f32.mrf.mxu1 }
 0x6b3   : > { %v3505_v39 = vpop.f32.mrf.mxu1 }
 0x6b5   : > { %v3507_v4 = vpop.f32.mrf.mxu1 }
 0x6b7   : > { %v3511_v5 = vpop.f32.mrf.mxu1 }
 0x6b9   : > { %v3513_v50 = vpop.f32.mrf.mxu1 }
 0x6c4   : > { %v3307_v7 = vpop.f32.mrf.mxu0 }
 0x6c5   : > { %v3494_v60 = vadd.f32 %v3493_v44, %v3307_v7  ;;  %v3685_v7 = vld [vmem:[%s7351_s8] sm:$0x1] }
 0x6c6   : > { %v3309_v45 = vpop.f32.mrf.mxu0 }
 0x6c7   : > { %v3496_v31 = vadd.f32 %v3495_v13, %v3309_v45  ;;  %v3625_v30 = vmul.f32 %v3608_v58, %v3494_v60 }
 0x6c8   : > { %v3313_v28 = vpop.f32.mrf.mxu0 }
 0x6c9   : > { %v3500_v35 = vadd.f32 %v3499_v27, %v3313_v28  ;;  %v3626_v15 = vmul.f32 %v3608_v58, %v3496_v31  ;;  %v3661_v52 = vadd.f32 %v3644_v24, %v3625_v30 }
 0x6ca   : > { %v3315_v51 = vpop.f32.mrf.mxu0 }
 0x6cb   : > { %v3502_v18 = vadd.f32 %v3501_v10, %v3315_v51  ;;  %v3628_v29 = vmul.f32 %v3613_v6, %v3500_v35  ;;  %v3662_v40 = vadd.f32 %v3644_v24, %v3626_v15  ;;  %v3673_v10 = vmax.f32 %v3661_v52, 0.0 }
 0x6cc   : > { %v3319_v61 = vpop.f32.mrf.mxu0 }
 0x6cd   : > { %v3506_v53 = vadd.f32 %v3505_v39, %v3319_v61  ;;  %v3629_v0 = vmul.f32 %v3613_v6, %v3502_v18  ;;  %v3664_v49 = vadd.f32 %v3649_v42, %v3628_v29  ;;  %v3674_v27 = vmax.f32 %v3662_v40, 0.0 }
 0x6ce   : > { %v3321_v12 = vpop.f32.mrf.mxu0 }
 0x6cf   : > { %v3508_v54 = vadd.f32 %v3507_v4, %v3321_v12  ;;  %v3631_v43 = vmul.f32 %v7266_v41, %v3506_v53  ;;  %v3665_v55 = vadd.f32 %v3649_v42, %v3629_v0  ;;  %v3676_v13 = vmax.f32 %v3664_v49, 0.0 }
 0x6d0   : > { %v3325_v33 = vpop.f32.mrf.mxu0 }
 0x6d1   : > { %v3512_v21 = vadd.f32 %v3511_v5, %v3325_v33  ;;  %v3632_v56 = vmul.f32 %v7266_v41, %v3508_v54  ;;  %v3667_v48 = vadd.f32 %v3654_v57, %v3631_v43  ;;  %v3677_v44 = vmax.f32 %v3665_v55, 0.0 }
 0x6d2   : > { %v3327_v59 = vpop.f32.mrf.mxu0 }
 0x6d3   : > { %v3634_v26 = vmul.f32 %v7264_v8, %v3512_v21  ;;  %v3514_v23 = vadd.f32 %v3513_v50, %v3327_v59  ;;  %v3668_v1 = vadd.f32 %v3654_v57, %v3632_v56  ;;  %v3679_v34 = vmax.f32 %v3667_v48, 0.0 }
 0x6d5   : > { %v3635_v19 = vmul.f32 %v7264_v8, %v3514_v23  ;;  %v3670_v62 = vadd.f32 %v7268_v16, %v3634_v26  ;;  %v3680_v3 = vmax.f32 %v3668_v1, 0.0 }
 0x6d7   : > { %v3671_v20 = vadd.f32 %v7268_v16, %v3635_v19  ;;  %v3682_v25 = vmax.f32 %v3670_v62, 0.0 }
 0x6d9   : > { %v3683_v36 = vmax.f32 %v3671_v20, 0.0 }
 0x6db   : > { %3730 = vmatprep.subr.mxu0 %v3683_v36 }
 0x6dc   : > { %3731 = vmatpush1.msra.mxu0 %v3682_v25 }
 0x6dd   : > { %3732 = vmatprep.subr.mxu0 %v3680_v3 }
 0x6de   : > { %3733 = vmatpush1.msra.mxu0 %v3679_v34 }
 0x6df   : > { %3734 = vmatprep.subr.mxu0 %v3677_v44 }
 0x6e0   : > { %3735 = vmatpush1.msra.mxu0 %v3676_v13 }
 0x6e1   : > { %3736 = vmatprep.subr.mxu0 %v3674_v27 }
 0x6e2   : > { %v4149_v39 = vpop.f32.mrf.mxu0  ;;  %3737 = vmatpush1.msra.mxu0 %v3673_v10 }
 0x6e3   : > { %4099 = vmatmul.mubr.msk.f32.vlgmr.msra.gmra.mxu0 %vm3228_vm15, %v3685_v7  ;;  %v3588_v28 = vadd.f32 %v4149_v39, %v7256_v14 }
 0x6e4   : > { %v3582_v45 = vpop.f32.mrf.mxu0 }
 0x6e5   : > { %v3583_v51 = vadd.f32 %v3582_v45, %v7258_v37  ;;  %v3630_v12 = vmul.f32 %v3613_v6, %v3588_v28  ;;  %v3686_v6 = vld [vmem:[%s7352_s9] sm:$0x7] }
 0x6e6   : > { %v4152_v4 = vpop.f32.mrf.mxu0 }
 0x6e7   : > { %v3598_v61 = vadd.f32 %v4152_v4, %v7260_v22  ;;  %v3627_v33 = vmul.f32 %v3608_v58, %v3583_v51  ;;  %v3666_v21 = vadd.f32 %v3649_v42, %v3630_v12 }
 0x6e8   : > { %v3592_v5 = vpop.f32.mrf.mxu0 }
 0x6e9   : > { %v3636_v54 = vmul.f32 %v7264_v8, %v3598_v61  ;;  %v3593_v53 = vadd.f32 %v3592_v5, %v7262_v2  ;;  %v3663_v14 = vadd.f32 %v3644_v24, %v3627_v33  ;;  %v3678_v37 = vmax.f32 %v3666_v21, 0.0  ;;  %v8189_v33 = vld [vmem:[#allocation96_spill] sm:$0xff] }
 0x6ea   : > { %v3688_v2 = vlaneseq }
 0x6eb   : > { %v3672_v50 = vadd.f32 %v7268_v16, %v3636_v54  ;;  %v3633_v18 = vmul.f32 %v7266_v41, %v3593_v53  ;;  %v3675_v22 = vmax.f32 %v3663_v14, 0.0  ;;  %v8192_v14 = vld [vmem:[#allocation90_spill] sm:$0xff] }
 0x6ec   : > { %v3689_v8 = vshrl.u32 %v3688_v2, 7  ;;  %v8194_v2 = vld [vmem:[#allocation63_spill] sm:$0xff] }
 0x6ed   : > { %v3684_v35 = vmax.f32 %v3672_v50, 0.0  ;;  %v3669_v59 = vadd.f32 %v3654_v57, %v3633_v18  ;;  %v8190_v18 = vld [vmem:[#allocation95_spill] sm:$0xff] }
 0x6ee   : > { %v3690_v41 = vsub.s32 0, %v3689_v8  ;;  %v3694_v16 = vsub.s32 1, %v3689_v8  ;;  %v3698_v58 = vsub.s32 2, %v3689_v8  ;;  %v8195_v8 = vld [vmem:[#allocation87_spill] sm:$0xff] }
 0x6ef   : > { %v3681_v31 = vmax.f32 %v3669_v59, 0.0  ;;  %4154 = vmatpush3.msra.mxu1 %v3684_v35  ;;  %v8191_v35 = vld [vmem:[#allocation68_spill] sm:$0xff] }
 0x6f0   : > { %4155 = vmatprep.subr.mxu1 %v8109_v17  ;;  %v3691_v56 = vrot.slane %v3686_v6, %v3690_v41  ;;  %v3695_v26 = vrot.slane %v3686_v6, %v3694_v16  ;;  %v8197_v16 = vld [vmem:[#allocation54_spill] sm:$0xff] }
 0x6f1   : > { %4156 = vmatpush3.msra.mxu1 %v3681_v31 }
 0x6f2   : > { %4157 = vmatprep.subr.mxu1 %v8109_v17 }
 0x6f3   : > { %4158 = vmatpush3.msra.mxu1 %v3678_v37  ;;  %v8193_v37 = vld [vmem:[#allocation86_spill] sm:$0xff] }
 0x6f4   : > { %4159 = vmatprep.subr.mxu1 %v8109_v17  ;;  %v3699_v17 = vrot.slane %v3686_v6, %v3698_v58 }
 0x6f5   : > { %4160 = vmatpush3.msra.mxu1 %v3675_v22 }
 0x6f6   : > { %4162 = vmatmul.mubr.msk.f32.vlgmr.msra.gmra.mxu1 %vm3228_vm15, %v3685_v7 }
 0x7a3   : > { %v3772_v57 = vpop.f32.mrf.mxu0 }
 0x7a4   : > { %v3773_v60 = vadd.f32 %v3772_v57, %v3691_v56  ;;  %v8198_v57 = vld [vmem:[#allocation83_spill] sm:$0xff] }
 0x7a5   : > { %v3774_v23 = vpop.f32.mrf.mxu0  ;;  %v8199_v56 = vmax.f32 %v8198_v57, 0.0 }
 0x7a6   : > { %v3775_v43 = vadd.f32 %v3774_v23, %v3695_v26  ;;  %v3848_v0 = vsel %vm3847_vm10, %v3773_v60, -inf  ;;  %v8200_v23 = vld [vmem:[#allocation84_spill] sm:$0xff] }
 0x7a7   : > { %v8201_v58 = vmax.f32 %v8200_v23, 0.0 }
 0x7a8   : > { %v3849_v19 = vsel %vm3847_vm10, %v3775_v43, -inf }
 0x7a9   : > { %v3852_v15 = vmax.f32 %v3848_v0, %v3849_v19 }
 0x7b6   : > { %v3843_v29 = vpop.f32.mrf.mxu1 }
 0x7b7   : > { %v3844_v62 = vadd.f32 %v3843_v29, %v3699_v17  ;;  %v8202_v17 = vld [vmem:[#allocation80_spill] sm:$0xff]  ;;  %v8204_v29 = vld [vmem:[#allocation77_spill] sm:$0xff] }
 0x7b8   : > { %v4163_v20 = vpop.f32.mrf.mxu1  ;;  %v8203_v0 = vmax.f32 %v8202_v17, 0.0 }
 0x7b9   : > { %v3851_v1 = vsel %vm3850_vm11, %v3844_v62, -inf }
 0x7ba   : > { %v3853_v42 = vmax.f32 %v3852_v15, %v3851_v1  ;;  %v8206_v1 = vld [vmem:[#allocation78_spill] sm:$0xff] }
 0x7bc   : > { %3854 = vmax.xlane.f32.xlu0 %v3853_v42  ;;  %v8207_v42 = vmax.f32 %v8206_v1, 0.0 }
 0x845   : > { %v3855_v30 = vpop.xlane.xlu0 %3854 }
 0x846   : > { %v3856_v48 = vsub.f32 %v3773_v60, %v3855_v30  ;;  %v3857_v36 = vsub.f32 %v3775_v43, %v3855_v30  ;;  %v3858_v55 = vsub.f32 %v3844_v62, %v3855_v30  ;;  %v8205_v62 = vmax.f32 %v8204_v29, 0.0 }
 0x848   : > { %v3859_v24 = vmul.f32 1.442695, %v3856_v48  ;;  %v3861_v49 = vmul.f32 1.442695, %v3857_v36  ;;  %v3863_v25 = vmul.f32 1.442695, %v3858_v55 }
 0x849   : > { %v8208_v48 = vld [vmem:[#allocation74_spill] sm:$0xff] }
 0x84a   : > { %4202 = vpow2.f32 %v3859_v24  ;;  %v8209_v36 = vmax.f32 %v8208_v48, 0.0 }
 0x84b   : > { %4204 = vpow2.f32 %v3861_v49  ;;  %v8210_v49 = vld [vmem:[#allocation75_spill] sm:$0xff] }
 0x84c   : > { %4206 = vpow2.f32 %v3863_v25  ;;  %v8211_v25 = vmax.f32 %v8210_v49, 0.0 }
 0x857   : > { %v4203_v3 = vpop.eup %4202 }
 0x858   : > { %v4205_v40 = vpop.eup %4204  ;;  %v3865_v52 = vsel %vm3847_vm10, %v4203_v3, 0.0 }
 0x859   : > { %v4207_v34 = vpop.eup %4206  ;;  %v3866_v44 = vsel %vm3847_vm10, %v4205_v40, 0.0 }
 0x85a   : > { %v3867_v13 = vadd.f32 %v3866_v44, %v3865_v52  ;;  %v3868_v27 = vsel %vm3850_vm11, %v4207_v34, 0.0 }
 0x85c   : > { %v3869_v10 = vadd.f32 %v3868_v27, %v3867_v13 }
 0x85e   : > { %3870 = vadd.xlane.f32.xlu1 %v3869_v10 }
 0x8e7   : > { %v3871_v7 = vpop.xlane.xlu1 %3870 }
 0x8e8   : > { %4208 = vrcp.f32 %v3871_v7 }
 0x8f5   : > { %v4209_v39 = vpop.eup %4208 }
 0x8f6   : > { %v3873_v45 = vmul.f32 %v4209_v39, %v4203_v3  ;;  %v3874_v28 = vmul.f32 %v4209_v39, %v4205_v40  ;;  %v3875_v4 = vmul.f32 %v4209_v39, %v4207_v34 }
 0x8f8   : > { %v3879_v51 = vrot.slane %v3873_v45, %v3690_v41  ;;  %v3883_v61 = vrot.slane %v3874_v28, %v3690_v41  ;;  %v3887_v5 = vrot.slane %v3875_v4, %v3690_v41  ;;  %v8196_v41 = vld [vmem:[#allocation81_spill] sm:$0xff] }
 0x8fa   : > { %v3888_v12 = vmul.f32 %v3879_v51, %v7151_v32  ;;  %v3889_v54 = vmul.f32 %v3883_v61, %v7148_v9  ;;  %v3890_v53 = vmul.f32 %v3887_v5, %v6946_v11  ;;  %v3891_v50 = vmul.f32 %v3879_v51, %v8189_v33 }
 0x8fb   : > { %v3892_v21 = vmul.f32 %v3883_v61, %v8190_v18  ;;  %v3893_v59 = vmul.f32 %v3887_v5, %v8191_v35  ;;  %v3894_v31 = vmul.f32 %v3879_v51, %v8192_v14  ;;  %v3895_v22 = vmul.f32 %v3883_v61, %v8193_v37 }
 0x8fc   : > { %v3896_v32 = vmul.f32 %v3887_v5, %v8194_v2  ;;  %v3897_v9 = vmul.f32 %v3879_v51, %v8195_v8  ;;  %v3898_v11 = vmul.f32 %v3883_v61, %v8196_v41  ;;  %v3899_v6 = vmul.f32 %v3887_v5, %v8197_v16 }
 0x8fd   : > { %v3900_v26 = vadd.f32 %v3888_v12, %v8199_v56  ;;  %v3901_v60 = vadd.f32 %v3889_v54, %v8201_v58  ;;  %v3902_v43 = vadd.f32 %v3890_v53, %v7243_v47  ;;  %v3903_v19 = vadd.f32 %v3891_v50, %v8203_v0  ;;  %v8212_v47 = vld [vmem:[#allocation71_spill] sm:$0xff] }
 0x8fe   : > { %v3904_v15 = vadd.f32 %v3892_v21, %v8205_v62  ;;  %v3905_v20 = vadd.f32 %v3893_v59, %v7240_v63  ;;  %v3906_v30 = vadd.f32 %v3894_v31, %v8207_v42  ;;  %v3907_v55 = vadd.f32 %v3895_v22, %v8209_v36 }
 0x8ff   : > { %v3908_v24 = vadd.f32 %v3896_v32, %v7234_v38  ;;  %v3909_v3 = vadd.f32 %v3897_v9, %v8211_v25  ;;  %v8213_v40 = vmax.f32 %v8212_v47, 0.0  ;;  %v3911_v34 = vadd.f32 %v3899_v6, %v7214_v46  ;;  %3912 = vst [vmem:[%s359_s12] sm:$0xff] %v3900_v26  ;;  %3913 = vst [vmem:[%s359_s12 + $0x8] sm:$0xff] %v3901_v60 }
 0x900   : > { %3914 = vst.msk [vmem:[%s359_s12 + $0x10] sm:$0xff] %vm2401_vm3, %v3902_v43  ;;  %3915 = vst [vmem:[%s359_s12 + $0x18] sm:$0xff] %v3903_v19 }
 0x901   : > { %v3910_v52 = vadd.f32 %v3898_v11, %v8213_v40  ;;  %3916 = vst [vmem:[%s359_s12 + $0x20] sm:$0xff] %v3904_v15  ;;  %3917 = vst.msk [vmem:[%s359_s12 + $0x28] sm:$0xff] %vm2401_vm3, %v3905_v20 }
 0x902   : > { %3918 = vst [vmem:[%s359_s12 + $0x30] sm:$0xff] %v3906_v30  ;;  %3919 = vst [vmem:[%s359_s12 + $0x38] sm:$0xff] %v3907_v55 }
 0x903   : > { %3920 = vst.msk [vmem:[%s359_s12 + $0x40] sm:$0xff] %vm2401_vm3, %v3908_v24  ;;  %3921 = vst [vmem:[%s359_s12 + $0x48] sm:$0xff] %v3909_v3 }
 0x904   : > { %3922 = vst [vmem:[%s359_s12 + $0x50] sm:$0xff] %v3910_v52  ;;  %3923 = vst.msk [vmem:[%s359_s12 + $0x58] sm:$0xff] %vm2401_vm3, %v3911_v34 }
 0x905 PF: > { %s20_s13 = sadd.s32 1, %s4242_s13  }
 0x906   : > { %p17_p4 = scmp.ge.s32.totalorder %s20_s13, 4  }
 0x908   :  { %19 = sbr.rel (!%p17_p4) target bundleno = 1 (0x1), region = 114 }

</bundles_post_ra>
